<compile_context>
chip_gen: v5e
topology: v5e:2x2
jax: 0.10.0
libtpu: 0.0.40
codegen_flags: <defaults>
</compile_context>

<pallas_src>
import jax
import jax.numpy as jnp
from jax import lax
from jax.experimental import pallas as pl
from jax.experimental.pallas import tpu as pltpu


def _upsample_conv_kernel(core_ref, halo_ref, w_ref, b_ref, o_ref):
    """Fused nearest-x2 upsample + Conv3d(3,1,1) for one (batch, depth-tile).

    core_ref: (1, TD, H+2, W+2, Ci)  bf16  original-res rows of this depth tile,
                                            zero-padded in H/W only.
    halo_ref: (1, 2, H+2, W+2, Ci)   bf16  [row before tile, row after tile]
                                            (zero planes at the volume border).
    w_ref:    (8, 8*Ci, Co)          bf16  polyphase-folded weights:
                                            [phase a*4+b*2+c, (td*4+th*2+tw)*Ci+ci, co]
    b_ref:    (1, Co)                f32
    o_ref:    (1, 8*TD, H, W, Co)    f32   phase-major output: rows
                                            [phase*TD:(phase+1)*TD] hold phase (a,b,c).
    """
    TD = core_ref.shape[1]
    Ci = core_ref.shape[-1]
    H, W, Co = o_ref.shape[2], o_ref.shape[3], o_ref.shape[4]

    halo = halo_ref[0]                                        # (2, H+2, W+2, Ci)
    # Depth-padded original-resolution slab for this tile.
    xd = jnp.concatenate([halo[0:1], core_ref[0], halo[1:2]], axis=0)  # (TD+2, H+2, W+2, Ci)

    bias_v = b_ref[...]                                       # (1, Co) f32

    # Polyphase identity (nearest x2 then conv3 pad1):
    #   out[2i+a, 2j+b, 2k+c] = sum_{td,th,tw in {0,1}}
    #       xd[i+a+td, j+b+th, k+c+tw, :] @ Wfold[a,b,c,td,th,tw]
    for pb in range(2):
        for pc in range(2):
            # im2col slab shared by phases (0,pb,pc) and (1,pb,pc); K = 8*Ci.
            pieces = [
                xd[td:td + TD + 1, pb + th:pb + th + H, pc + tw:pc + tw + W, :]
                for td in range(2) for th in range(2) for tw in range(2)
            ]
            g = jnp.concatenate(pieces, axis=-1)              # (TD+1, H, W, 8*Ci)
            for pa in range(2):
                phase = pa * 4 + pb * 2 + pc
                lhs = g[pa:pa + TD].reshape(TD * H * W, 8 * Ci)
                acc = jnp.dot(lhs, w_ref[phase],
                              preferred_element_type=jnp.float32)
                acc = acc + bias_v
                o_ref[0, phase * TD:(phase + 1) * TD] = (
                    acc.reshape(TD, H, W, Co).astype(o_ref.dtype))


def _fold_weights(weight_oidhw):
    """(Co, Ci, 3, 3, 3) -> polyphase-folded (8, 8*Ci, Co), f32."""
    w_t = jnp.transpose(weight_oidhw, (2, 3, 4, 1, 0)).astype(jnp.float32)  # (kd,kh,kw,Ci,Co)
    # f[a, t, k]: which original taps k fold into reduced tap t for output phase a.
    f = jnp.array([[[1., 0., 0.], [0., 1., 1.]],
                   [[1., 1., 0.], [0., 0., 1.]]], jnp.float32)
    wf = jnp.einsum('adp,beq,cfr,pqrio->abcdefio', f, f, f, w_t)  # (2,2,2,2,2,2,Ci,Co)
    ci, co = w_t.shape[3], w_t.shape[4]
    return wf.reshape(8, 8 * ci, co)


def _pick_tile_d(D, H, W, Ci, Co, budget_bytes=20 * 1024 * 1024):
    """Largest divisor of D whose per-step VMEM footprint fits a conservative budget."""
    Hp, Wp = H + 2, W + 2
    best = 1
    for td in range(1, D + 1):
        if D % td:
            continue
        blocks = (2 * td * Hp * Wp * Ci * 2        # core block (bf16, double-buffered)
                  + 2 * 2 * Hp * Wp * Ci * 2       # halo block
                  + 2 * 8 * 8 * Ci * Co * 2        # folded weights
                  + 2 * 8 * td * H * W * Co * 4)   # output block (f32)
        temps = ((td + 2) * Hp * Wp * Ci * 2       # depth-padded slab
                 + 2 * (td + 1) * H * W * 8 * Ci * 2   # im2col slab (+ slack)
                 + 2 * td * H * W * Co * 4)        # per-phase f32 matmul result
        if blocks + temps <= budget_bytes:
            best = td
    return best


def upsample_forward(x_ncdhw, weight_oidhw, bias, with_conv=True, tile_d=None):
    """Equivalent of Upsample.forward for the default ('3d', no keep_*) config.

    x_ncdhw: (N, C, D, H, W) float32
    weight_oidhw: (Cout, Cin, 3, 3, 3)
    bias: (Cout,)
    returns (N, Cout, 2D, 2H, 2W) float32
    """
    N, C, D, H, W = x_ncdhw.shape

    if not with_conv:
        u = jnp.broadcast_to(x_ncdhw[:, :, :, None, :, None, :, None],
                             (N, C, D, 2, H, 2, W, 2))
        return u.reshape(N, C, 2 * D, 2 * H, 2 * W)

    Ci = C
    Co = weight_oidhw.shape[0]
    if tile_d is None:
        tile_d = _pick_tile_d(D, H, W, Ci, Co)
    assert D % tile_d == 0, (D, tile_d)
    nD = D // tile_d
    Hp, Wp = H + 2, W + 2

    # Channels-last, bf16 matmul operands, zero pad H/W only
    # (the depth padding / tile halo comes from the small halo-plane array).
    x = jnp.transpose(x_ncdhw, (0, 2, 3, 4, 1)).astype(jnp.bfloat16)     # NDHWC
    x_hw = jnp.pad(x, ((0, 0), (0, 0), (1, 1), (1, 1), (0, 0)))          # (N, D, Hp, Wp, Ci)

    zplane = jnp.zeros((N, 1, Hp, Wp, Ci), x_hw.dtype)
    halo_lo = jnp.concatenate([zplane, x_hw[:, tile_d - 1:D - 1:tile_d]], axis=1)  # (N, nD, ...)
    halo_hi = jnp.concatenate([x_hw[:, tile_d::tile_d], zplane], axis=1)           # (N, nD, ...)
    halo = jnp.stack([halo_lo, halo_hi], axis=2).reshape(N, nD * 2, Hp, Wp, Ci)

    wf = _fold_weights(weight_oidhw).astype(jnp.bfloat16)    # (8, 8*Ci, Co)
    b2 = bias.reshape(1, Co).astype(jnp.float32)

    out_k = pl.pallas_call(
        _upsample_conv_kernel,
        out_shape=jax.ShapeDtypeStruct((N, nD * 8 * tile_d, H, W, Co), jnp.float32),
        grid=(N, nD),
        in_specs=[
            pl.BlockSpec((1, tile_d, Hp, Wp, Ci), lambda n, d: (n, d, 0, 0, 0)),
            pl.BlockSpec((1, 2, Hp, Wp, Ci), lambda n, d: (n, d, 0, 0, 0)),
            pl.BlockSpec((8, 8 * Ci, Co), lambda n, d: (0, 0, 0)),
            pl.BlockSpec((1, Co), lambda n, d: (0, 0)),
        ],
        out_specs=pl.BlockSpec((1, 8 * tile_d, H, W, Co),
                               lambda n, d: (n, d, 0, 0, 0)),
        compiler_params=pltpu.CompilerParams(
            dimension_semantics=("parallel", "parallel"),
            vmem_limit_bytes=48 * 1024 * 1024),
    )(x_hw, halo, wf, b2)

    # De-interleave the 8 sub-pixel phases; this fuses with the NCDHW transpose
    # we need anyway, so it is a single output-sized copy in XLA.
    out = out_k.reshape(N, nD, 2, 2, 2, tile_d, H, W, Co)     # (n, d, a, b, c, i, j, k, co)
    out = jnp.transpose(out, (0, 8, 1, 5, 2, 6, 3, 7, 4))     # (n, co, d, i, a, j, b, k, c)
    return out.reshape(N, Co, 2 * D, 2 * H, 2 * W)


def reference_forward(x_ncdhw, weight_oidhw, bias):
    """Pure-JAX reference (mirrors torch interpolate(nearest, x2) + Conv3d), f32."""
    x = jnp.repeat(x_ncdhw, 2, axis=2)
    x = jnp.repeat(x, 2, axis=3)
    x = jnp.repeat(x, 2, axis=4)
    y = lax.conv_general_dilated(
        x, weight_oidhw, window_strides=(1, 1, 1),
        padding=((1, 1), (1, 1), (1, 1)),
        dimension_numbers=("NCDHW", "OIDHW", "NCDHW"))
    return y + bias.reshape(1, -1, 1, 1, 1)


if __name__ == "__main__":
    key = jax.random.PRNGKey(0)
    k_x, k_w, k_b = jax.random.split(key, 3)

    # Small shapes consistent with a 3D VAE feature map.
    N, C_in, D, H, W = 2, 16, 8, 8, 8
    C_out = C_in  # Upsample default: out_channels = in_channels

    x = jax.random.normal(k_x, (N, C_in, D, H, W), dtype=jnp.float32)
    weight = 0.1 * jax.random.normal(k_w, (C_out, C_in, 3, 3, 3), dtype=jnp.float32)
    bias = 0.1 * jax.random.normal(k_b, (C_out,), dtype=jnp.float32)

    # tile_d=2 exercises the depth-tiling + halo path (grid = (2, 4)).
    out = upsample_forward(x, weight, bias, with_conv=True, tile_d=2)
    out = jax.block_until_ready(out)
    assert out.shape == (N, C_out, 2 * D, 2 * H, 2 * W), out.shape

    ref = jax.block_until_ready(reference_forward(x, weight, bias))
    # bf16 MXU operands (f32 accumulation) -> looser tolerance than the f32 path.
    assert jnp.allclose(out, ref, atol=8e-2, rtol=8e-2), (
        float(jnp.max(jnp.abs(out - ref))))

    print("KERNEL_OK")
</pallas_src>

<mosaic_0001>
module attributes {stable_mosaic.version = 11 : i64} {
  func.func @_upsample_conv_kernel(%arg0: i32, %arg1: i32, %arg2: memref<1x2x10x10x16xbf16, #tpu.memory_space<vmem>>, %arg3: memref<1x2x10x10x16xbf16, #tpu.memory_space<vmem>>, %arg4: memref<8x128x16xbf16, #tpu.memory_space<vmem>>, %arg5: memref<1x16xf32, #tpu.memory_space<vmem>>, %arg6: memref<1x16x8x8x16xf32, #tpu.memory_space<vmem>>) attributes {dimension_semantics = [#tpu.dimension_semantics<parallel>, #tpu.dimension_semantics<parallel>], iteration_bounds = array<i64: 2, 4>, scalar_prefetch = 0 : i64, scratch_operands = 0 : i64, tpu.core_type = #tpu.core_type<tc>, window_params = [{transform_indices = @transform_0, window_bounds = array<i64: 1, 2, 10, 10, 16>}, {transform_indices = @transform_1, window_bounds = array<i64: 1, 2, 10, 10, 16>}, {pipeline_mode = #tpu.pipeline_mode<synchronous>, transform_indices = @transform_2, window_bounds = array<i64: 8, 128, 16>}, {pipeline_mode = #tpu.pipeline_mode<synchronous>, transform_indices = @transform_3, window_bounds = array<i64: 1, 16>}, {transform_indices = @transform_4, window_bounds = array<i64: 1, 16, 8, 8, 16>}]} {
    %c0 = arith.constant 0 : index
    %c0_0 = arith.constant 0 : index
    %c0_1 = arith.constant 0 : index
    %c0_2 = arith.constant 0 : index
    %c0_3 = arith.constant 0 : index
    %0 = vector.load %arg3[%c0, %c0_0, %c0_1, %c0_2, %c0_3] : memref<1x2x10x10x16xbf16, #tpu.memory_space<vmem>>, vector<1x2x10x10x16xbf16>
    %1 = vector.shape_cast %0 : vector<1x2x10x10x16xbf16> to vector<2x10x10x16xbf16>
    %2 = vector.extract_strided_slice %1 {offsets = [0, 0, 0, 0], sizes = [1, 10, 10, 16], strides = [1, 1, 1, 1]} : vector<2x10x10x16xbf16> to vector<1x10x10x16xbf16>
    %c0_4 = arith.constant 0 : index
    %c0_5 = arith.constant 0 : index
    %c0_6 = arith.constant 0 : index
    %c0_7 = arith.constant 0 : index
    %c0_8 = arith.constant 0 : index
    %3 = vector.load %arg2[%c0_4, %c0_5, %c0_6, %c0_7, %c0_8] : memref<1x2x10x10x16xbf16, #tpu.memory_space<vmem>>, vector<1x2x10x10x16xbf16>
    %4 = vector.shape_cast %3 : vector<1x2x10x10x16xbf16> to vector<2x10x10x16xbf16>
    %5 = vector.extract_strided_slice %1 {offsets = [1, 0, 0, 0], sizes = [1, 10, 10, 16], strides = [1, 1, 1, 1]} : vector<2x10x10x16xbf16> to vector<1x10x10x16xbf16>
    %6 = tpu.concatenate %2, %4, %5 in 0 : vector<1x10x10x16xbf16>, vector<2x10x10x16xbf16>, vector<1x10x10x16xbf16> -> vector<4x10x10x16xbf16>
    %c0_9 = arith.constant 0 : index
    %c0_10 = arith.constant 0 : index
    %7 = vector.load %arg5[%c0_9, %c0_10] : memref<1x16xf32, #tpu.memory_space<vmem>>, vector<1x16xf32>
    %8 = vector.extract_strided_slice %6 {offsets = [0, 0, 0, 0], sizes = [3, 8, 8, 16], strides = [1, 1, 1, 1]} : vector<4x10x10x16xbf16> to vector<3x8x8x16xbf16>
    %9 = vector.extract_strided_slice %6 {offsets = [0, 0, 1, 0], sizes = [3, 8, 8, 16], strides = [1, 1, 1, 1]} : vector<4x10x10x16xbf16> to vector<3x8x8x16xbf16>
    %10 = vector.extract_strided_slice %6 {offsets = [0, 1, 0, 0], sizes = [3, 8, 8, 16], strides = [1, 1, 1, 1]} : vector<4x10x10x16xbf16> to vector<3x8x8x16xbf16>
    %11 = vector.extract_strided_slice %6 {offsets = [0, 1, 1, 0], sizes = [3, 8, 8, 16], strides = [1, 1, 1, 1]} : vector<4x10x10x16xbf16> to vector<3x8x8x16xbf16>
    %12 = vector.extract_strided_slice %6 {offsets = [1, 0, 0, 0], sizes = [3, 8, 8, 16], strides = [1, 1, 1, 1]} : vector<4x10x10x16xbf16> to vector<3x8x8x16xbf16>
    %13 = vector.extract_strided_slice %6 {offsets = [1, 0, 1, 0], sizes = [3, 8, 8, 16], strides = [1, 1, 1, 1]} : vector<4x10x10x16xbf16> to vector<3x8x8x16xbf16>
    %14 = vector.extract_strided_slice %6 {offsets = [1, 1, 0, 0], sizes = [3, 8, 8, 16], strides = [1, 1, 1, 1]} : vector<4x10x10x16xbf16> to vector<3x8x8x16xbf16>
    %15 = vector.extract_strided_slice %6 {offsets = [1, 1, 1, 0], sizes = [3, 8, 8, 16], strides = [1, 1, 1, 1]} : vector<4x10x10x16xbf16> to vector<3x8x8x16xbf16>
    %16 = tpu.concatenate %8, %9, %10, %11, %12, %13, %14, %15 in 3 : vector<3x8x8x16xbf16>, vector<3x8x8x16xbf16>, vector<3x8x8x16xbf16>, vector<3x8x8x16xbf16>, vector<3x8x8x16xbf16>, vector<3x8x8x16xbf16>, vector<3x8x8x16xbf16>, vector<3x8x8x16xbf16> -> vector<3x8x8x128xbf16>
    %17 = vector.extract_strided_slice %16 {offsets = [0, 0, 0, 0], sizes = [2, 8, 8, 128], strides = [1, 1, 1, 1]} : vector<3x8x8x128xbf16> to vector<2x8x8x128xbf16>
    %18 = vector.shape_cast %17 : vector<2x8x8x128xbf16> to vector<128x128xbf16>
    %c0_11 = arith.constant 0 : index
    %c0_12 = arith.constant 0 : index
    %c0_13 = arith.constant 0 : index
    %19 = vector.load %arg4[%c0_11, %c0_12, %c0_13] : memref<8x128x16xbf16, #tpu.memory_space<vmem>>, vector<1x128x16xbf16>
    %20 = vector.shape_cast %19 : vector<1x128x16xbf16> to vector<128x16xbf16>
    %cst = arith.constant dense<0.000000e+00> : vector<128x16xf32>
    %21 = tpu.matmul %18, %20, %cst {dimension_numbers = #tpu.dot_dimension_numbers<[1], [0], [0], [1], [0, 0, 1, 1], [], []>} : vector<128x128xbf16>, vector<128x16xbf16>, vector<128x16xf32> -> vector<128x16xf32>
    %22 = vector.broadcast %7 : vector<1x16xf32> to vector<128x16xf32>
    %23 = arith.addf %21, %22 : vector<128x16xf32>
    %24 = vector.shape_cast %23 : vector<128x16xf32> to vector<2x8x8x16xf32>
    %c0_14 = arith.constant 0 : index
    %c0_15 = arith.constant 0 : index
    %c0_16 = arith.constant 0 : index
    %c0_17 = arith.constant 0 : index
    %c0_18 = arith.constant 0 : index
    %25 = vector.load %arg6[%c0_14, %c0_15, %c0_16, %c0_17, %c0_18] : memref<1x16x8x8x16xf32, #tpu.memory_space<vmem>>, vector<1x2x8x8x16xf32>
    %26 = vector.shape_cast %25 : vector<1x2x8x8x16xf32> to vector<2x8x8x16xf32>
    %27 = vector.shape_cast %24 : vector<2x8x8x16xf32> to vector<1x2x8x8x16xf32>
    tpu.vector_store %arg6[%c0_14, %c0_15, %c0_16, %c0_17, %c0_18], %27 {strides = array<i32>} : memref<1x16x8x8x16xf32, #tpu.memory_space<vmem>>, vector<1x2x8x8x16xf32>,
    %28 = vector.extract_strided_slice %16 {offsets = [1, 0, 0, 0], sizes = [2, 8, 8, 128], strides = [1, 1, 1, 1]} : vector<3x8x8x128xbf16> to vector<2x8x8x128xbf16>
    %29 = vector.shape_cast %28 : vector<2x8x8x128xbf16> to vector<128x128xbf16>
    %c4 = arith.constant 4 : index
    %c0_19 = arith.constant 0 : index
    %c0_20 = arith.constant 0 : index
    %30 = vector.load %arg4[%c4, %c0_19, %c0_20] : memref<8x128x16xbf16, #tpu.memory_space<vmem>>, vector<1x128x16xbf16>
    %31 = vector.shape_cast %30 : vector<1x128x16xbf16> to vector<128x16xbf16>
    %cst_21 = arith.constant dense<0.000000e+00> : vector<128x16xf32>
    %32 = tpu.matmul %29, %31, %cst_21 {dimension_numbers = #tpu.dot_dimension_numbers<[1], [0], [0], [1], [0, 0, 1, 1], [], []>} : vector<128x128xbf16>, vector<128x16xbf16>, vector<128x16xf32> -> vector<128x16xf32>
    %33 = vector.broadcast %7 : vector<1x16xf32> to vector<128x16xf32>
    %34 = arith.addf %32, %33 : vector<128x16xf32>
    %35 = vector.shape_cast %34 : vector<128x16xf32> to vector<2x8x8x16xf32>
    %c0_22 = arith.constant 0 : index
    %c8 = arith.constant 8 : index
    %c0_23 = arith.constant 0 : index
    %c0_24 = arith.constant 0 : index
    %c0_25 = arith.constant 0 : index
    %36 = vector.load %arg6[%c0_22, %c8, %c0_23, %c0_24, %c0_25] : memref<1x16x8x8x16xf32, #tpu.memory_space<vmem>>, vector<1x2x8x8x16xf32>
    %37 = vector.shape_cast %36 : vector<1x2x8x8x16xf32> to vector<2x8x8x16xf32>
    %38 = vector.shape_cast %35 : vector<2x8x8x16xf32> to vector<1x2x8x8x16xf32>
    tpu.vector_store %arg6[%c0_22, %c8, %c0_23, %c0_24, %c0_25], %38 {strides = array<i32>} : memref<1x16x8x8x16xf32, #tpu.memory_space<vmem>>, vector<1x2x8x8x16xf32>,
    %39 = vector.extract_strided_slice %6 {offsets = [0, 0, 1, 0], sizes = [3, 8, 8, 16], strides = [1, 1, 1, 1]} : vector<4x10x10x16xbf16> to vector<3x8x8x16xbf16>
    %40 = vector.extract_strided_slice %6 {offsets = [0, 0, 2, 0], sizes = [3, 8, 8, 16], strides = [1, 1, 1, 1]} : vector<4x10x10x16xbf16> to vector<3x8x8x16xbf16>
    %41 = vector.extract_strided_slice %6 {offsets = [0, 1, 1, 0], sizes = [3, 8, 8, 16], strides = [1, 1, 1, 1]} : vector<4x10x10x16xbf16> to vector<3x8x8x16xbf16>
    %42 = vector.extract_strided_slice %6 {offsets = [0, 1, 2, 0], sizes = [3, 8, 8, 16], strides = [1, 1, 1, 1]} : vector<4x10x10x16xbf16> to vector<3x8x8x16xbf16>
    %43 = vector.extract_strided_slice %6 {offsets = [1, 0, 1, 0], sizes = [3, 8, 8, 16], strides = [1, 1, 1, 1]} : vector<4x10x10x16xbf16> to vector<3x8x8x16xbf16>
    %44 = vector.extract_strided_slice %6 {offsets = [1, 0, 2, 0], sizes = [3, 8, 8, 16], strides = [1, 1, 1, 1]} : vector<4x10x10x16xbf16> to vector<3x8x8x16xbf16>
    %45 = vector.extract_strided_slice %6 {offsets = [1, 1, 1, 0], sizes = [3, 8, 8, 16], strides = [1, 1, 1, 1]} : vector<4x10x10x16xbf16> to vector<3x8x8x16xbf16>
    %46 = vector.extract_strided_slice %6 {offsets = [1, 1, 2, 0], sizes = [3, 8, 8, 16], strides = [1, 1, 1, 1]} : vector<4x10x10x16xbf16> to vector<3x8x8x16xbf16>
    %47 = tpu.concatenate %39, %40, %41, %42, %43, %44, %45, %46 in 3 : vector<3x8x8x16xbf16>, vector<3x8x8x16xbf16>, vector<3x8x8x16xbf16>, vector<3x8x8x16xbf16>, vector<3x8x8x16xbf16>, vector<3x8x8x16xbf16>, vector<3x8x8x16xbf16>, vector<3x8x8x16xbf16> -> vector<3x8x8x128xbf16>
    %48 = vector.extract_strided_slice %47 {offsets = [0, 0, 0, 0], sizes = [2, 8, 8, 128], strides = [1, 1, 1, 1]} : vector<3x8x8x128xbf16> to vector<2x8x8x128xbf16>
    %49 = vector.shape_cast %48 : vector<2x8x8x128xbf16> to vector<128x128xbf16>
    %c1 = arith.constant 1 : index
    %c0_26 = arith.constant 0 : index
    %c0_27 = arith.constant 0 : index
    %50 = vector.load %arg4[%c1, %c0_26, %c0_27] : memref<8x128x16xbf16, #tpu.memory_space<vmem>>, vector<1x128x16xbf16>
    %51 = vector.shape_cast %50 : vector<1x128x16xbf16> to vector<128x16xbf16>
    %cst_28 = arith.constant dense<0.000000e+00> : vector<128x16xf32>
    %52 = tpu.matmul %49, %51, %cst_28 {dimension_numbers = #tpu.dot_dimension_numbers<[1], [0], [0], [1], [0, 0, 1, 1], [], []>} : vector<128x128xbf16>, vector<128x16xbf16>, vector<128x16xf32> -> vector<128x16xf32>
    %53 = vector.broadcast %7 : vector<1x16xf32> to vector<128x16xf32>
    %54 = arith.addf %52, %53 : vector<128x16xf32>
    %55 = vector.shape_cast %54 : vector<128x16xf32> to vector<2x8x8x16xf32>
    %c0_29 = arith.constant 0 : index
    %c2 = arith.constant 2 : index
    %c0_30 = arith.constant 0 : index
    %c0_31 = arith.constant 0 : index
    %c0_32 = arith.constant 0 : index
    %56 = vector.load %arg6[%c0_29, %c2, %c0_30, %c0_31, %c0_32] : memref<1x16x8x8x16xf32, #tpu.memory_space<vmem>>, vector<1x2x8x8x16xf32>
    %57 = vector.shape_cast %56 : vector<1x2x8x8x16xf32> to vector<2x8x8x16xf32>
    %58 = vector.shape_cast %55 : vector<2x8x8x16xf32> to vector<1x2x8x8x16xf32>
    tpu.vector_store %arg6[%c0_29, %c2, %c0_30, %c0_31, %c0_32], %58 {strides = array<i32>} : memref<1x16x8x8x16xf32, #tpu.memory_space<vmem>>, vector<1x2x8x8x16xf32>,
    %59 = vector.extract_strided_slice %47 {offsets = [1, 0, 0, 0], sizes = [2, 8, 8, 128], strides = [1, 1, 1, 1]} : vector<3x8x8x128xbf16> to vector<2x8x8x128xbf16>
    %60 = vector.shape_cast %59 : vector<2x8x8x128xbf16> to vector<128x128xbf16>
    %c5 = arith.constant 5 : index
    %c0_33 = arith.constant 0 : index
    %c0_34 = arith.constant 0 : index
    %61 = vector.load %arg4[%c5, %c0_33, %c0_34] : memref<8x128x16xbf16, #tpu.memory_space<vmem>>, vector<1x128x16xbf16>
    %62 = vector.shape_cast %61 : vector<1x128x16xbf16> to vector<128x16xbf16>
    %cst_35 = arith.constant dense<0.000000e+00> : vector<128x16xf32>
    %63 = tpu.matmul %60, %62, %cst_35 {dimension_numbers = #tpu.dot_dimension_numbers<[1], [0], [0], [1], [0, 0, 1, 1], [], []>} : vector<128x128xbf16>, vector<128x16xbf16>, vector<128x16xf32> -> vector<128x16xf32>
    %64 = vector.broadcast %7 : vector<1x16xf32> to vector<128x16xf32>
    %65 = arith.addf %63, %64 : vector<128x16xf32>
    %66 = vector.shape_cast %65 : vector<128x16xf32> to vector<2x8x8x16xf32>
    %c0_36 = arith.constant 0 : index
    %c10 = arith.constant 10 : index
    %c0_37 = arith.constant 0 : index
    %c0_38 = arith.constant 0 : index
    %c0_39 = arith.constant 0 : index
    %67 = vector.load %arg6[%c0_36, %c10, %c0_37, %c0_38, %c0_39] : memref<1x16x8x8x16xf32, #tpu.memory_space<vmem>>, vector<1x2x8x8x16xf32>
    %68 = vector.shape_cast %67 : vector<1x2x8x8x16xf32> to vector<2x8x8x16xf32>
    %69 = vector.shape_cast %66 : vector<2x8x8x16xf32> to vector<1x2x8x8x16xf32>
    tpu.vector_store %arg6[%c0_36, %c10, %c0_37, %c0_38, %c0_39], %69 {strides = array<i32>} : memref<1x16x8x8x16xf32, #tpu.memory_space<vmem>>, vector<1x2x8x8x16xf32>,
    %70 = vector.extract_strided_slice %6 {offsets = [0, 1, 0, 0], sizes = [3, 8, 8, 16], strides = [1, 1, 1, 1]} : vector<4x10x10x16xbf16> to vector<3x8x8x16xbf16>
    %71 = vector.extract_strided_slice %6 {offsets = [0, 1, 1, 0], sizes = [3, 8, 8, 16], strides = [1, 1, 1, 1]} : vector<4x10x10x16xbf16> to vector<3x8x8x16xbf16>
    %72 = vector.extract_strided_slice %6 {offsets = [0, 2, 0, 0], sizes = [3, 8, 8, 16], strides = [1, 1, 1, 1]} : vector<4x10x10x16xbf16> to vector<3x8x8x16xbf16>
    %73 = vector.extract_strided_slice %6 {offsets = [0, 2, 1, 0], sizes = [3, 8, 8, 16], strides = [1, 1, 1, 1]} : vector<4x10x10x16xbf16> to vector<3x8x8x16xbf16>
    %74 = vector.extract_strided_slice %6 {offsets = [1, 1, 0, 0], sizes = [3, 8, 8, 16], strides = [1, 1, 1, 1]} : vector<4x10x10x16xbf16> to vector<3x8x8x16xbf16>
    %75 = vector.extract_strided_slice %6 {offsets = [1, 1, 1, 0], sizes = [3, 8, 8, 16], strides = [1, 1, 1, 1]} : vector<4x10x10x16xbf16> to vector<3x8x8x16xbf16>
    %76 = vector.extract_strided_slice %6 {offsets = [1, 2, 0, 0], sizes = [3, 8, 8, 16], strides = [1, 1, 1, 1]} : vector<4x10x10x16xbf16> to vector<3x8x8x16xbf16>
    %77 = vector.extract_strided_slice %6 {offsets = [1, 2, 1, 0], sizes = [3, 8, 8, 16], strides = [1, 1, 1, 1]} : vector<4x10x10x16xbf16> to vector<3x8x8x16xbf16>
    %78 = tpu.concatenate %70, %71, %72, %73, %74, %75, %76, %77 in 3 : vector<3x8x8x16xbf16>, vector<3x8x8x16xbf16>, vector<3x8x8x16xbf16>, vector<3x8x8x16xbf16>, vector<3x8x8x16xbf16>, vector<3x8x8x16xbf16>, vector<3x8x8x16xbf16>, vector<3x8x8x16xbf16> -> vector<3x8x8x128xbf16>
    %79 = vector.extract_strided_slice %78 {offsets = [0, 0, 0, 0], sizes = [2, 8, 8, 128], strides = [1, 1, 1, 1]} : vector<3x8x8x128xbf16> to vector<2x8x8x128xbf16>
    %80 = vector.shape_cast %79 : vector<2x8x8x128xbf16> to vector<128x128xbf16>
    %c2_40 = arith.constant 2 : index
    %c0_41 = arith.constant 0 : index
    %c0_42 = arith.constant 0 : index
    %81 = vector.load %arg4[%c2_40, %c0_41, %c0_42] : memref<8x128x16xbf16, #tpu.memory_space<vmem>>, vector<1x128x16xbf16>
    %82 = vector.shape_cast %81 : vector<1x128x16xbf16> to vector<128x16xbf16>
    %cst_43 = arith.constant dense<0.000000e+00> : vector<128x16xf32>
    %83 = tpu.matmul %80, %82, %cst_43 {dimension_numbers = #tpu.dot_dimension_numbers<[1], [0], [0], [1], [0, 0, 1, 1], [], []>} : vector<128x128xbf16>, vector<128x16xbf16>, vector<128x16xf32> -> vector<128x16xf32>
    %84 = vector.broadcast %7 : vector<1x16xf32> to vector<128x16xf32>
    %85 = arith.addf %83, %84 : vector<128x16xf32>
    %86 = vector.shape_cast %85 : vector<128x16xf32> to vector<2x8x8x16xf32>
    %c0_44 = arith.constant 0 : index
    %c4_45 = arith.constant 4 : index
    %c0_46 = arith.constant 0 : index
    %c0_47 = arith.constant 0 : index
    %c0_48 = arith.constant 0 : index
    %87 = vector.load %arg6[%c0_44, %c4_45, %c0_46, %c0_47, %c0_48] : memref<1x16x8x8x16xf32, #tpu.memory_space<vmem>>, vector<1x2x8x8x16xf32>
    %88 = vector.shape_cast %87 : vector<1x2x8x8x16xf32> to vector<2x8x8x16xf32>
    %89 = vector.shape_cast %86 : vector<2x8x8x16xf32> to vector<1x2x8x8x16xf32>
    tpu.vector_store %arg6[%c0_44, %c4_45, %c0_46, %c0_47, %c0_48], %89 {strides = array<i32>} : memref<1x16x8x8x16xf32, #tpu.memory_space<vmem>>, vector<1x2x8x8x16xf32>,
    %90 = vector.extract_strided_slice %78 {offsets = [1, 0, 0, 0], sizes = [2, 8, 8, 128], strides = [1, 1, 1, 1]} : vector<3x8x8x128xbf16> to vector<2x8x8x128xbf16>
    %91 = vector.shape_cast %90 : vector<2x8x8x128xbf16> to vector<128x128xbf16>
    %c6 = arith.constant 6 : index
    %c0_49 = arith.constant 0 : index
    %c0_50 = arith.constant 0 : index
    %92 = vector.load %arg4[%c6, %c0_49, %c0_50] : memref<8x128x16xbf16, #tpu.memory_space<vmem>>, vector<1x128x16xbf16>
    %93 = vector.shape_cast %92 : vector<1x128x16xbf16> to vector<128x16xbf16>
    %cst_51 = arith.constant dense<0.000000e+00> : vector<128x16xf32>
    %94 = tpu.matmul %91, %93, %cst_51 {dimension_numbers = #tpu.dot_dimension_numbers<[1], [0], [0], [1], [0, 0, 1, 1], [], []>} : vector<128x128xbf16>, vector<128x16xbf16>, vector<128x16xf32> -> vector<128x16xf32>
    %95 = vector.broadcast %7 : vector<1x16xf32> to vector<128x16xf32>
    %96 = arith.addf %94, %95 : vector<128x16xf32>
    %97 = vector.shape_cast %96 : vector<128x16xf32> to vector<2x8x8x16xf32>
    %c0_52 = arith.constant 0 : index
    %c12 = arith.constant 12 : index
    %c0_53 = arith.constant 0 : index
    %c0_54 = arith.constant 0 : index
    %c0_55 = arith.constant 0 : index
    %98 = vector.load %arg6[%c0_52, %c12, %c0_53, %c0_54, %c0_55] : memref<1x16x8x8x16xf32, #tpu.memory_space<vmem>>, vector<1x2x8x8x16xf32>
    %99 = vector.shape_cast %98 : vector<1x2x8x8x16xf32> to vector<2x8x8x16xf32>
    %100 = vector.shape_cast %97 : vector<2x8x8x16xf32> to vector<1x2x8x8x16xf32>
    tpu.vector_store %arg6[%c0_52, %c12, %c0_53, %c0_54, %c0_55], %100 {strides = array<i32>} : memref<1x16x8x8x16xf32, #tpu.memory_space<vmem>>, vector<1x2x8x8x16xf32>,
    %101 = vector.extract_strided_slice %6 {offsets = [0, 1, 1, 0], sizes = [3, 8, 8, 16], strides = [1, 1, 1, 1]} : vector<4x10x10x16xbf16> to vector<3x8x8x16xbf16>
    %102 = vector.extract_strided_slice %6 {offsets = [0, 1, 2, 0], sizes = [3, 8, 8, 16], strides = [1, 1, 1, 1]} : vector<4x10x10x16xbf16> to vector<3x8x8x16xbf16>
    %103 = vector.extract_strided_slice %6 {offsets = [0, 2, 1, 0], sizes = [3, 8, 8, 16], strides = [1, 1, 1, 1]} : vector<4x10x10x16xbf16> to vector<3x8x8x16xbf16>
    %104 = vector.extract_strided_slice %6 {offsets = [0, 2, 2, 0], sizes = [3, 8, 8, 16], strides = [1, 1, 1, 1]} : vector<4x10x10x16xbf16> to vector<3x8x8x16xbf16>
    %105 = vector.extract_strided_slice %6 {offsets = [1, 1, 1, 0], sizes = [3, 8, 8, 16], strides = [1, 1, 1, 1]} : vector<4x10x10x16xbf16> to vector<3x8x8x16xbf16>
    %106 = vector.extract_strided_slice %6 {offsets = [1, 1, 2, 0], sizes = [3, 8, 8, 16], strides = [1, 1, 1, 1]} : vector<4x10x10x16xbf16> to vector<3x8x8x16xbf16>
    %107 = vector.extract_strided_slice %6 {offsets = [1, 2, 1, 0], sizes = [3, 8, 8, 16], strides = [1, 1, 1, 1]} : vector<4x10x10x16xbf16> to vector<3x8x8x16xbf16>
    %108 = vector.extract_strided_slice %6 {offsets = [1, 2, 2, 0], sizes = [3, 8, 8, 16], strides = [1, 1, 1, 1]} : vector<4x10x10x16xbf16> to vector<3x8x8x16xbf16>
    %109 = tpu.concatenate %101, %102, %103, %104, %105, %106, %107, %108 in 3 : vector<3x8x8x16xbf16>, vector<3x8x8x16xbf16>, vector<3x8x8x16xbf16>, vector<3x8x8x16xbf16>, vector<3x8x8x16xbf16>, vector<3x8x8x16xbf16>, vector<3x8x8x16xbf16>, vector<3x8x8x16xbf16> -> vector<3x8x8x128xbf16>
    %110 = vector.extract_strided_slice %109 {offsets = [0, 0, 0, 0], sizes = [2, 8, 8, 128], strides = [1, 1, 1, 1]} : vector<3x8x8x128xbf16> to vector<2x8x8x128xbf16>
    %111 = vector.shape_cast %110 : vector<2x8x8x128xbf16> to vector<128x128xbf16>
    %c3 = arith.constant 3 : index
    %c0_56 = arith.constant 0 : index
    %c0_57 = arith.constant 0 : index
    %112 = vector.load %arg4[%c3, %c0_56, %c0_57] : memref<8x128x16xbf16, #tpu.memory_space<vmem>>, vector<1x128x16xbf16>
    %113 = vector.shape_cast %112 : vector<1x128x16xbf16> to vector<128x16xbf16>
    %cst_58 = arith.constant dense<0.000000e+00> : vector<128x16xf32>
    %114 = tpu.matmul %111, %113, %cst_58 {dimension_numbers = #tpu.dot_dimension_numbers<[1], [0], [0], [1], [0, 0, 1, 1], [], []>} : vector<128x128xbf16>, vector<128x16xbf16>, vector<128x16xf32> -> vector<128x16xf32>
    %115 = vector.broadcast %7 : vector<1x16xf32> to vector<128x16xf32>
    %116 = arith.addf %114, %115 : vector<128x16xf32>
    %117 = vector.shape_cast %116 : vector<128x16xf32> to vector<2x8x8x16xf32>
    %c0_59 = arith.constant 0 : index
    %c6_60 = arith.constant 6 : index
    %c0_61 = arith.constant 0 : index
    %c0_62 = arith.constant 0 : index
    %c0_63 = arith.constant 0 : index
    %118 = vector.load %arg6[%c0_59, %c6_60, %c0_61, %c0_62, %c0_63] : memref<1x16x8x8x16xf32, #tpu.memory_space<vmem>>, vector<1x2x8x8x16xf32>
    %119 = vector.shape_cast %118 : vector<1x2x8x8x16xf32> to vector<2x8x8x16xf32>
    %120 = vector.shape_cast %117 : vector<2x8x8x16xf32> to vector<1x2x8x8x16xf32>
    tpu.vector_store %arg6[%c0_59, %c6_60, %c0_61, %c0_62, %c0_63], %120 {strides = array<i32>} : memref<1x16x8x8x16xf32, #tpu.memory_space<vmem>>, vector<1x2x8x8x16xf32>,
    %121 = vector.extract_strided_slice %109 {offsets = [1, 0, 0, 0], sizes = [2, 8, 8, 128], strides = [1, 1, 1, 1]} : vector<3x8x8x128xbf16> to vector<2x8x8x128xbf16>
    %122 = vector.shape_cast %121 : vector<2x8x8x128xbf16> to vector<128x128xbf16>
    %c7 = arith.constant 7 : index
    %c0_64 = arith.constant 0 : index
    %c0_65 = arith.constant 0 : index
    %123 = vector.load %arg4[%c7, %c0_64, %c0_65] : memref<8x128x16xbf16, #tpu.memory_space<vmem>>, vector<1x128x16xbf16>
    %124 = vector.shape_cast %123 : vector<1x128x16xbf16> to vector<128x16xbf16>
    %cst_66 = arith.constant dense<0.000000e+00> : vector<128x16xf32>
    %125 = tpu.matmul %122, %124, %cst_66 {dimension_numbers = #tpu.dot_dimension_numbers<[1], [0], [0], [1], [0, 0, 1, 1], [], []>} : vector<128x128xbf16>, vector<128x16xbf16>, vector<128x16xf32> -> vector<128x16xf32>
    %126 = vector.broadcast %7 : vector<1x16xf32> to vector<128x16xf32>
    %127 = arith.addf %125, %126 : vector<128x16xf32>
    %128 = vector.shape_cast %127 : vector<128x16xf32> to vector<2x8x8x16xf32>
    %c0_67 = arith.constant 0 : index
    %c14 = arith.constant 14 : index
    %c0_68 = arith.constant 0 : index
    %c0_69 = arith.constant 0 : index
    %c0_70 = arith.constant 0 : index
    %129 = vector.load %arg6[%c0_67, %c14, %c0_68, %c0_69, %c0_70] : memref<1x16x8x8x16xf32, #tpu.memory_space<vmem>>, vector<1x2x8x8x16xf32>
    %130 = vector.shape_cast %129 : vector<1x2x8x8x16xf32> to vector<2x8x8x16xf32>
    %131 = vector.shape_cast %128 : vector<2x8x8x16xf32> to vector<1x2x8x8x16xf32>
    tpu.vector_store %arg6[%c0_67, %c14, %c0_68, %c0_69, %c0_70], %131 {strides = array<i32>} : memref<1x16x8x8x16xf32, #tpu.memory_space<vmem>>, vector<1x2x8x8x16xf32>,
    return
  }
  func.func @transform_0(%arg0: i32, %arg1: i32) -> (i32, i32, i32, i32, i32) {
    %c0_i32 = arith.constant 0 : i32
    %c0_i32_0 = arith.constant 0 : i32
    %c0_i32_1 = arith.constant 0 : i32
    %c0_i32_2 = arith.constant 0 : i32
    return %arg0, %arg1, %c0_i32, %c0_i32_0, %c0_i32_1 : i32, i32, i32, i32, i32
  }
  func.func @transform_1(%arg0: i32, %arg1: i32) -> (i32, i32, i32, i32, i32) {
    %c0_i32 = arith.constant 0 : i32
    %c0_i32_0 = arith.constant 0 : i32
    %c0_i32_1 = arith.constant 0 : i32
    %c0_i32_2 = arith.constant 0 : i32
    return %arg0, %arg1, %c0_i32, %c0_i32_0, %c0_i32_1 : i32, i32, i32, i32, i32
  }
  func.func @transform_2(%arg0: i32, %arg1: i32) -> (i32, i32, i32) {
    %c0_i32 = arith.constant 0 : i32
    %c0_i32_0 = arith.constant 0 : i32
    %c0_i32_1 = arith.constant 0 : i32
    %c0_i32_2 = arith.constant 0 : i32
    return %c0_i32, %c0_i32_0, %c0_i32_1 : i32, i32, i32
  }
  func.func @transform_3(%arg0: i32, %arg1: i32) -> (i32, i32) {
    %c0_i32 = arith.constant 0 : i32
    %c0_i32_0 = arith.constant 0 : i32
    %c0_i32_1 = arith.constant 0 : i32
    return %c0_i32, %c0_i32_0 : i32, i32
  }
  func.func @transform_4(%arg0: i32, %arg1: i32) -> (i32, i32, i32, i32, i32) {
    %c0_i32 = arith.constant 0 : i32
    %c0_i32_0 = arith.constant 0 : i32
    %c0_i32_1 = arith.constant 0 : i32
    %c0_i32_2 = arith.constant 0 : i32
    return %arg0, %arg1, %c0_i32, %c0_i32_0, %c0_i32_1 : i32, i32, i32, i32, i32
  }
}

</mosaic_0001>

<bundles_post_ra>
// kernel: tpu_custom_call.1
= control target key start
LH: loop header
LB: loop body
LE: loop exit
PB: predicated region body
PF: predicated region fallthrough
CT: control target
= control target key end

     0   :  { %9 = vsyncpa [#allocation3], 0  ;;  %s4754_s15 = smov 0   ;;  %s4756_s16 = smov 0   ;;  %s7889_s0 = inlined_call_operand.vmem [shape: bf16[2,8,10,10,16], index: 0, kind: input, shape index: {}]   ;;  %s7890_s1 = inlined_call_operand.vmem [shape: bf16[2,8,10,10,16], index: 1, kind: input, shape index: {}]   ;;  %s7891_s2 = inlined_call_operand.vmem [shape: bf16[8,128,16], index: 2, kind: input, shape index: {}]   ;;  %s7892_s3 = inlined_call_operand.hbm [shape: f32[1,16], index: 3, kind: input, shape index: {}]   ;;  %s7893_s4 = inlined_call_operand.vmem [shape: f32[2,64,8,8,16], index: 4, kind: output, shape index: {}]  }
   0x1   :  { %s4758_s17 = smov 0   ;;  %s4760_s18 = smov 0  }
   0x2   :  { %s4762_s19 = smov 0  }
   0x3 LB: > { %s3992_s20 = sadd.s32 4294967295, %s4719_s19   ;;  %s24_s21 = sadd.s32 1, %s4711_s17  ;;  %s4719_s19 = sphi %s4762_s19, %s15_s19   ;;  %s4715_s18 = sphi %s4760_s18, %s8429_s18   ;;  %s4711_s17 = sphi %s4758_s17, %s8428_s17   ;;  %s4707_s16 = sphi %s4756_s16, %s8427_s16   ;;  %s4703_s15 = sphi %s4754_s15, %s8426_s15  }
   0x4   : > { %p25_p0 = scmp.ge.s32.totalorder %s24_s21, 4  ;;  %s27_s22 = sadd.s32 1, %s4715_s18 }
   0x5   : > { %p3994_p1 = scmp.ge.s32.totalorder %s4719_s19, 1  ;;  %p158_p2 = scmp.lt.s32.totalorder %s4719_s19, 9 }
   0x6   : > { %s8431_s21 = smov (%p25_p0, %s24_s21), 0  ;;  %s8433_s22 = smov (!%p25_p0, %s27_s22), %s4715_s18 }
   0x7   : > { %p159_p3 = pnand %p3994_p1, %p158_p2  ;;  %p29_p4 = scmp.ge.s32.totalorder %s8433_s22, 2 }
   0x8   : > { %p4568_p5 = scmp.eq.s32.totalorder %s3992_s20, 0  ;;  %s173_s25 = sshll.u32 %s7892_s3, 4  ;;  %s174_s25 = int_to_ptr.hbm [resolvable:$true] %s173_s25 }
   0x9   : > { %p4564_p6 = pneg %p159_p3  ;;  %s8435_s22 = smov (%p29_p4, %s8433_s22), 0 }
   0xa   : > { %s4721_s26 = smov [#allocation2]   ;;  %216 = sbr.rel (%p159_p3) target bundleno = 1068 (0x42c), region = 36 }
   0xb   : > { %s175_s27 = sshll.u32 %s4721_s26, 4  ;;  %p4565_p7 = pnand %p4568_p5, %p4564_p6  ;;  %s176_s27 = int_to_ptr.vmem [resolvable:$true] %s175_s27 }
   0xd   : > { %4567 = dma.hbm_to_vmem [thread:$0]  (!%p4565_p7), %s174_s25, 16, %s176_s27, [#allocation3]  }
   0xf   : > { %4698 = dma.done.wait (%p4568_p5), [#allocation3], 16  }
  0x10   : > { %4700 = vsyncadd (%p4568_p5), [#allocation3], 4294967280  ;;  %s3999_s28 = sshll.u32 %s4703_s15, 1  ;;  %p264_p8 = scmp.lt.s32.totalorder %s4707_s16, 1  ;;  %vm1180_vm0 = vcmask 130048   ;;  %vm1253_vm1 = vcmask 261120  }
  0x11   : > { %p266_p9 = scmp.lt.s32.totalorder %s3999_s28, 7  ;;  %s4722_s13 = smov 16   ;;  %vm1302_vm2 = vcmask 392192   ;;  %vm1351_vm3 = vcmask 523264   ;;  %vm1400_vm4 = vcmask 654336   ;;  %vm1449_vm5 = vcmask 785408  }
  0x12   : > { %s8437_s16 = smov (!%p264_p8, %s4707_s16), 1  ;;  %s4723_s14 = smov 32   ;;  %vm1498_vm6 = vcmask 916480   ;;  %vm2346_vm7 = vsmask.f32 3328 }
  0x13   : > { %s8439_s28 = smov (!%p266_p9, %s3999_s28), 7  ;;  %s4559_s29 = smul.u32 160, %s8437_s16  ;;  %vm2347_vm8 = vsmask.f32 7440 }
  0x14   : > { %s4558_s30 = smul.u32 20, %s8439_s28  ;;  %s4724_s20 = smov 48   ;;  %vm6069_vm9 = vmor %vm2346_vm7, %vm2347_vm8 }
  0x15   : > { %s4725_s23 = smov 64   ;;  %s4726_s24 = smov 80  }
  0x16   : > { %s270_s5 = sadd.s32 %s4559_s29, %s4558_s30  ;;  %s4727_s25 = smov 96  }
  0x17   : > { %s4000_s6 = sshll.u32 %s270_s5, 2  ;;  %s4728_s26 = smov 112  }
  0x18   : > { %s4801_s9 = scalar_lea.vmem %s7890_s1, %s4000_s6  ;;  %s4833_s12 = scalar_lea.vmem %s7889_s0, %s4000_s6 }
  0x19   : > { %v4009_v0 = vld [vmem:[%s4801_s9] sm:$0xf]  ;;  %v4493_v1 = vld [vmem:[%s4801_s9] sm:$0x10]  ;;  %v300_v5 = vld [vmem:[%s4801_s9 + $0x10] sm:$0xf] }
  0x1a   : > { %v4805_v2 = vor.u32 %v4493_v1, %v4009_v0  ;;  %v304_v3 = vld [vmem:[%s4801_s9 + $0x20] sm:$0xf]  ;;  %v305_v4 = vld [vmem:[%s4801_s9 + $0x24] sm:$0x1]  ;;  %v301_v8 = vld [vmem:[%s4801_s9 + $0x14] sm:$0x1]  ;;  %v4813_v9 = vunpack.c.l.b16 %v300_v5 }
  0x1b   : > { %v4810_v6 = vunpack.c.l.b16 %v304_v3  ;;  %v434_v7 = vunpack.c.l.b16 %v305_v4  ;;  %v298_v10 = vld [vmem:[%s4801_s9 + $0x8] sm:$0xf]  ;;  %v299_v11 = vld [vmem:[%s4801_s9 + $0xc] sm:$0x1]  ;;  %v430_v14 = vunpack.c.l.b16 %v301_v8  ;;  %v302_v22 = vld [vmem:[%s4801_s9 + $0x18] sm:$0xf] }
  0x1c   : > { %8060 = vst [vmem:[#allocation5_spill] sm:$0xff] %v4805_v2  ;;  %v498_v12 = vshrl.u32 %v4805_v2, 16  ;;  %v500_v13 = vshll.u32 %v4805_v2, 16  ;;  %v4819_v15 = vunpack.c.l.b16 %v298_v10  ;;  %v306_v16 = vld [vmem:[%s4801_s9 + $0x28] sm:$0xf]  ;;  %v428_v19 = vunpack.c.l.b16 %v299_v11  ;;  %s4003_s5 = sshll.u32 %s4703_s15, 4 }
  0x1d   : > { %v307_v17 = vld [vmem:[%s4801_s9 + $0x2c] sm:$0x1]  ;;  %v4824_v18 = vpack.c.b16 %v434_v7, %v4810_v6  ;;  %v4826_v20 = vunpack.c.l.b16 %v306_v16  ;;  %v303_v23 = vld [vmem:[%s4801_s9 + $0x1c] sm:$0x1]  ;;  %v4836_v25 = vpack.c.b16 %v430_v14, %v4813_v9  ;;  %v4838_v26 = vunpack.c.l.b16 %v302_v22  ;;  %v308_v32 = vld [vmem:[%s4801_s9 + $0x30] sm:$0xf] }
  0x1e   : > { %v436_v21 = vunpack.c.l.b16 %v307_v17  ;;  %v502_v24 = vrot.slane %v500_v13, 1  ;;  %v432_v27 = vunpack.c.l.b16 %v303_v23  ;;  %v4843_v30 = vpack.c.b16 %v428_v19, %v4819_v15  ;;  %v309_v37 = vld [vmem:[%s4801_s9 + $0x34] sm:$0x1]  ;;  %v336_v38 = vld [vmem:[%s4833_s12] sm:$0xf]  ;;  %p288_p10 = scmp.lt.s32.totalorder %s4003_s5, 63 }
  0x1f   : > { %8061 = vst [vmem:[#allocation6_spill] sm:$0xff] %v4824_v18  ;;  %v526_v28 = vshrl.u32 %v4824_v18, 16  ;;  %v528_v29 = vshll.u32 %v4824_v18, 16  ;;  %v512_v34 = vshrl.u32 %v4836_v25, 16  ;;  %v514_v35 = vshll.u32 %v4836_v25, 16  ;;  %s4005_s6 = sshll.u32 %s8437_s16, 9 }
  0x20   : > { %v4846_v31 = vpack.c.b16 %v436_v21, %v4826_v20  ;;  %v503_v33 = vor.u32 %v502_v24, %v498_v12  ;;  %v4852_v36 = vpack.c.b16 %v432_v27, %v4838_v26  ;;  %v505_v40 = vshrl.u32 %v4843_v30, 16  ;;  %v337_v42 = vld [vmem:[%s4833_s12 + $0x4] sm:$0x1]  ;;  %v310_v47 = vld [vmem:[%s4801_s9 + $0x38] sm:$0xf]  ;;  %s8441_s5 = smov (!%p288_p10, %s4003_s5), 63 }
  0x21   : > { %v530_v39 = vrot.slane %v528_v29, 1  ;;  %v507_v41 = vshll.u32 %v4843_v30, 16  ;;  %v516_v43 = vrot.slane %v514_v35, 1  ;;  %v4866_v50 = vunpack.c.l.b16 %v308_v32  ;;  %v311_v52 = vld [vmem:[%s4801_s9 + $0x3c] sm:$0x1]  ;;  %s4004_s15 = sshll.u32 %s8441_s5, 3 }
  0x22   : > { %8062 = vst [vmem:[#allocation7_spill] sm:$0xff] %v4846_v31  ;;  %665 = vrot.lane.b32.xlu0 %v503_v33, %s4722_s13  ;;  %v533_v44 = vshrl.u32 %v4846_v31, 16  ;;  %v535_v45 = vshll.u32 %v4846_v31, 16  ;;  %v521_v46 = vshll.u32 %v4852_v36, 16  ;;  %v438_v51 = vunpack.c.l.b16 %v309_v37  ;;  %v338_v53 = vld [vmem:[%s4833_s12 + $0x8] sm:$0xf]  ;;  %s6511_s7 = sadd.s32 %s4005_s6, %s4004_s15 }
  0x23   : > { %8063 = vst [vmem:[#allocation8_spill] sm:$0xff] %v4852_v36  ;;  %v4864_v48 = vor.u32 %v530_v39, %v526_v28  ;;  %v509_v49 = vrot.slane %v507_v41, 1  ;;  %v4870_v54 = vor.u32 %v516_v43, %v512_v34  ;;  %v519_v56 = vshrl.u32 %v4852_v36, 16  ;;  %v339_v58 = vld [vmem:[%s4833_s12 + $0xc] sm:$0x1]  ;;  %s4006_s16 = sshll.u32 %s6511_s7, 3 }
  0x24   : > { %v537_v55 = vrot.slane %v535_v45, 1  ;;  %v4873_v57 = vunpack.c.l.b16 %v336_v38  ;;  %v523_v59 = vrot.slane %v521_v46, 1  ;;  %v4879_v60 = vpack.c.b16 %v438_v51, %v4866_v50  ;;  %v342_v63 = vld [vmem:[%s4833_s12 + $0x18] sm:$0xf]  ;;  %v343_v0 = vld [vmem:[%s4833_s12 + $0x1c] sm:$0x1]  ;;  %s6562_s11 = scalar_lea.vmem %s7893_s4, %s4006_s16 }
  0x25   : > { %673 = vrot.lane.b32.xlu2 %v4864_v48, %s4722_s13  ;;  %v442_v61 = vunpack.c.l.b16 %v337_v42  ;;  %v4881_v62 = vunpack.c.l.b16 %v310_v47  ;;  %669 = vrot.lane.b32.xlu1 %v4870_v54, %s4722_s13  ;;  %v4887_v1 = vor.u32 %v509_v49, %v505_v40  ;;  %v440_v3 = vunpack.c.l.b16 %v311_v52  ;;  %v340_v5 = vld [vmem:[%s4833_s12 + $0x10] sm:$0xf]  ;;  %v341_v11 = vld [vmem:[%s4833_s12 + $0x14] sm:$0x1] }
  0x26   : > { %8064 = vst [vmem:[#allocation9_spill] sm:$0xff] %v4879_v60  ;;  %v4889_v4 = vunpack.c.l.b16 %v338_v53  ;;  %v542_v7 = vshll.u32 %v4879_v60, 16  ;;  %v444_v10 = vunpack.c.l.b16 %v339_v58  ;;  %v4897_v12 = vor.u32 %v537_v55, %v533_v44  ;;  %v344_v29 = vld [vmem:[%s4833_s12 + $0x20] sm:$0xf]  ;;  %v345_v32 = vld [vmem:[%s4833_s12 + $0x24] sm:$0x1] }
  0x27   : > { %v4894_v8 = vpack.c.b16 %v442_v61, %v4873_v57  ;;  %v4900_v13 = vpack.c.b16 %v440_v3, %v4881_v62  ;;  %v4902_v14 = vunpack.c.l.b16 %v342_v63  ;;  %v448_v16 = vunpack.c.l.b16 %v343_v0  ;;  %v348_v44 = vld [vmem:[%s4833_s12 + $0x30] sm:$0xf]  ;;  %v349_v45 = vld [vmem:[%s4833_s12 + $0x34] sm:$0x1]  ;;  %v346_v46 = vld [vmem:[%s4833_s12 + $0x28] sm:$0xf] }
  0x28   : > { %v4904_v17 = vor.u32 %v523_v59, %v519_v56  ;;  %v4908_v21 = vpack.c.b16 %v444_v10, %v4889_v4  ;;  %v4910_v22 = vunpack.c.l.b16 %v340_v5  ;;  %v540_v23 = vshrl.u32 %v4879_v60, 16  ;;  %v347_v47 = vld [vmem:[%s4833_s12 + $0x2c] sm:$0x1]  ;;  %v350_v3 = vld [vmem:[%s4833_s12 + $0x38] sm:$0xf] }
  0x29   : > { %8065 = vst [vmem:[#allocation10_spill] sm:$0xff] %v4900_v13  ;;  %v556_v19 = vshll.u32 %v4894_v8, 16  ;;  %v544_v24 = vrot.slane %v542_v7, 1  ;;  %v549_v27 = vshll.u32 %v4900_v13, 16  ;;  %v446_v28 = vunpack.c.l.b16 %v341_v11  ;;  %v351_v5 = vld [vmem:[%s4833_s12 + $0x3c] sm:$0x1] }
  0x2a   : > { %667 = vrot.lane.b32.xlu0 %v4887_v1, %s4722_s13  ;;  %v554_v33 = vshrl.u32 %v4894_v8, 16  ;;  %v4920_v35 = vpack.c.b16 %v448_v16, %v4902_v14  ;;  %v547_v37 = vshrl.u32 %v4900_v13, 16  ;;  %v563_v38 = vshll.u32 %v4908_v21, 16  ;;  %v358_v11 = vld [vmem:[%s4833_s12 + $0x58] sm:$0xf] }
  0x2b   : > { %v558_v34 = vrot.slane %v556_v19, 1  ;;  %v4927_v39 = vpack.c.b16 %v446_v28, %v4910_v22  ;;  %v4931_v40 = vor.u32 %v544_v24, %v540_v23  ;;  %v551_v41 = vrot.slane %v549_v27, 1  ;;  %v359_v16 = vld [vmem:[%s4833_s12 + $0x5c] sm:$0x1]  ;;  %v356_v28 = vld [vmem:[%s4833_s12 + $0x50] sm:$0xf] }
  0x2c   : > { %8066 = vst [vmem:[#allocation11_spill] sm:$0xff] %v4920_v35  ;;  %v4933_v42 = vunpack.c.l.b16 %v344_v29  ;;  %v450_v43 = vunpack.c.l.b16 %v345_v32  ;;  %v561_v51 = vshrl.u32 %v4908_v21, 16  ;;  %v577_v52 = vshll.u32 %v4920_v35, 16  ;;  %v357_v29 = vld [vmem:[%s4833_s12 + $0x54] sm:$0x1] }
  0x2d   : > { %675 = vrot.lane.b32.xlu2 %v4897_v12, %s4722_s13  ;;  %671 = vrot.lane.b32.xlu1 %v4904_v17, %s4722_s13  ;;  %v4939_v49 = vor.u32 %v558_v34, %v554_v33  ;;  %v565_v53 = vrot.slane %v563_v38, 1  ;;  %v570_v55 = vshll.u32 %v4927_v39, 16  ;;  %v4944_v56 = vunpack.c.l.b16 %v348_v44  ;;  %v371_v31 = vld [vmem:[%s4833_s12 + $0x8c] sm:$0x1]  ;;  %v369_v18 = vld [vmem:[%s4833_s12 + $0x84] sm:$0x1] }
  0x2e   : > { %v454_v58 = vunpack.c.l.b16 %v349_v45  ;;  %v4948_v59 = vor.u32 %v551_v41, %v547_v37  ;;  %v4951_v61 = vpack.c.b16 %v450_v43, %v4933_v42  ;;  %v4953_v63 = vunpack.c.l.b16 %v346_v46 }
  0x2f   : > { %v452_v0 = vunpack.c.l.b16 %v347_v47  ;;  %v575_v7 = vshrl.u32 %v4920_v35, 16  ;;  %v579_v10 = vrot.slane %v577_v52, 1  ;;  %v4962_v19 = vor.u32 %v565_v53, %v561_v51 }
  0x30   : > { %8067 = vst [vmem:[#allocation12_spill] sm:$0xff] %v4951_v61  ;;  %v568_v23 = vshrl.u32 %v4927_v39, 16  ;;  %v572_v24 = vrot.slane %v570_v55, 1  ;;  %v4966_v27 = vpack.c.b16 %v454_v58, %v4944_v56  ;;  %v584_v32 = vshll.u32 %v4951_v61, 16  ;;  %v360_v58 = vld [vmem:[%s4833_s12 + $0x60] sm:$0xf] }
  0x31   : > { %v4974_v33 = vpack.c.b16 %v452_v0, %v4953_v63  ;;  %v4976_v34 = vunpack.c.l.b16 %v350_v3  ;;  %v456_v37 = vunpack.c.l.b16 %v351_v5  ;;  %v4978_v38 = vunpack.c.l.b16 %v358_v11  ;;  %v361_v0 = vld [vmem:[%s4833_s12 + $0x64] sm:$0x1] }
  0x32   : > { %677 = vrot.lane.b32.xlu0 %v4931_v40, %s4722_s13  ;;  %8068 = vst [vmem:[#allocation13_spill] sm:$0xff] %v4966_v27  ;;  %v460_v41 = vunpack.c.l.b16 %v359_v16  ;;  %v4980_v43 = vunpack.c.l.b16 %v356_v28  ;;  %v458_v44 = vunpack.c.l.b16 %v357_v29  ;;  %v4982_v45 = vor.u32 %v579_v10, %v575_v7 }
  0x33   : > { %8069 = vst [vmem:[#allocation14_spill] sm:$0xff] %v4974_v33  ;;  %v582_v46 = vshrl.u32 %v4951_v61, 16  ;;  %v598_v47 = vshll.u32 %v4966_v27, 16  ;;  %v4988_v51 = vor.u32 %v572_v24, %v568_v23  ;;  %v586_v52 = vrot.slane %v584_v32, 1  ;;  %v364_v23 = vld [vmem:[%s4833_s12 + $0x70] sm:$0xf] }
  0x34   : > { %v591_v53 = vshll.u32 %v4974_v33, 16  ;;  %v4992_v55 = vpack.c.b16 %v456_v37, %v4976_v34  ;;  %v4997_v3 = vpack.c.b16 %v460_v41, %v4978_v38  ;;  %v5000_v5 = vpack.c.b16 %v458_v44, %v4980_v43  ;;  %v365_v37 = vld [vmem:[%s4833_s12 + $0x74] sm:$0x1]  ;;  %v362_v41 = vld [vmem:[%s4833_s12 + $0x68] sm:$0xf] }
  0x35   : > { %681 = vrot.lane.b32.xlu2 %v4939_v49, %s4722_s13  ;;  %679 = vrot.lane.b32.xlu1 %v4948_v59, %s4722_s13  ;;  %v596_v7 = vshrl.u32 %v4966_v27, 16  ;;  %v600_v10 = vrot.slane %v598_v47, 1  ;;  %v5005_v11 = vunpack.c.l.b16 %v360_v58  ;;  %v462_v16 = vunpack.c.l.b16 %v361_v0  ;;  %v363_v44 = vld [vmem:[%s4833_s12 + $0x6c] sm:$0x1]  ;;  %v368_v61 = vld [vmem:[%s4833_s12 + $0x80] sm:$0xf] }
  0x36   : > { %8070 = vst [vmem:[#allocation15_spill] sm:$0xff] %v4992_v55  ;;  %v5010_v24 = vor.u32 %v586_v52, %v582_v46  ;;  %v589_v28 = vshrl.u32 %v4974_v33, 16  ;;  %v593_v29 = vrot.slane %v591_v53, 1  ;;  %v605_v32 = vshll.u32 %v4992_v55, 16  ;;  %v366_v33 = vld [vmem:[%s4833_s12 + $0x78] sm:$0xf] }
  0x37   : > { %8071 = vst [vmem:[#allocation16_spill] sm:$0xff] %v4997_v3  ;;  %v603_v47 = vshrl.u32 %v4992_v55, 16  ;;  %v619_v58 = vshll.u32 %v4997_v3, 16  ;;  %v612_v0 = vshll.u32 %v5000_v5, 16  ;;  %v5020_v13 = vor.u32 %v600_v10, %v596_v7  ;;  %v367_v7 = vld [vmem:[%s4833_s12 + $0x7c] sm:$0x1] }
  0x38   : > { %8072 = vst [vmem:[#allocation17_spill] sm:$0xff] %v5000_v5  ;;  %v5023_v46 = vpack.c.b16 %v462_v16, %v5005_v11  ;;  %v5025_v52 = vunpack.c.l.b16 %v364_v23  ;;  %v466_v53 = vunpack.c.l.b16 %v365_v37  ;;  %v5029_v2 = vor.u32 %v593_v29, %v589_v28 }
  0x39   : > { %v607_v27 = vrot.slane %v605_v32, 1  ;;  %v5031_v60 = vunpack.c.l.b16 %v362_v41  ;;  %v464_v55 = vunpack.c.l.b16 %v363_v44  ;;  %v617_v10 = vshrl.u32 %v4997_v3, 16 }
  0x3a   : > { %683 = vrot.lane.b32.xlu0 %v4962_v19, %s4722_s13  ;;  %8073 = vst [vmem:[#allocation18_spill] sm:$0xff] %v5023_v46  ;;  %v621_v16 = vrot.slane %v619_v58, 1  ;;  %v610_v23 = vshrl.u32 %v5000_v5, 16  ;;  %v614_v37 = vrot.slane %v612_v0, 1  ;;  %v626_v28 = vshll.u32 %v5023_v46, 16 }
  0x3b   : > { %v5041_v29 = vpack.c.b16 %v466_v53, %v5025_v52  ;;  %v5045_v32 = vor.u32 %v607_v27, %v603_v47  ;;  %v5048_v41 = vpack.c.b16 %v464_v55, %v5031_v60  ;;  %v5050_v44 = vunpack.c.l.b16 %v366_v33  ;;  %v370_v0 = vld [vmem:[%s4833_s12 + $0x88] sm:$0xf] }
  0x3c   : > { %v468_v58 = vunpack.c.l.b16 %v367_v7  ;;  %v5056_v35 = vor.u32 %v621_v16, %v617_v10  ;;  %v5058_v36 = vor.u32 %v614_v37, %v610_v23  ;;  %v624_v53 = vshrl.u32 %v5023_v46, 16 }
  0x3d   : > { %687 = vrot.lane.b32.xlu2 %v4982_v45, %s4722_s13  ;;  %685 = vrot.lane.b32.xlu1 %v4988_v51, %s4722_s13  ;;  %8074 = vst [vmem:[#allocation19_spill] sm:$0xff] %v5041_v29  ;;  %v628_v3 = vrot.slane %v626_v28, 1  ;;  %v640_v27 = vshll.u32 %v5041_v29, 16  ;;  %v5062_v47 = vunpack.c.l.b16 %v370_v0  ;;  %v472_v55 = vunpack.c.l.b16 %v371_v31 }
  0x3e   : > { %8075 = vst [vmem:[#allocation20_spill] sm:$0xff] %v5045_v32  ;;  %v633_v33 = vshll.u32 %v5048_v41, 16  ;;  %v5068_v7 = vpack.c.b16 %v468_v58, %v5050_v44  ;;  %v5070_v10 = vunpack.c.l.b16 %v368_v61  ;;  %v470_v16 = vunpack.c.l.b16 %v369_v18 }
  0x3f   : > { %8076 = vst [vmem:[#allocation21_spill] sm:$0xff] %v5048_v41  ;;  %v638_v23 = vshrl.u32 %v5041_v29, 16  ;;  %v642_v37 = vrot.slane %v640_v27, 1  ;;  %v631_v28 = vshrl.u32 %v5048_v41, 16  ;;  %v5077_v31 = vpack.c.b16 %v472_v55, %v5062_v47 }
  0x40   : > { %8077 = vst [vmem:[#allocation22_spill] sm:$0xff] %v5068_v7  ;;  %v5081_v0 = vor.u32 %v628_v3, %v624_v53  ;;  %v635_v58 = vrot.slane %v633_v33, 1  ;;  %v647_v61 = vshll.u32 %v5068_v7, 16  ;;  %v5085_v18 = vpack.c.b16 %v470_v16, %v5070_v10 }
  0x41   : > { %8078 = vst [vmem:[#allocation23_spill] sm:$0xff] %v5077_v31  ;;  %v5087_v46 = vor.u32 %v642_v37, %v638_v23  ;;  %v661_v27 = vshll.u32 %v5077_v31, 16  ;;  %v645_v29 = vshrl.u32 %v5068_v7, 16  ;;  %v659_v53 = vshrl.u32 %v5077_v31, 16 }
  0x42   : > { %689 = vrot.lane.b32.xlu0 %v5010_v24, %s4722_s13  ;;  %8079 = vst [vmem:[#allocation24_spill] sm:$0xff] %v5085_v18  ;;  %v5092_v55 = vor.u32 %v635_v58, %v631_v28  ;;  %v649_v41 = vrot.slane %v647_v61, 1  ;;  %v654_v3 = vshll.u32 %v5085_v18, 16  ;;  %v652_v23 = vshrl.u32 %v5085_v18, 16 }
  0x43   : > { %v663_v33 = vrot.slane %v661_v27, 1  ;;  %v720_v61 = vpack.c.b16 %v4813_v9, %v4813_v9  ;;  %v722_v27 = vpack.c.b16 %v4810_v6, %v4810_v6  ;;  %v725_v9 = vpack.c.b16 %v4881_v62, %v4881_v62 }
  0x44   : > { %v5101_v16 = vor.u32 %v649_v41, %v645_v29  ;;  %v656_v37 = vrot.slane %v654_v3, 1  ;;  %v719_v29 = vpack.c.b16 %v4819_v15, %v4819_v15  ;;  %v721_v41 = vpack.c.b16 %v4838_v26, %v4838_v26  ;;  %v312_v26 = vld [vmem:[%s4801_s9 + $0x40] sm:$0xf] }
  0x45   : > { %693 = vrot.lane.b32.xlu2 %v5020_v13, %s4722_s13  ;;  %691 = vrot.lane.b32.xlu1 %v5029_v2, %s4722_s13  ;;  %v5104_v28 = vor.u32 %v663_v33, %v659_v53  ;;  %v724_v3 = vpack.c.b16 %v4866_v50, %v4866_v50  ;;  %v723_v15 = vpack.c.b16 %v4826_v20, %v4826_v20  ;;  %v716_v53 = vunpack.c.l.b16 %v312_v26 }
  0x46   : > { %v5108_v58 = vor.u32 %v656_v37, %v652_v23  ;;  %v5137_v6 = vpack.c.b16 %v4889_v4, %v4889_v4  ;;  %v5145_v20 = vpack.c.b16 %v4910_v22, %v4910_v22  ;;  %v5149_v62 = vpack.c.b16 %v4933_v42, %v4933_v42  ;;  %v352_v42 = vld [vmem:[%s4833_s12 + $0x40] sm:$0xf] }
  0x47   : > { %v726_v50 = vpack.c.b16 %v716_v53, %v716_v53  ;;  %v5155_v4 = vpack.c.b16 %v4902_v14, %v4902_v14  ;;  %v5163_v22 = vpack.c.b16 %v4953_v63, %v4953_v63  ;;  %v5170_v23 = vpack.c.b16 %v4976_v34, %v4976_v34 }
  0x48   : > { %v5176_v14 = vpack.c.b16 %v4944_v56, %v4944_v56  ;;  %v717_v37 = vunpack.c.l.b16 %v352_v42  ;;  %v5188_v34 = vpack.c.b16 %v5005_v11, %v5005_v11  ;;  %v5194_v56 = vpack.c.b16 %v4978_v38, %v4978_v38 }
  0x49   : > { %8080 = vst [vmem:[#allocation25_spill] sm:$0xff] %v5163_v22  ;;  %v5208_v11 = vpack.c.b16 %v5050_v44, %v5050_v44  ;;  %v5214_v38 = vpack.c.b16 %v5025_v52, %v5025_v52  ;;  %v5225_v44 = vpack.c.b16 %v5070_v10, %v5070_v10  ;;  %v313_v10 = vld [vmem:[%s4801_s9 + $0x44] sm:$0x1] }
  0x4a   : > { %695 = vrot.lane.b32.xlu0 %v5045_v32, %s4722_s13  ;;  %8082 = vst [vmem:[#allocation27_spill] sm:$0xff] %v5170_v23  ;;  %v5182_v63 = vpack.c.b16 %v717_v37, %v717_v37 }
  0x4b   : > { %8083 = vst [vmem:[#allocation28_spill] sm:$0xff] %v5176_v14 }
  0x4c   : > { %8084 = vst [vmem:[#allocation29_spill] sm:$0xff] %v5182_v63 }
  0x4d   : > { %699 = vrot.lane.b32.xlu2 %v5056_v35, %s4722_s13  ;;  %697 = vrot.lane.b32.xlu1 %v5058_v36, %s4722_s13  ;;  %8086 = vst [vmem:[#allocation31_spill] sm:$0xff] %v5208_v11 }
  0x4e   : > { %8087 = vst [vmem:[#allocation32_spill] sm:$0xff] %v5225_v44 }
  0x52   : > { %701 = vrot.lane.b32.xlu0 %v5081_v0, %s4722_s13 }
  0x55   : > { %705 = vrot.lane.b32.xlu2 %v5087_v46, %s4722_s13  ;;  %703 = vrot.lane.b32.xlu1 %v5092_v55, %s4722_s13 }
  0x5a   : > { %707 = vrot.lane.b32.xlu0 %v5101_v16, %s4722_s13 }
  0x5d   : > { %711 = vrot.lane.b32.xlu2 %v5104_v28, %s4722_s13  ;;  %709 = vrot.lane.b32.xlu1 %v5108_v58, %s4722_s13 }
  0x62   : > { %743 = vrot.lane.b32.xlu0 %v719_v29, %s4723_s14 }
  0x65   : > { %747 = vrot.lane.b32.xlu2 %v721_v41, %s4723_s14  ;;  %745 = vrot.lane.b32.xlu1 %v720_v61, %s4723_s14  ;;  %v5202_v41 = vpack.c.b16 %v5031_v60, %v5031_v60 }
  0x6a   : > { %749 = vrot.lane.b32.xlu0 %v722_v27, %s4723_s14  ;;  %v372_v27 = vld [vmem:[%s4833_s12 + $0x90] sm:$0xf] }
  0x6b   : > { %v718_v60 = vunpack.c.l.b16 %v372_v27 }
  0x6d   : > { %753 = vrot.lane.b32.xlu2 %v724_v3, %s4723_s14  ;;  %751 = vrot.lane.b32.xlu1 %v723_v15, %s4723_s14  ;;  %v5231_v52 = vpack.c.b16 %v718_v60, %v718_v60 }
  0x6f   : > { %8090 = vst [vmem:[#allocation35_spill] sm:$0xff] %v5231_v52 }
  0x72   : > { %755 = vrot.lane.b32.xlu0 %v725_v9, %s4723_s14  ;;  %v5237_v9 = vpack.c.b16 %v5062_v47, %v5062_v47 }
  0x74   : > { %8091 = vst [vmem:[#allocation36_spill] sm:$0xff] %v5237_v9 }
  0x75   : > { %759 = vrot.lane.b32.xlu2 %v5137_v6, %s4723_s14  ;;  %757 = vrot.lane.b32.xlu1 %v726_v50, %s4723_s14 }
  0x7a   : > { %761 = vrot.lane.b32.xlu0 %v5145_v20, %s4723_s14 }
  0x7d   : > { %765 = vrot.lane.b32.xlu2 %v5149_v62, %s4723_s14  ;;  %763 = vrot.lane.b32.xlu1 %v5155_v4, %s4723_s14 }
  0x7f   : > { %v5165_v33 = vpop.permute.xlu2 %673 }
  0x80   : > { %8081 = vst [vmem:[#allocation26_spill] sm:$0xff] %v5165_v33 }
  0x82   : > { %767 = vrot.lane.b32.xlu0 %v5163_v22, %s4723_s14 }
  0x85   : > { %771 = vrot.lane.b32.xlu2 %v5170_v23, %s4723_s14  ;;  %769 = vrot.lane.b32.xlu1 %v5176_v14, %s4723_s14 }
  0x87   : > { %v5184_v29 = vpop.permute.xlu2 %675 }
  0x88   : > { %8085 = vst [vmem:[#allocation30_spill] sm:$0xff] %v5184_v29  ;;  %v794_v29 = vunpack.c.l.b16 %v313_v10 }
  0x8a   : > { %773 = vrot.lane.b32.xlu0 %v5182_v63, %s4723_s14  ;;  %v320_v63 = vld [vmem:[%s4801_s9 + $0x60] sm:$0xf] }
  0x8d   : > { %777 = vrot.lane.b32.xlu2 %v5188_v34, %s4723_s14  ;;  %775 = vrot.lane.b32.xlu1 %v5194_v56, %s4723_s14 }
  0x8f   : > { %v5204_v61 = vpop.permute.xlu2 %681 }
  0x92   : > { %779 = vrot.lane.b32.xlu0 %v5202_v41, %s4723_s14 }
  0x94   : > { %v5217_v3 = vpop.permute.xlu0 %665 }
  0x95   : > { %783 = vrot.lane.b32.xlu2 %v5208_v11, %s4723_s14  ;;  %781 = vrot.lane.b32.xlu1 %v5214_v38, %s4723_s14 }
  0x97   : > { %v5227_v15 = vpop.permute.xlu2 %687  ;;  %v5229_v26 = vpop.permute.xlu1 %669 }
  0x98   : > { %8088 = vst [vmem:[#allocation33_spill] sm:$0xff] %v5227_v15 }
  0x99   : > { %8089 = vst [vmem:[#allocation34_spill] sm:$0xff] %v5229_v26 }
  0x9a   : > { %785 = vrot.lane.b32.xlu0 %v5225_v44, %s4723_s14 }
  0x9c   : > { %v5239_v50 = vpop.permute.xlu0 %667 }
  0x9d   : > { %789 = vrot.lane.b32.xlu2 %v5231_v52, %s4723_s14  ;;  %787 = vrot.lane.b32.xlu1 %v5237_v9, %s4723_s14  ;;  %v5256_v52 = vpack.c.b16 %v794_v29, %v716_v53 }
  0x9f   : > { %v5246_v42 = vpop.permute.xlu2 %693  ;;  %v5248_v27 = vpop.permute.xlu1 %671  ;;  %8095 = vst [vmem:[#allocation40_spill] sm:$0xff] %v5256_v52 }
  0xa0   : > { %8092 = vst [vmem:[#allocation37_spill] sm:$0xff] %v5246_v42 }
  0xa1   : > { %8093 = vst [vmem:[#allocation38_spill] sm:$0xff] %v5248_v27 }
  0xa2   : > { %821 = vrot.lane.b32.xlu0 %v4887_v1, %s4724_s20  ;;  %v803_v1 = vshll.u32 %v5256_v52, 16 }
  0xa4   : > { %v5252_v47 = vpop.permute.xlu0 %677 }
  0xa5   : > { %8094 = vst [vmem:[#allocation39_spill] sm:$0xff] %v5252_v47  ;;  %825 = vrot.lane.b32.xlu2 %v4904_v17, %s4724_s20  ;;  %823 = vrot.lane.b32.xlu1 %v4870_v54, %s4724_s20  ;;  %v801_v17 = vshrl.u32 %v5256_v52, 16  ;;  %v805_v54 = vrot.slane %v803_v1, 1 }
  0xa7   : > { %v5260_v33 = vpop.permute.xlu2 %699  ;;  %v5262_v42 = vpop.permute.xlu1 %679 }
  0xa8   : > { %8096 = vst [vmem:[#allocation41_spill] sm:$0xff] %v5260_v33  ;;  %v353_v33 = vld [vmem:[%s4833_s12 + $0x44] sm:$0x1] }
  0xa9   : > { %8097 = vst [vmem:[#allocation42_spill] sm:$0xff] %v5262_v42 }
  0xaa   : > { %827 = vrot.lane.b32.xlu0 %v4864_v48, %s4724_s20  ;;  %v5280_v48 = vor.u32 %v805_v54, %v801_v17 }
  0xac   : > { %v5267_v10 = vpop.permute.xlu0 %683  ;;  %8100 = vst [vmem:[#allocation45_spill] sm:$0xff] %v5280_v48 }
  0xad   : > { %831 = vrot.lane.b32.xlu2 %v4931_v40, %s4724_s20  ;;  %829 = vrot.lane.b32.xlu1 %v4897_v12, %s4724_s20  ;;  %v795_v40 = vunpack.c.l.b16 %v353_v33 }
  0xaf   : > { %v5274_v53 = vpop.permute.xlu2 %705  ;;  %v5276_v29 = vpop.permute.xlu1 %685 }
  0xb0   : > { %8098 = vst [vmem:[#allocation43_spill] sm:$0xff] %v5274_v53  ;;  %v5293_v53 = vpack.c.b16 %v795_v40, %v717_v37 }
  0xb1   : > { %8099 = vst [vmem:[#allocation44_spill] sm:$0xff] %v5276_v29 }
  0xb2   : > { %833 = vrot.lane.b32.xlu0 %v4948_v59, %s4724_s20  ;;  %8104 = vst [vmem:[#allocation49_spill] sm:$0xff] %v5293_v53  ;;  %v810_v33 = vshll.u32 %v5293_v53, 16  ;;  %v808_v37 = vshrl.u32 %v5293_v53, 16 }
  0xb4   : > { %v5283_v42 = vpop.permute.xlu0 %689  ;;  %v812_v40 = vrot.slane %v810_v33, 1 }
  0xb5   : > { %8101 = vst [vmem:[#allocation46_spill] sm:$0xff] %v5283_v42  ;;  %837 = vrot.lane.b32.xlu2 %v4962_v19, %s4724_s20  ;;  %835 = vrot.lane.b32.xlu1 %v5280_v48, %s4724_s20  ;;  %v373_v48 = vld [vmem:[%s4833_s12 + $0x94] sm:$0x1] }
  0xb7   : > { %v5289_v12 = vpop.permute.xlu2 %711  ;;  %v5291_v1 = vpop.permute.xlu1 %691 }
  0xb8   : > { %8102 = vst [vmem:[#allocation47_spill] sm:$0xff] %v5289_v12 }
  0xb9   : > { %8103 = vst [vmem:[#allocation48_spill] sm:$0xff] %v5291_v1 }
  0xba   : > { %839 = vrot.lane.b32.xlu0 %v4988_v51, %s4724_s20 }
  0xbc   : > { %v5297_v59 = vpop.permute.xlu0 %695 }
  0xbd   : > { %8105 = vst [vmem:[#allocation50_spill] sm:$0xff] %v5297_v59  ;;  %843 = vrot.lane.b32.xlu2 %v5010_v24, %s4724_s20  ;;  %841 = vrot.lane.b32.xlu1 %v4982_v45, %s4724_s20  ;;  %v5318_v59 = vor.u32 %v812_v40, %v808_v37 }
  0xbf   : > { %v5304_v17 = vpop.permute.xlu2 %747  ;;  %v5306_v54 = vpop.permute.xlu1 %697  ;;  %8109 = vst [vmem:[#allocation54_spill] sm:$0xff] %v5318_v59 }
  0xc0   : > { %8106 = vst [vmem:[#allocation51_spill] sm:$0xff] %v5304_v17  ;;  %v796_v17 = vunpack.c.l.b16 %v373_v48 }
  0xc1   : > { %8107 = vst [vmem:[#allocation52_spill] sm:$0xff] %v5306_v54 }
  0xc2   : > { %845 = vrot.lane.b32.xlu0 %v5029_v2, %s4724_s20 }
  0xc4   : > { %v5311_v12 = vpop.permute.xlu0 %701 }
  0xc5   : > { %8108 = vst [vmem:[#allocation53_spill] sm:$0xff] %v5311_v12  ;;  %849 = vrot.lane.b32.xlu2 %v5045_v32, %s4724_s20  ;;  %847 = vrot.lane.b32.xlu1 %v5020_v13, %s4724_s20  ;;  %v5328_v12 = vpack.c.b16 %v796_v17, %v718_v60 }
  0xc7   : > { %v5320_v47 = vpop.permute.xlu2 %753  ;;  %v5322_v54 = vpop.permute.xlu1 %703  ;;  %8113 = vst [vmem:[#allocation58_spill] sm:$0xff] %v5328_v12  ;;  %v815_v60 = vshrl.u32 %v5328_v12, 16 }
  0xc8   : > { %8110 = vst [vmem:[#allocation55_spill] sm:$0xff] %v5320_v47 }
  0xc9   : > { %8111 = vst [vmem:[#allocation56_spill] sm:$0xff] %v5322_v54  ;;  %v817_v54 = vshll.u32 %v5328_v12, 16  ;;  %v331_v12 = vld [vmem:[%s4801_s9 + $0x8c] sm:$0x1] }
  0xca   : > { %851 = vrot.lane.b32.xlu0 %v5318_v59, %s4724_s20 }
  0xcb   : > { %v819_v17 = vrot.slane %v817_v54, 1  ;;  %v885_v54 = vpack.c.b16 %v4873_v57, %v4873_v57 }
  0xcc   : > { %v5326_v33 = vpop.permute.xlu0 %707 }
  0xcd   : > { %8112 = vst [vmem:[#allocation57_spill] sm:$0xff] %v5326_v33  ;;  %855 = vrot.lane.b32.xlu2 %v5081_v0, %s4724_s20  ;;  %853 = vrot.lane.b32.xlu1 %v5056_v35, %s4724_s20 }
  0xcf   : > { %v5334_v37 = vpop.permute.xlu2 %759  ;;  %v5336_v40 = vpop.permute.xlu1 %709 }
  0xd0   : > { %8114 = vst [vmem:[#allocation59_spill] sm:$0xff] %v5334_v37 }
  0xd1   : > { %8115 = vst [vmem:[#allocation60_spill] sm:$0xff] %v5336_v40  ;;  %v5352_v40 = vor.u32 %v819_v17, %v815_v60 }
  0xd2   : > { %857 = vrot.lane.b32.xlu0 %v5092_v55, %s4724_s20 }
  0xd3   : > { %8117 = vst [vmem:[#allocation62_spill] sm:$0xff] %v5352_v40 }
  0xd4   : > { %v5341_v48 = vpop.permute.xlu0 %743 }
  0xd5   : > { %861 = vrot.lane.b32.xlu2 %v5101_v16, %s4724_s20  ;;  %859 = vrot.lane.b32.xlu1 %v5087_v46, %s4724_s20 }
  0xd7   : > { %v5348_v33 = vpop.permute.xlu2 %765  ;;  %v5350_v47 = vpop.permute.xlu1 %745 }
  0xd8   : > { %8116 = vst [vmem:[#allocation61_spill] sm:$0xff] %v5348_v33 }
  0xda   : > { %863 = vrot.lane.b32.xlu0 %v5108_v58, %s4724_s20 }
  0xdc   : > { %v5356_v1 = vpop.permute.xlu0 %749 }
  0xdd   : > { %8118 = vst [vmem:[#allocation63_spill] sm:$0xff] %v5356_v1  ;;  %867 = vrot.lane.b32.xlu2 %v5352_v40, %s4724_s20  ;;  %865 = vrot.lane.b32.xlu1 %v5104_v28, %s4724_s20 }
  0xdf   : > { %v5364_v42 = vpop.permute.xlu2 %771  ;;  %v5366_v33 = vpop.permute.xlu1 %751 }
  0xe0   : > { %8119 = vst [vmem:[#allocation64_spill] sm:$0xff] %v5364_v42 }
  0xe1   : > { %8120 = vst [vmem:[#allocation65_spill] sm:$0xff] %v5366_v33 }
  0xe2   : > { %895 = vrot.lane.b32.xlu0 %v885_v54, %s4725_s23 }
  0xe4   : > { %v5369_v60 = vpop.permute.xlu0 %755 }
  0xe5   : > { %8121 = vst [vmem:[#allocation66_spill] sm:$0xff] %v5369_v60  ;;  %899 = vrot.lane.b32.xlu2 %v5145_v20, %s4725_s23  ;;  %897 = vrot.lane.b32.xlu1 %v5137_v6, %s4725_s23 }
  0xe7   : > { %v5375_v17 = vpop.permute.xlu2 %777  ;;  %v5377_v1 = vpop.permute.xlu1 %757 }
  0xe8   : > { %8122 = vst [vmem:[#allocation67_spill] sm:$0xff] %v5375_v17  ;;  %v886_v17 = vpack.c.b16 %v4980_v43, %v4980_v43 }
  0xe9   : > { %8123 = vst [vmem:[#allocation68_spill] sm:$0xff] %v5377_v1 }
  0xea   : > { %901 = vrot.lane.b32.xlu0 %v5155_v4, %s4725_s23 }
  0xec   : > { %v5381_v57 = vpop.permute.xlu0 %761 }
  0xed   : > { %8124 = vst [vmem:[#allocation69_spill] sm:$0xff] %v5381_v57  ;;  %905 = vrot.lane.b32.xlu2 %v5163_v22, %s4725_s23  ;;  %903 = vrot.lane.b32.xlu1 %v5149_v62, %s4725_s23  ;;  %v326_v22 = vld [vmem:[%s4801_s9 + $0x78] sm:$0xf] }
  0xef   : > { %v5387_v54 = vpop.permute.xlu2 %783  ;;  %v5389_v60 = vpop.permute.xlu1 %763 }
  0xf0   : > { %8125 = vst [vmem:[#allocation70_spill] sm:$0xff] %v5387_v54 }
  0xf1   : > { %8126 = vst [vmem:[#allocation71_spill] sm:$0xff] %v5389_v60 }
  0xf2   : > { %907 = vrot.lane.b32.xlu0 %v5176_v14, %s4725_s23 }
  0xf4   : > { %v5395_v1 = vpop.permute.xlu0 %767 }
  0xf5   : > { %8127 = vst [vmem:[#allocation72_spill] sm:$0xff] %v5395_v1  ;;  %911 = vrot.lane.b32.xlu2 %v886_v17, %s4725_s23  ;;  %909 = vrot.lane.b32.xlu1 %v5170_v23, %s4725_s23 }
  0xf7   : > { %v5400_v33 = vpop.permute.xlu2 %789  ;;  %v5402_v54 = vpop.permute.xlu1 %769 }
  0xf8   : > { %8128 = vst [vmem:[#allocation73_spill] sm:$0xff] %v5400_v33  ;;  %v318_v33 = vld [vmem:[%s4801_s9 + $0x58] sm:$0xf] }
  0xf9   : > { %8129 = vst [vmem:[#allocation74_spill] sm:$0xff] %v5402_v54  ;;  %v316_v54 = vld [vmem:[%s4801_s9 + $0x50] sm:$0xf] }
  0xfa   : > { %913 = vrot.lane.b32.xlu0 %v5194_v56, %s4725_s23  ;;  %v5428_v60 = vunpack.c.l.b16 %v316_v54  ;;  %v324_v54 = vld [vmem:[%s4801_s9 + $0x70] sm:$0xf] }
  0xfc   : > { %v5406_v42 = vpop.permute.xlu0 %773 }
  0xfd   : > { %8130 = vst [vmem:[#allocation75_spill] sm:$0xff] %v5406_v42  ;;  %917 = vrot.lane.b32.xlu2 %v5202_v41, %s4725_s23  ;;  %915 = vrot.lane.b32.xlu1 %v5188_v34, %s4725_s23  ;;  %v5424_v42 = vunpack.c.l.b16 %v318_v33  ;;  %v887_v33 = vpack.c.b16 %v5428_v60, %v5428_v60 }
  0xff   : > { %v5412_v43 = vpop.permute.xlu2 %825  ;;  %v5414_v17 = vpop.permute.xlu1 %775  ;;  %v5437_v14 = vpack.c.b16 %v5424_v42, %v5424_v42 }
 0x100   : > { %8131 = vst [vmem:[#allocation76_spill] sm:$0xff] %v5412_v43 }
 0x101   : > { %8132 = vst [vmem:[#allocation77_spill] sm:$0xff] %v5414_v17 }
 0x102   : > { %919 = vrot.lane.b32.xlu0 %v5214_v38, %s4725_s23  ;;  %8136 = vst [vmem:[#allocation81_spill] sm:$0xff] %v5437_v14 }
 0x104   : > { %v5420_v1 = vpop.permute.xlu0 %779 }
 0x105   : > { %8133 = vst [vmem:[#allocation78_spill] sm:$0xff] %v5420_v1  ;;  %923 = vrot.lane.b32.xlu2 %v5225_v44, %s4725_s23  ;;  %921 = vrot.lane.b32.xlu1 %v5208_v11, %s4725_s23  ;;  %v5443_v1 = vunpack.c.l.b16 %v320_v63 }
 0x107   : > { %v5430_v17 = vpop.permute.xlu2 %831  ;;  %v5433_v23 = vpop.permute.xlu1 %781 }
 0x108   : > { %8134 = vst [vmem:[#allocation79_spill] sm:$0xff] %v5430_v17  ;;  %v322_v17 = vld [vmem:[%s4801_s9 + $0x68] sm:$0xf] }
 0x109   : > { %8135 = vst [vmem:[#allocation80_spill] sm:$0xff] %v5433_v23  ;;  %v5451_v23 = vunpack.c.l.b16 %v324_v54  ;;  %v5458_v11 = vunpack.c.l.b16 %v322_v17  ;;  %v5475_v54 = vunpack.c.l.b16 %v326_v22  ;;  %v330_v17 = vld [vmem:[%s4801_s9 + $0x88] sm:$0xf] }
 0x10a   : > { %925 = vrot.lane.b32.xlu0 %v5237_v9, %s4725_s23  ;;  %v5456_v9 = vpack.c.b16 %v5443_v1, %v5443_v1 }
 0x10c   : > { %v5447_v44 = vpop.permute.xlu0 %785  ;;  %8138 = vst [vmem:[#allocation83_spill] sm:$0xff] %v5456_v9 }
 0x10d   : > { %8137 = vst [vmem:[#allocation82_spill] sm:$0xff] %v5447_v44  ;;  %929 = vrot.lane.b32.xlu2 %v5437_v14, %s4725_s23  ;;  %927 = vrot.lane.b32.xlu1 %v887_v33, %s4725_s23  ;;  %v5467_v44 = vpack.c.b16 %v5451_v23, %v5451_v23  ;;  %v5473_v33 = vpack.c.b16 %v5458_v11, %v5458_v11  ;;  %v328_v14 = vld [vmem:[%s4801_s9 + $0x80] sm:$0xf] }
 0x10e   : > { %v5491_v57 = vunpack.c.l.b16 %v328_v14 }
 0x10f   : > { %v5460_v63 = vpop.permute.xlu2 %837  ;;  %v5463_v37 = vpop.permute.xlu1 %787  ;;  %8140 = vst [vmem:[#allocation85_spill] sm:$0xff] %v5467_v44 }
 0x110   : > { %8139 = vst [vmem:[#allocation84_spill] sm:$0xff] %v5463_v37  ;;  %v5483_v37 = vunpack.c.l.b16 %v330_v17  ;;  %v5505_v17 = vpack.c.b16 %v5491_v57, %v5491_v57 }
 0x111   : > { %8141 = vst [vmem:[#allocation86_spill] sm:$0xff] %v5473_v33 }
 0x112   : > { %931 = vrot.lane.b32.xlu0 %v5456_v9, %s4725_s23  ;;  %v5489_v9 = vpack.c.b16 %v5475_v54, %v5475_v54  ;;  %v5499_v43 = vpack.c.b16 %v5483_v37, %v5483_v37  ;;  %8145 = vst [vmem:[#allocation90_spill] sm:$0xff] %v5505_v17 }
 0x114   : > { %v5479_v15 = vpop.permute.xlu0 %821  ;;  %8142 = vst [vmem:[#allocation87_spill] sm:$0xff] %v5489_v9 }
 0x115   : > { %935 = vrot.lane.b32.xlu2 %v5467_v44, %s4725_s23  ;;  %933 = vrot.lane.b32.xlu1 %v5473_v33, %s4725_s23  ;;  %8144 = vst [vmem:[#allocation89_spill] sm:$0xff] %v5499_v43 }
 0x117   : > { %v5493_v22 = vpop.permute.xlu2 %843  ;;  %v5495_v40 = vpop.permute.xlu1 %823 }
 0x118   : > { %8143 = vst [vmem:[#allocation88_spill] sm:$0xff] %v5493_v22 }
 0x11a   : > { %937 = vrot.lane.b32.xlu0 %v5489_v9, %s4725_s23 }
 0x11c   : > { %v5507_v33 = vpop.permute.xlu0 %827 }
 0x11d   : > { %8146 = vst [vmem:[#allocation91_spill] sm:$0xff] %v5507_v33  ;;  %941 = vrot.lane.b32.xlu2 %v5499_v43, %s4725_s23  ;;  %939 = vrot.lane.b32.xlu1 %v5505_v17, %s4725_s23 }
 0x11f   : > { %v5513_v14 = vpop.permute.xlu2 %849  ;;  %v5515_v44 = vpop.permute.xlu1 %829 }
 0x120   : > { %8147 = vst [vmem:[#allocation92_spill] sm:$0xff] %v5513_v14 }
 0x121   : > { %8148 = vst [vmem:[#allocation93_spill] sm:$0xff] %v5515_v44  ;;  %v317_v44 = vld [vmem:[%s4801_s9 + $0x54] sm:$0x1] }
 0x122   : > { %1023 = vrot.lane.b32.xlu0 %v4939_v49, %s4726_s24  ;;  %v951_v27 = vunpack.c.l.b16 %v317_v44  ;;  %v323_v44 = vld [vmem:[%s4801_s9 + $0x6c] sm:$0x1] }
 0x124   : > { %v5519_v9 = vpop.permute.xlu0 %833  ;;  %v5566_v59 = vpack.c.b16 %v951_v27, %v5428_v60  ;;  %v954_v27 = vunpack.c.l.b16 %v323_v44  ;;  %v327_v60 = vld [vmem:[%s4801_s9 + $0x7c] sm:$0x1]  ;;  %v329_v44 = vld [vmem:[%s4801_s9 + $0x84] sm:$0x1] }
 0x125   : > { %8149 = vst [vmem:[#allocation94_spill] sm:$0xff] %v5519_v9  ;;  %1027 = vrot.lane.b32.xlu2 %v4988_v51, %s4726_s24  ;;  %1025 = vrot.lane.b32.xlu1 %v4962_v19, %s4726_s24 }
 0x126   : > { %8159 = vst [vmem:[#allocation104_spill] sm:$0xff] %v5566_v59 }
 0x127   : > { %v5525_v43 = vpop.permute.xlu2 %855  ;;  %v5527_v17 = vpop.permute.xlu1 %835 }
 0x128   : > { %8150 = vst [vmem:[#allocation95_spill] sm:$0xff] %v5525_v43 }
 0x129   : > { %8151 = vst [vmem:[#allocation96_spill] sm:$0xff] %v5527_v17  ;;  %v319_v17 = vld [vmem:[%s4801_s9 + $0x5c] sm:$0x1] }
 0x12a   : > { %1029 = vrot.lane.b32.xlu0 %v4982_v45, %s4726_s24  ;;  %v952_v33 = vunpack.c.l.b16 %v319_v17  ;;  %v325_v17 = vld [vmem:[%s4801_s9 + $0x74] sm:$0x1] }
 0x12c   : > { %v5531_v14 = vpop.permute.xlu0 %839 }
 0x12d   : > { %1033 = vrot.lane.b32.xlu2 %v5029_v2, %s4726_s24  ;;  %1031 = vrot.lane.b32.xlu1 %v5010_v24, %s4726_s24 }
 0x12f   : > { %v5537_v49 = vpop.permute.xlu2 %861  ;;  %v5539_v9 = vpop.permute.xlu1 %841 }
 0x130   : > { %8152 = vst [vmem:[#allocation97_spill] sm:$0xff] %v5537_v49 }
 0x131   : > { %8153 = vst [vmem:[#allocation98_spill] sm:$0xff] %v5539_v9 }
 0x132   : > { %1035 = vrot.lane.b32.xlu0 %v5020_v13, %s4726_s24 }
 0x134   : > { %v5543_v43 = vpop.permute.xlu0 %845 }
 0x135   : > { %8154 = vst [vmem:[#allocation99_spill] sm:$0xff] %v5543_v43  ;;  %1039 = vrot.lane.b32.xlu2 %v5058_v36, %s4726_s24  ;;  %1037 = vrot.lane.b32.xlu1 %v5045_v32, %s4726_s24  ;;  %v321_v43 = vld [vmem:[%s4801_s9 + $0x64] sm:$0x1]  ;;  %v5561_v36 = vpack.c.b16 %v952_v33, %v5424_v42  ;;  %v955_v42 = vunpack.c.l.b16 %v325_v17  ;;  %v5594_v17 = vpack.c.b16 %v954_v27, %v5458_v11 }
 0x137   : > { %v5551_v22 = vpop.permute.xlu2 %867  ;;  %v5553_v49 = vpop.permute.xlu1 %847  ;;  %8158 = vst [vmem:[#allocation103_spill] sm:$0xff] %v5561_v36  ;;  %v977_v33 = vshll.u32 %v5561_v36, 16 }
 0x138   : > { %8155 = vst [vmem:[#allocation100_spill] sm:$0xff] %v5551_v22  ;;  %v953_v22 = vunpack.c.l.b16 %v321_v43  ;;  %v970_v43 = vshll.u32 %v5566_v59, 16 }
 0x139   : > { %8156 = vst [vmem:[#allocation101_spill] sm:$0xff] %v5553_v49 }
 0x13a   : > { %1041 = vrot.lane.b32.xlu0 %v5056_v35, %s4726_s24  ;;  %8164 = vst [vmem:[#allocation109_spill] sm:$0xff] %v5594_v17  ;;  %v972_v32 = vrot.slane %v970_v43, 1 }
 0x13c   : > { %v5558_v9 = vpop.permute.xlu0 %851 }
 0x13d   : > { %8157 = vst [vmem:[#allocation102_spill] sm:$0xff] %v5558_v9  ;;  %1045 = vrot.lane.b32.xlu2 %v5092_v55, %s4726_s24  ;;  %1043 = vrot.lane.b32.xlu1 %v5081_v0, %s4726_s24  ;;  %v5578_v9 = vpack.c.b16 %v953_v22, %v5443_v1  ;;  %v975_v1 = vshrl.u32 %v5561_v36, 16  ;;  %v979_v22 = vrot.slane %v977_v33, 1  ;;  %v957_v33 = vunpack.c.l.b16 %v329_v44 }
 0x13f   : > { %v5572_v49 = vpop.permute.xlu2 %899  ;;  %v5574_v26 = vpop.permute.xlu1 %853  ;;  %v5608_v11 = vor.u32 %v979_v22, %v975_v1  ;;  %v982_v43 = vshrl.u32 %v5578_v9, 16 }
 0x140   : > { %8160 = vst [vmem:[#allocation105_spill] sm:$0xff] %v5572_v49  ;;  %v5587_v49 = vpack.c.b16 %v955_v42, %v5451_v23  ;;  %v984_v23 = vshll.u32 %v5578_v9, 16 }
 0x141   : > { %8161 = vst [vmem:[#allocation106_spill] sm:$0xff] %v5574_v26  ;;  %v956_v26 = vunpack.c.l.b16 %v327_v60  ;;  %v958_v60 = vunpack.c.l.b16 %v331_v12 }
 0x142   : > { %1047 = vrot.lane.b32.xlu0 %v5087_v46, %s4726_s24  ;;  %8163 = vst [vmem:[#allocation108_spill] sm:$0xff] %v5587_v49  ;;  %v998_v27 = vshll.u32 %v5587_v49, 16  ;;  %v986_v53 = vrot.slane %v984_v23, 1 }
 0x143   : > { %v5606_v36 = vpack.c.b16 %v956_v26, %v5475_v54  ;;  %v5621_v26 = vpack.c.b16 %v957_v33, %v5491_v57  ;;  %v996_v54 = vshrl.u32 %v5587_v49, 16 }
 0x144   : > { %v5584_v29 = vpop.permute.xlu0 %857  ;;  %v1000_v1 = vrot.slane %v998_v27, 1 }
 0x145   : > { %8162 = vst [vmem:[#allocation107_spill] sm:$0xff] %v5584_v29  ;;  %1051 = vrot.lane.b32.xlu2 %v5108_v58, %s4726_s24  ;;  %1049 = vrot.lane.b32.xlu1 %v5101_v16, %s4726_s24  ;;  %v968_v29 = vshrl.u32 %v5566_v59, 16  ;;  %v1005_v44 = vshll.u32 %v5606_v36, 16 }
 0x146   : > { %8167 = vst [vmem:[#allocation112_spill] sm:$0xff] %v5606_v36  ;;  %v5635_v57 = vor.u32 %v1000_v1, %v996_v54 }
 0x147   : > { %v5601_v42 = vpop.permute.xlu2 %905  ;;  %v5603_v31 = vpop.permute.xlu1 %859  ;;  %v973_v59 = vor.u32 %v972_v32, %v968_v29  ;;  %8170 = vst [vmem:[#allocation115_spill] sm:$0xff] %v5621_v26  ;;  %v5627_v32 = vor.u32 %v986_v53, %v982_v43  ;;  %v989_v29 = vshrl.u32 %v5594_v17, 16  ;;  %v1003_v53 = vshrl.u32 %v5606_v36, 16 }
 0x148   : > { %8165 = vst [vmem:[#allocation110_spill] sm:$0xff] %v5601_v42  ;;  %v991_v42 = vshll.u32 %v5594_v17, 16  ;;  %v4517_v17 = vld [vmem:[%s7891_s2 + $0x78] sm:$0xff] }
 0x149   : > { %8166 = vst [vmem:[#allocation111_spill] sm:$0xff] %v5603_v31  ;;  %v5618_v31 = vpack.c.b16 %v958_v60, %v5483_v37  ;;  %2670 = vmatpush.bf16.msra.mxu2 %v4517_v17  ;;  %v4524_v17 = vld [vmem:[%s7891_s2 + $0x170] sm:$0xff] }
 0x14a   : > { %1053 = vrot.lane.b32.xlu0 %v5104_v28, %s4726_s24  ;;  %v993_v22 = vrot.slane %v991_v42, 1  ;;  %8172 = vst [vmem:[#allocation117_spill] sm:$0xff] %v5635_v57  ;;  %v1012_v42 = vshll.u32 %v5621_v26, 16 }
 0x14b   : > { %8169 = vst [vmem:[#allocation114_spill] sm:$0xff] %v5618_v31  ;;  %v1019_v60 = vshll.u32 %v5618_v31, 16  ;;  %v1017_v43 = vshrl.u32 %v5618_v31, 16 }
 0x14c   : > { %v5615_v12 = vpop.permute.xlu0 %863  ;;  %v5640_v33 = vor.u32 %v993_v22, %v989_v29  ;;  %v1010_v29 = vshrl.u32 %v5621_v26, 16  ;;  %v1014_v22 = vrot.slane %v1012_v42, 1 }
 0x14d   : > { %8168 = vst [vmem:[#allocation113_spill] sm:$0xff] %v5615_v12  ;;  %1057 = vrot.lane.b32.xlu2 %v5608_v11, %s4726_s24  ;;  %1055 = vrot.lane.b32.xlu1 %v973_v59, %s4726_s24  ;;  %v1007_v59 = vrot.slane %v1005_v44, 1  ;;  %v1021_v54 = vrot.slane %v1019_v60, 1 }
 0x14e   : > { %8173 = vst [vmem:[#allocation118_spill] sm:$0xff] %v5640_v33  ;;  %v5662_v36 = vor.u32 %v1014_v22, %v1010_v29 }
 0x14f   : > { %v5631_v37 = vpop.permute.xlu2 %911  ;;  %v5633_v23 = vpop.permute.xlu1 %865  ;;  %v5651_v1 = vor.u32 %v1007_v59, %v1003_v53  ;;  %v5658_v12 = vor.u32 %v1021_v54, %v1017_v43 }
 0x150   : > { %8171 = vst [vmem:[#allocation116_spill] sm:$0xff] %v5633_v23 }
 0x151   : > { %8174 = vst [vmem:[#allocation119_spill] sm:$0xff] %v5651_v1 }
 0x152   : > { %1059 = vrot.lane.b32.xlu0 %v5627_v32, %s4726_s24  ;;  %8176 = vst [vmem:[#allocation121_spill] sm:$0xff] %v5658_v12 }
 0x153   : > { %8177 = vst [vmem:[#allocation122_spill] sm:$0xff] %v5662_v36 }
 0x154   : > { %v5644_v27 = vpop.permute.xlu0 %895 }
 0x155   : > { %1063 = vrot.lane.b32.xlu2 %v5635_v57, %s4726_s24  ;;  %1061 = vrot.lane.b32.xlu1 %v5640_v33, %s4726_s24  ;;  %v8208_v57 = vld [vmem:[#allocation19_spill] sm:$0xff] }
 0x157   : > { %v5654_v23 = vpop.permute.xlu2 %917  ;;  %v5656_v44 = vpop.permute.xlu1 %897 }
 0x158   : > { %8175 = vst [vmem:[#allocation120_spill] sm:$0xff] %v5654_v23 }
 0x15a   : > { %1065 = vrot.lane.b32.xlu0 %v5651_v1, %s4726_s24  ;;  %v8205_v1 = vld [vmem:[#allocation21_spill] sm:$0xff] }
 0x15c   : > { %v5664_v60 = vpop.permute.xlu0 %901 }
 0x15d   : > { %8178 = vst [vmem:[#allocation123_spill] sm:$0xff] %v5664_v60  ;;  %1069 = vrot.lane.b32.xlu2 %v5658_v12, %s4726_s24  ;;  %1067 = vrot.lane.b32.xlu1 %v5662_v36, %s4726_s24 }
 0x15f   : > { %v5670_v53 = vpop.permute.xlu2 %923  ;;  %v5672_v59 = vpop.permute.xlu1 %903 }
 0x160   : > { %8179 = vst [vmem:[#allocation124_spill] sm:$0xff] %v5670_v53 }
 0x161   : > { %8180 = vst [vmem:[#allocation125_spill] sm:$0xff] %v5672_v59  ;;  %v8198_v59 = vld [vmem:[#allocation8_spill] sm:$0xff] }
 0x162   : > { %1074 = vrot.lane.b32.xlu0 %v5137_v6, %s4727_s25 }
 0x164   : > { %v5676_v42 = vpop.permute.xlu0 %907 }
 0x165   : > { %8181 = vst [vmem:[#allocation126_spill] sm:$0xff] %v5676_v42  ;;  %1882 = vrot.lane.b32.xlu2 %v4843_v30, %s4723_s14  ;;  %1076 = vrot.lane.b32.xlu1 %v5145_v20, %s4727_s25  ;;  %v8189_v42 = vld [vmem:[#allocation16_spill] sm:$0xff] }
 0x167   : > { %v5682_v43 = vpop.permute.xlu2 %929  ;;  %v5684_v54 = vpop.permute.xlu1 %909 }
 0x168   : > { %8182 = vst [vmem:[#allocation127_spill] sm:$0xff] %v5682_v43 }
 0x169   : > { %8183 = vst [vmem:[#allocation128_spill] sm:$0xff] %v5684_v54 }
 0x16a   : > { %1884 = vrot.lane.b32.xlu0 %v4836_v25, %s4723_s14 }
 0x16c   : > { %v5688_v29 = vpop.permute.xlu0 %913 }
 0x16d   : > { %1900 = vrot.lane.b32.xlu2 %v4927_v39, %s4723_s14  ;;  %1898 = vrot.lane.b32.xlu1 %v4908_v21, %s4723_s14 }
 0x16f   : > { %v5694_v6 = vpop.permute.xlu2 %935  ;;  %v5696_v22 = vpop.permute.xlu1 %915 }
 0x170   : > { %8184 = vst [vmem:[#allocation129_spill] sm:$0xff] %v5694_v6 }
 0x171   : > { %8185 = vst [vmem:[#allocation130_spill] sm:$0xff] %v5696_v22  ;;  %v8220_v22 = vld [vmem:[#allocation13_spill] sm:$0xff] }
 0x172   : > { %1930 = vrot.lane.b32.xlu0 %v4894_v8, %s4725_s23 }
 0x174   : > { %v5700_v20 = vpop.permute.xlu0 %919 }
 0x175   : > { %8186 = vst [vmem:[#allocation131_spill] sm:$0xff] %v5700_v20  ;;  %1946 = vrot.lane.b32.xlu2 %v5000_v5, %s4725_s23  ;;  %1932 = vrot.lane.b32.xlu1 %v4908_v21, %s4725_s23 }
 0x177   : > { %v5706_v43 = vpop.permute.xlu2 %941  ;;  %v5708_v54 = vpop.permute.xlu1 %921 }
 0x178   : > { %8187 = vst [vmem:[#allocation132_spill] sm:$0xff] %v5706_v43 }
 0x179   : > { %8188 = vst [vmem:[#allocation133_spill] sm:$0xff] %v5708_v54 }
 0x17a   : > { %1948 = vrot.lane.b32.xlu0 %v8189_v42, %s4725_s23 }
 0x17c   : > { %v5712_v6 = vpop.permute.xlu0 %925 }
 0x17d   : > { %8190 = vst [vmem:[#allocation16_spill] sm:$0xff] %v5712_v6  ;;  %1980 = vrot.lane.b32.xlu2 %v4927_v39, %s4727_s25  ;;  %1978 = vrot.lane.b32.xlu1 %v4908_v21, %s4727_s25  ;;  %v8193_v6 = vld [vmem:[#allocation18_spill] sm:$0xff] }
 0x17f   : > { %v5718_v12 = vpop.permute.xlu2 %1027  ;;  %v5720_v5 = vpop.permute.xlu1 %927 }
 0x180   : > { %8191 = vst [vmem:[#allocation134_spill] sm:$0xff] %v5720_v5 }
 0x182   : > { %1994 = vrot.lane.b32.xlu0 %v8189_v42, %s4727_s25 }
 0x184   : > { %v5724_v43 = vpop.permute.xlu0 %931 }
 0x185   : > { %8192 = vst [vmem:[#allocation135_spill] sm:$0xff] %v5724_v43  ;;  %1132 = vrot.lane.b32.xlu2 %v4962_v19, %s4728_s26  ;;  %1996 = vrot.lane.b32.xlu1 %v8193_v6, %s4727_s25 }
 0x187   : > { %v5730_v54 = vpop.permute.xlu2 %1033  ;;  %v5732_v31 = vpop.permute.xlu1 %933 }
 0x188   : > { %8194 = vst [vmem:[#allocation136_spill] sm:$0xff] %v5730_v54 }
 0x189   : > { %8195 = vst [vmem:[#allocation137_spill] sm:$0xff] %v5732_v31  ;;  %v8199_v31 = vld [vmem:[#allocation11_spill] sm:$0xff] }
 0x18a   : > { %1134 = vrot.lane.b32.xlu0 %v4988_v51, %s4728_s26  ;;  %v8200_v51 = vld [vmem:[#allocation6_spill] sm:$0xff] }
 0x18c   : > { %v5736_v5 = vpop.permute.xlu0 %937 }
 0x18d   : > { %8196 = vst [vmem:[#allocation138_spill] sm:$0xff] %v5736_v5  ;;  %1150 = vrot.lane.b32.xlu2 %v5081_v0, %s4728_s26  ;;  %1148 = vrot.lane.b32.xlu1 %v5056_v35, %s4728_s26  ;;  %v8201_v35 = vld [vmem:[#allocation12_spill] sm:$0xff] }
 0x18f   : > { %v5742_v43 = vpop.permute.xlu2 %1039  ;;  %v5744_v19 = vpop.permute.xlu1 %939 }
 0x190   : > { %8197 = vst [vmem:[#allocation139_spill] sm:$0xff] %v5744_v19 }
 0x192   : > { %1886 = vrot.lane.b32.xlu0 %v8198_v59, %s4723_s14 }
 0x194   : > { %v5748_v53 = vpop.permute.xlu0 %1023 }
 0x195   : > { %1902 = vrot.lane.b32.xlu2 %v8199_v31, %s4723_s14  ;;  %1888 = vrot.lane.b32.xlu1 %v8200_v51, %s4723_s14 }
 0x197   : > { %v5754_v5 = vpop.permute.xlu2 %1045  ;;  %v5756_v0 = vpop.permute.xlu1 %1025 }
 0x19a   : > { %1904 = vrot.lane.b32.xlu0 %v8201_v35, %s4723_s14 }
 0x19c   : > { %v5760_v20 = vpop.permute.xlu0 %1029 }
 0x19d   : > { %1936 = vrot.lane.b32.xlu2 %v8199_v31, %s4725_s23  ;;  %1934 = vrot.lane.b32.xlu1 %v4927_v39, %s4725_s23 }
 0x19f   : > { %v5766_v19 = vpop.permute.xlu2 %1051  ;;  %v5768_v36 = vpop.permute.xlu1 %1031 }
 0x1a0   : > { %8202 = vst [vmem:[#allocation8_spill] sm:$0xff] %v5766_v19 }
 0x1a1   : > { %8203 = vst [vmem:[#allocation11_spill] sm:$0xff] %v5768_v36 }
 0x1a2   : > { %1950 = vrot.lane.b32.xlu0 %v8193_v6, %s4725_s23 }
 0x1a4   : > { %v5772_v26 = vpop.permute.xlu0 %1035 }
 0x1a5   : > { %8204 = vst [vmem:[#allocation12_spill] sm:$0xff] %v5772_v26  ;;  %1982 = vrot.lane.b32.xlu2 %v8199_v31, %s4727_s25  ;;  %1952 = vrot.lane.b32.xlu1 %v8205_v1, %s4725_s23 }
 0x1a7   : > { %v5778_v23 = vpop.permute.xlu2 %1057  ;;  %v5780_v33 = vpop.permute.xlu1 %1037 }
 0x1a8   : > { %8206 = vst [vmem:[#allocation140_spill] sm:$0xff] %v5778_v23 }
 0x1a9   : > { %8207 = vst [vmem:[#allocation141_spill] sm:$0xff] %v5780_v33 }
 0x1aa   : > { %1984 = vrot.lane.b32.xlu0 %v8201_v35, %s4727_s25 }
 0x1ac   : > { %v5784_v19 = vpop.permute.xlu0 %1041 }
 0x1ad   : > { %2000 = vrot.lane.b32.xlu2 %v8208_v57, %s4727_s25  ;;  %1998 = vrot.lane.b32.xlu1 %v8205_v1, %s4727_s25 }
 0x1af   : > { %v5790_v26 = vpop.permute.xlu2 %1063  ;;  %v5792_v49 = vpop.permute.xlu1 %1043 }
 0x1b0   : > { %8209 = vst [vmem:[#allocation142_spill] sm:$0xff] %v5790_v26 }
 0x1b2   : > { %1136 = vrot.lane.b32.xlu0 %v4982_v45, %s4728_s26 }
 0x1b4   : > { %v5796_v23 = vpop.permute.xlu0 %1047 }
 0x1b5   : > { %8210 = vst [vmem:[#allocation143_spill] sm:$0xff] %v5796_v23  ;;  %1152 = vrot.lane.b32.xlu2 %v5092_v55, %s4728_s26  ;;  %1138 = vrot.lane.b32.xlu1 %v5010_v24, %s4728_s26  ;;  %v8215_v24 = vld [vmem:[#allocation7_spill] sm:$0xff]  ;;  %v4495_v23 = vld [vmem:[%s7891_s2 + $0x8] sm:$0xff] }
 0x1b7   : > { %v5802_v33 = vpop.permute.xlu2 %1069  ;;  %v5804_v54 = vpop.permute.xlu1 %1049 }
 0x1b8   : > { %8211 = vst [vmem:[#allocation144_spill] sm:$0xff] %v5802_v33  ;;  %v4501_v33 = vld [vmem:[%s7891_s2 + $0x38] sm:$0xff] }
 0x1b9   : > { %8212 = vst [vmem:[#allocation145_spill] sm:$0xff] %v5804_v54  ;;  %1662 = vmatpush.bf16.msra.mxu0 %v4501_v33  ;;  %v4499_v33 = vld [vmem:[%s7891_s2 + $0x28] sm:$0xff] }
 0x1ba   : > { %1154 = vrot.lane.b32.xlu0 %v5087_v46, %s4728_s26 }
 0x1bc   : > { %v5808_v26 = vpop.permute.xlu0 %1053 }
 0x1bd   : > { %8213 = vst [vmem:[#allocation146_spill] sm:$0xff] %v5808_v26  ;;  %1092 = vrot.lane.b32.xlu2 %v5188_v34, %s4727_s25  ;;  %1090 = vrot.lane.b32.xlu1 %v5194_v56, %s4727_s25  ;;  %v8217_v26 = vld [vmem:[#allocation14_spill] sm:$0xff]  ;;  %v8218_v34 = vld [vmem:[#allocation9_spill] sm:$0xff] }
 0x1bf   : > { %v5814_v45 = vpop.permute.xlu2 %1882  ;;  %v5816_v55 = vpop.permute.xlu1 %1055 }
 0x1c0   : > { %8214 = vst [vmem:[#allocation147_spill] sm:$0xff] %v5816_v55  ;;  %v4500_v55 = vld [vmem:[%s7891_s2 + $0x30] sm:$0xff] }
 0x1c1   : > { %1663 = vmatpush.bf16.msra.mxu0 %v4500_v55  ;;  %v4498_v55 = vld [vmem:[%s7891_s2 + $0x20] sm:$0xff] }
 0x1c2   : > { %1890 = vrot.lane.b32.xlu0 %v8215_v24, %s4723_s14 }
 0x1c4   : > { %v5823_v46 = vpop.permute.xlu0 %1059 }
 0x1c5   : > { %8216 = vst [vmem:[#allocation148_spill] sm:$0xff] %v5823_v46  ;;  %1906 = vrot.lane.b32.xlu2 %v8217_v26, %s4723_s14  ;;  %1892 = vrot.lane.b32.xlu1 %v8218_v34, %s4723_s14 }
 0x1c6   : > { %1664 = vmatpush.bf16.msra.mxu0 %v4499_v33  ;;  %v4525_v33 = vld [vmem:[%s7891_s2 + $0x178] sm:$0xff] }
 0x1c7   : > { %v5829_v56 = vpop.permute.xlu2 %1900  ;;  %v5834_v54 = vpop.permute.xlu1 %1061  ;;  %2969 = vmatpush.bf16.msra.mxu3 %v4525_v33  ;;  %v4496_v33 = vld [vmem:[%s7891_s2 + $0x10] sm:$0xff] }
 0x1c8   : > { %8219 = vst [vmem:[#allocation149_spill] sm:$0xff] %v5834_v54 }
 0x1ca   : > { %1908 = vrot.lane.b32.xlu0 %v8220_v22, %s4723_s14  ;;  %1665 = vmatpush.bf16.msra.mxu0 %v4498_v55 }
 0x1cb   : > { %2970 = vmatpush.bf16.msra.mxu3 %v4524_v17  ;;  %v4514_v17 = vld [vmem:[%s7891_s2 + $0x60] sm:$0xff] }
 0x1cc   : > { %v5841_v46 = vpop.permute.xlu0 %1065 }
 0x1cd   : > { %8221 = vst [vmem:[#allocation13_spill] sm:$0xff] %v5841_v46  ;;  %1940 = vrot.lane.b32.xlu2 %v8217_v26, %s4725_s23  ;;  %1938 = vrot.lane.b32.xlu1 %v8201_v35, %s4725_s23  ;;  %v4497_v46 = vld [vmem:[%s7891_s2 + $0x18] sm:$0xff] }
 0x1ce   : > { %1666 = vmatpush.bf16.msra.mxu0 %v4497_v46  ;;  %v4515_v46 = vld [vmem:[%s7891_s2 + $0x68] sm:$0xff] }
 0x1cf   : > { %v5847_v34 = vpop.permute.xlu2 %1946  ;;  %v5852_v54 = vpop.permute.xlu1 %1067 }
 0x1d0   : > { %8222 = vst [vmem:[#allocation150_spill] sm:$0xff] %v5852_v54  ;;  %v4516_v54 = vld [vmem:[%s7891_s2 + $0x70] sm:$0xff] }
 0x1d1   : > { %2671 = vmatpush.bf16.msra.mxu2 %v4516_v54  ;;  %v4523_v54 = vld [vmem:[%s7891_s2 + $0x168] sm:$0xff] }
 0x1d2   : > { %1954 = vrot.lane.b32.xlu0 %v8208_v57, %s4725_s23  ;;  %1667 = vmatpush.bf16.msra.mxu0 %v4496_v33  ;;  %v4522_v33 = vld [vmem:[%s7891_s2 + $0x160] sm:$0xff] }
 0x1d3   : > { %2971 = vmatpush.bf16.msra.mxu3 %v4523_v54  ;;  %v4494_v54 = vld [vmem:[%s7891_s2] sm:$0xff] }
 0x1d4   : > { %v5865_v60 = vpop.permute.xlu0 %1074 }
 0x1d5   : > { %1986 = vrot.lane.b32.xlu2 %v8217_v26, %s4727_s25  ;;  %1956 = vrot.lane.b32.xlu1 %v5068_v7, %s4725_s23 }
 0x1d6   : > { %2672 = vmatpush.bf16.msra.mxu2 %v4515_v46  ;;  %1668 = vmatpush.bf16.msra.mxu0 %v4495_v23  ;;  %v4513_v23 = vld [vmem:[%s7891_s2 + $0x58] sm:$0xff] }
 0x1d7   : > { %v5877_v55 = vpop.permute.xlu2 %1980  ;;  %v5882_v36 = vpop.permute.xlu1 %1076  ;;  %2972 = vmatpush.bf16.msra.mxu3 %v4522_v33  ;;  %v4512_v33 = vld [vmem:[%s7891_s2 + $0x50] sm:$0xff] }
 0x1da   : > { %1988 = vrot.lane.b32.xlu0 %v8220_v22, %s4727_s25  ;;  %2673 = vmatpush.bf16.msra.mxu2 %v4514_v17  ;;  %v4521_v17 = vld [vmem:[%s7891_s2 + $0x158] sm:$0xff] }
 0x1db   : > { %1669 = vmatpush.bf16.msra.mxu0 %v4494_v54  ;;  %2973 = vmatpush.bf16.msra.mxu3 %v4521_v17  ;;  %v4520_v54 = vld [vmem:[%s7891_s2 + $0x150] sm:$0xff] }
 0x1dc   : > { %v1885_v26 = vpop.permute.xlu0 %1884 }
 0x1dd   : > { %2004 = vrot.lane.b32.xlu2 %v5085_v18, %s4727_s25  ;;  %2002 = vrot.lane.b32.xlu1 %v5068_v7, %s4727_s25 }
 0x1de   : > { %2674 = vmatpush.bf16.msra.mxu2 %v4513_v23  ;;  %v8223_v23 = vld [vmem:[#allocation5_spill] sm:$0xff] }
 0x1df   : > { %v5905_v46 = vpop.permute.xlu2 %1132  ;;  %v5907_v1 = vpop.permute.xlu1 %1898  ;;  %v2026_v57 = vsel %vm1180_vm0, %v8223_v23, %v5217_v3  ;;  %2974 = vmatpush.bf16.msra.mxu3 %v4520_v54  ;;  %v4510_v23 = vld [vmem:[%s7891_s2 + $0x40] sm:$0xff] }
 0x1e0   : > { %v2051_v17 = vsel %vm1253_vm1, %v2026_v57, %v5814_v45 }
 0x1e1   : > { %v2098_v57 = vsel %vm1302_vm2, %v2051_v17, %v5479_v15 }
 0x1e2   : > { %1140 = vrot.lane.b32.xlu0 %v5029_v2, %s4728_s26  ;;  %2675 = vmatpush.bf16.msra.mxu2 %v4512_v33  ;;  %v4519_v33 = vld [vmem:[%s7891_s2 + $0x148] sm:$0xff] }
 0x1e3   : > { %2975 = vmatpush.bf16.msra.mxu3 %v4519_v33 }
 0x1e4   : > { %v1931_v7 = vpop.permute.xlu0 %1930 }
 0x1e5   : > { %1156 = vrot.lane.b32.xlu2 %v5101_v16, %s4728_s26  ;;  %1142 = vrot.lane.b32.xlu1 %v5020_v13, %s4728_s26  ;;  %v4511_v13 = vld [vmem:[%s7891_s2 + $0x48] sm:$0xff]  ;;  %v2123_v54 = vsel %vm1351_vm3, %v2098_v57, %v1931_v7  ;;  %v2035_v7 = vsel %vm1180_vm0, %v4908_v21, %v5267_v10 }
 0x1e6   : > { %2676 = vmatpush.bf16.msra.mxu2 %v4511_v13  ;;  %v296_v13 = vld [vmem:[%s4801_s9] sm:$0xf]  ;;  %v2170_v17 = vsel %vm1400_vm4, %v2123_v54, %v5748_v53  ;;  %v2069_v33 = vsel %vm1253_vm1, %v2035_v7, %v5829_v56  ;;  %v4619_v54 = vld [vmem:[%s4801_s9 + $0x8] sm:$0xf] }
 0x1e7   : > { %v5927_v2 = vpop.permute.xlu2 %1150  ;;  %v1933_v16 = vpop.permute.xlu1 %1932 }
 0x1ea   : > { %1158 = vrot.lane.b32.xlu0 %v5108_v58, %s4728_s26  ;;  %v4518_v58 = vld [vmem:[%s7891_s2 + $0x140] sm:$0xff]  ;;  %2677 = vmatpush.bf16.msra.mxu2 %v4510_v23  ;;  %v1183_v23 = vsel %vm1180_vm0, %v296_v13, %v5217_v3  ;;  %v2034_v3 = vsel %vm1180_vm0, %v4894_v8, %v5204_v61  ;;  %v8224_v8 = vld [vmem:[#allocation10_spill] sm:$0xff] }
 0x1eb   : > { %2976 = vmatpush.bf16.msra.mxu3 %v4518_v58  ;;  %v1255_v56 = vsel %vm1253_vm1, %v1183_v23, %v5341_v48 }
 0x1ec   : > { %v1949_v45 = vpop.permute.xlu0 %1948  ;;  %v1304_v58 = vsel %vm1302_vm2, %v1255_v56, %v5479_v15 }
 0x1ed   : > { %1080 = vrot.lane.b32.xlu2 %v5149_v62, %s4727_s25  ;;  %1078 = vrot.lane.b32.xlu1 %v5155_v4, %s4727_s25  ;;  %v2027_v4 = vsel %vm1180_vm0, %v4843_v30, %v5239_v50  ;;  %v1186_v30 = vsel %vm1180_vm0, %v4619_v54, %v5239_v50  ;;  %v1353_v50 = vsel %vm1351_vm3, %v1304_v58, %v5644_v27 }
 0x1ee   : > { %v2053_v21 = vsel %vm1253_vm1, %v2027_v4, %v1885_v26  ;;  %v1257_v26 = vsel %vm1253_vm1, %v1186_v30, %v5350_v47  ;;  %v1402_v15 = vsel %vm1400_vm4, %v1353_v50, %v5748_v53  ;;  %v2067_v4 = vsel %vm1253_vm1, %v2034_v3, %v5907_v1 }
 0x1ef   : > { %v5959_v24 = vpop.permute.xlu2 %1902  ;;  %v1979_v62 = vpop.permute.xlu1 %1978  ;;  %v2099_v48 = vsel %vm1302_vm2, %v2053_v21, %v5495_v40  ;;  %v1306_v47 = vsel %vm1302_vm2, %v1257_v26, %v5495_v40  ;;  %v1451_v40 = vsel %vm1449_vm5, %v1402_v15, %v5865_v60 }
 0x1f0   : > { %v2195_v57 = vsel %vm1449_vm5, %v2170_v17, %v1979_v62  ;;  %v2125_v27 = vsel %vm1351_vm3, %v2099_v48, %v1933_v16 }
 0x1f1   : > { %v2242_v51 = vsel %vm1498_vm6, %v2195_v57, %v5905_v46  ;;  %v2171_v60 = vsel %vm1400_vm4, %v2125_v27, %v5756_v0 }
 0x1f2   : > { %1094 = vrot.lane.b32.xlu0 %v5202_v41, %s4727_s25  ;;  %v2282_v7 = vunpack.c.l.b16 %v2242_v51  ;;  %v2107_v41 = vsel %vm1302_vm2, %v2069_v33, %v5531_v14  ;;  %v1355_v33 = vsel %vm1351_vm3, %v1306_v47, %v5656_v44  ;;  %v2106_v44 = vsel %vm1302_vm2, %v2067_v4, %v5460_v63  ;;  %v8227_v4 = vld [vmem:[#allocation15_spill] sm:$0xff] }
 0x1f3   : > { %v2141_v62 = vsel %vm1351_vm3, %v2107_v41, %v1949_v45  ;;  %v4509_v45 = vld [vmem:[%s7891_s2 + $0x138] sm:$0xff]  ;;  %v1404_v1 = vsel %vm1400_vm4, %v1355_v33, %v5756_v0  ;;  %v2283_v54 = vunpack.c.h.b16 %v2242_v51  ;;  %v2139_v0 = vsel %vm1351_vm3, %v2106_v44, %v5847_v34 }
 0x1f4   : > { %v1995_v13 = vpop.permute.xlu0 %1994  ;;  %v2314_v17 = vpack.c.b16 %v2282_v7, %v2282_v7  ;;  %v2179_v21 = vsel %vm1400_vm4, %v2141_v62, %v5784_v19  ;;  %1816 = vmatpush.bf16.msra.mxu1 %v4509_v45  ;;  %v1453_v56 = vsel %vm1449_vm5, %v1404_v1, %v5882_v36  ;;  %v4508_v7 = vld [vmem:[%s7891_s2 + $0x130] sm:$0xff]  ;;  %v2197_v36 = vsel %vm1449_vm5, %v2171_v60, %v5877_v55  ;;  %v8225_v62 = vld [vmem:[#allocation49_spill] sm:$0xff] }
 0x1f5   : > { %1894 = vrot.lane.b32.xlu2 %v8224_v8, %s4723_s14  ;;  %1096 = vrot.lane.b32.xlu1 %v5214_v38, %s4727_s25  ;;  %v1500_v38 = vsel %vm1498_vm6, %v1451_v40, %v5905_v46  ;;  %v2315_v50 = vpack.c.b16 %v2283_v54, %v2283_v54  ;;  %v4507_v45 = vld [vmem:[%s7891_s2 + $0x128] sm:$0xff]  ;;  %v2178_v33 = vsel %vm1400_vm4, %v2139_v0, %v5742_v43 }
 0x1f6   : > { %v2350_v57 = vshrl.u32 %v2314_v17, 16  ;;  %v2353_v53 = vshll.u32 %v2314_v17, 16  ;;  %v1582_v51 = vunpack.c.l.b16 %v1500_v38  ;;  %v2211_v38 = vsel %vm1449_vm5, %v2178_v33, %v1995_v13 }
 0x1f7   : > { %v6016_v23 = vpop.permute.xlu2 %1936  ;;  %v1997_v16 = vpop.permute.xlu1 %1996  ;;  %v2359_v54 = vshll.u32 %v2315_v50, 16 }
 0x1f8   : > { %v2213_v30 = vsel %vm1449_vm5, %v2179_v21, %v1997_v16  ;;  %v2352_v3 = vrot.slane %v2350_v57, 4  ;;  %v2355_v26 = vrot.slane %v2353_v53, 5  ;;  %1817 = vmatpush.bf16.msra.mxu1 %v4508_v7 }
 0x1f9   : > { %v2251_v46 = vsel %vm1498_vm6, %v2213_v30, %v5927_v2 }
 0x1fa   : > { %1896 = vrot.lane.b32.xlu0 %v5256_v52, %s4723_s14  ;;  %v2300_v58 = vunpack.c.l.b16 %v2251_v46  ;;  %v2301_v15 = vunpack.c.h.b16 %v2251_v46  ;;  %v2356_v1 = vor.u32 %v2355_v26, %v2352_v3  ;;  %v8243_v52 = vld [vmem:[#allocation33_spill] sm:$0xff] }
 0x1fc   : > { %v1135_v41 = vpop.permute.xlu0 %1134  ;;  %v2332_v48 = vpack.c.b16 %v2300_v58, %v2300_v58  ;;  %1818 = vmatpush.bf16.msra.mxu1 %v4507_v45  ;;  %v2333_v7 = vpack.c.b16 %v2301_v15, %v2301_v15  ;;  %v2361_v15 = vrot.slane %v2359_v54, 5  ;;  %v4506_v45 = vld [vmem:[%s7891_s2 + $0x120] sm:$0xff] }
 0x1fd   : > { %1912 = vrot.lane.b32.xlu2 %v8225_v62, %s4723_s14  ;;  %v6045_v17 = vsel %vm1498_vm6, %v1453_v56, %v1135_v41  ;;  %v2243_v47 = vsel %vm1498_vm6, %v2197_v36, %v1135_v41  ;;  %1910 = vrot.lane.b32.xlu1 %v8227_v4, %s4723_s14  ;;  %v2357_v36 = vrot.slane %v2356_v1, 4 }
 0x1fe   : > { %8226 = vst [vmem:[#allocation5_spill] sm:$0xff] %v6045_v17  ;;  %v8032_v34 = vunpack.c.l.b16 %v6045_v17  ;;  %v2284_v55 = vunpack.c.l.b16 %v2243_v47  ;;  %v2285_v27 = vunpack.c.h.b16 %v2243_v47  ;;  %v2476_v40 = vshrl.u32 %v2332_v48, 16 }
 0x1ff   : > { %v2479_v57 = vshll.u32 %v2332_v48, 16  ;;  %v6056_v53 = vpop.permute.xlu2 %1982  ;;  %v6059_v44 = vpop.permute.xlu1 %1148  ;;  %v2485_v33 = vshll.u32 %v2333_v7, 16  ;;  %v4505_v7 = vld [vmem:[%s7891_s2 + $0x118] sm:$0xff] }
 0x200   : > { %v2316_v16 = vpack.c.b16 %v2284_v55, %v2284_v55  ;;  %v2317_v21 = vpack.c.b16 %v2285_v27, %v2285_v27  ;;  %v1598_v60 = vpack.c.b16 %v8032_v34, %v1582_v51  ;;  %v2478_v30 = vrot.slane %v2476_v40, 4  ;;  %1819 = vmatpush.bf16.msra.mxu1 %v4506_v45  ;;  %v4504_v45 = vld [vmem:[%s7891_s2 + $0x110] sm:$0xff] }
 0x201   : > { %v2481_v56 = vrot.slane %v2479_v57, 5  ;;  %v2250_v46 = vsel %vm1498_vm6, %v2211_v38, %v6059_v44 }
 0x202   : > { %v2364_v58 = vshrl.u32 %v2316_v16, 16  ;;  %v2367_v0 = vshll.u32 %v2316_v16, 16  ;;  %v2298_v3 = vunpack.c.l.b16 %v2250_v46  ;;  %1942 = vrot.lane.b32.xlu0 %v8220_v22, %s4725_s23  ;;  %1670 = vmatmul.bf16.vlgmr.msra.gmra.mxu0 %v1598_v60  ;;  %v2373_v13 = vshll.u32 %v2317_v21, 16 }
 0x203   : > { %v2299_v26 = vunpack.c.h.b16 %v2250_v46  ;;  %v2482_v41 = vor.u32 %v2481_v56, %v2478_v30  ;;  %v2362_v21 = vsel %vm6069_vm9, %v2357_v36, %v2361_v15 }
 0x204   : > { %v2366_v51 = vrot.slane %v2364_v58, 4  ;;  %v2369_v48 = vrot.slane %v2367_v0, 5  ;;  %v2330_v50 = vpack.c.b16 %v2298_v3, %v2298_v3  ;;  %v1887_v47 = vpop.permute.xlu0 %1886  ;;  %v2375_v38 = vrot.slane %v2373_v13, 5  ;;  %v8230_v13 = vld [vmem:[#allocation23_spill] sm:$0xff]  ;;  %1820 = vmatpush.bf16.msra.mxu1 %v4505_v7 }
 0x205   : > { %v2331_v27 = vpack.c.b16 %v2299_v26, %v2299_v26  ;;  %1958 = vrot.lane.b32.xlu2 %v5085_v18, %s4725_s23  ;;  %1944 = vrot.lane.b32.xlu1 %v8227_v4, %s4725_s23  ;;  %v2483_v60 = vrot.slane %v2482_v41, 4  ;;  %v2487_v0 = vrot.slane %v2485_v33, 5  ;;  %v2590_v36 = vunpack.c.l.b16 %v2362_v21 }
 0x206   : > { %v2370_v40 = vor.u32 %v2369_v48, %v2366_v51  ;;  %v2462_v57 = vshrl.u32 %v2330_v50, 16  ;;  %v2465_v1 = vshll.u32 %v2330_v50, 16 }
 0x207   : > { %v6080_v16 = vpop.permute.xlu2 %2000  ;;  %v2471_v56 = vshll.u32 %v2331_v27, 16  ;;  %v1889_v46 = vpop.permute.xlu1 %1888  ;;  %v2488_v15 = vsel %vm6069_vm9, %v2483_v60, %v2487_v0  ;;  %v4503_v60 = vld [vmem:[%s7891_s2 + $0x108] sm:$0xff]  ;;  %v8235_v0 = vld [vmem:[#allocation44_spill] sm:$0xff] }
 0x208   : > { %v2464_v54 = vrot.slane %v2462_v57, 4  ;;  %v2467_v30 = vrot.slane %v2465_v1, 5  ;;  %v2371_v58 = vrot.slane %v2370_v40, 4  ;;  %v6107_v1 = vunpack.c.l.b16 %v2488_v15  ;;  %1821 = vmatpush.bf16.msra.mxu1 %v4504_v45  ;;  %v8238_v45 = vld [vmem:[#allocation98_spill] sm:$0xff] }
 0x209   : > { %v2473_v51 = vrot.slane %v2471_v56, 5  ;;  %v4502_v56 = vld [vmem:[%s7891_s2 + $0x100] sm:$0xff] }
 0x20a   : > { %v2468_v3 = vor.u32 %v2467_v30, %v2464_v54  ;;  %1960 = vrot.lane.b32.xlu0 %v8230_v13, %s4725_s23  ;;  %v2376_v26 = vsel %vm6069_vm9, %v2371_v58, %v2375_v38  ;;  %v8233_v30 = vld [vmem:[#allocation20_spill] sm:$0xff]  ;;  %v8234_v58 = vld [vmem:[#allocation58_spill] sm:$0xff] }
 0x20b   : > { %v6091_v41 = vunpack.c.l.b16 %v2376_v26 }
 0x20c   : > { %v1905_v48 = vpop.permute.xlu0 %1904  ;;  %v2469_v50 = vrot.slane %v2468_v3, 4  ;;  %1822 = vmatpush.bf16.msra.mxu1 %v4503_v60  ;;  %v2036_v3 = vsel %vm1180_vm0, %v4927_v39, %v8235_v0  ;;  %v8239_v60 = vld [vmem:[#allocation38_spill] sm:$0xff] }
 0x20d   : > { %8231 = vst [vmem:[#allocation10_spill] sm:$0xff] %v6091_v41  ;;  %1992 = vrot.lane.b32.xlu2 %v8225_v62, %s4727_s25  ;;  %v2606_v27 = vpack.c.b16 %v6091_v41, %v2590_v36  ;;  %1990 = vrot.lane.b32.xlu1 %v8227_v4, %s4727_s25  ;;  %v8236_v36 = vld [vmem:[#allocation34_spill] sm:$0xff]  ;;  %v2029_v39 = vsel %vm1180_vm0, %v8198_v59, %v8239_v60  ;;  %v8242_v59 = vld [vmem:[#allocation69_spill] sm:$0xff] }
 0x20e   : > { %v2474_v33 = vsel %vm6069_vm9, %v2469_v50, %v2473_v51  ;;  %v2028_v51 = vsel %vm1180_vm0, %v4836_v25, %v8236_v36  ;;  %v2071_v50 = vsel %vm1253_vm1, %v2036_v3, %v5959_v24  ;;  %v8241_v24 = vld [vmem:[#allocation62_spill] sm:$0xff]  ;;  %v8269_v41 = vld [vmem:[#allocation93_spill] sm:$0xff] }
 0x20f   : > { %v6105_v40 = vpop.permute.xlu2 %1152  ;;  %2678 = vmatmul.bf16.vlgmr.msra.gmra.mxu2 %v2606_v27  ;;  %v2598_v57 = vunpack.c.l.b16 %v2474_v33  ;;  %v1935_v38 = vpop.permute.xlu1 %1934  ;;  %v2055_v15 = vsel %vm1253_vm1, %v2028_v51, %v1887_v47  ;;  %v8237_v27 = vld [vmem:[#allocation54_spill] sm:$0xff]  ;;  %v2108_v33 = vsel %vm1302_vm2, %v2071_v50, %v8238_v45  ;;  %v2057_v51 = vsel %vm1253_vm1, %v2029_v39, %v1889_v46  ;;  %v8244_v39 = vld [vmem:[#allocation91_spill] sm:$0xff] }
 0x210   : > { %1823 = vmatpush.bf16.msra.mxu1 %v4502_v56  ;;  %v4620_v47 = vld [vmem:[%s4833_s12 + $0x8] sm:$0xf] }
 0x211   : > { %v6110_v21 = vpack.c.b16 %v6107_v1, %v2598_v57  ;;  %v1210_v3 = vsel %vm1180_vm0, %v4620_v47, %v5267_v10  ;;  %v2037_v10 = vsel %vm1180_vm0, %v8199_v31, %v8243_v52 }
 0x212   : > { %2006 = vrot.lane.b32.xlu0 %v8230_v13, %s4727_s25  ;;  %v1273_v34 = vsel %vm1253_vm1, %v1210_v3, %v8242_v59  ;;  %v2073_v47 = vsel %vm1253_vm1, %v2037_v10, %v1905_v48  ;;  %v8245_v59 = vld [vmem:[#allocation59_spill] sm:$0xff]  ;;  %v8247_v10 = vld [vmem:[#allocation88_spill] sm:$0xff] }
 0x213   : > { %8232 = vst [vmem:[#allocation15_spill] sm:$0xff] %v6110_v21  ;;  %2977 = vmatmul.bf16.vlgmr.msra.gmra.mxu3 %v6110_v21  ;;  %v1322_v46 = vsel %vm1302_vm2, %v1273_v34, %v5531_v14 }
 0x214   : > { %v1951_v54 = vpop.permute.xlu0 %1950  ;;  %v1371_v14 = vsel %vm1351_vm3, %v1322_v46, %v5688_v29 }
 0x215   : > { %1144 = vrot.lane.b32.xlu2 %v8233_v30, %s4728_s26  ;;  %2008 = vrot.lane.b32.xlu1 %v8234_v58, %s4727_s25  ;;  %v8240_v30 = vld [vmem:[#allocation76_spill] sm:$0xff]  ;;  %v2143_v56 = vsel %vm1351_vm3, %v2108_v33, %v1951_v54 }
 0x216   : > { %v2100_v25 = vsel %vm1302_vm2, %v2055_v15, %v8240_v30  ;;  %v4621_v54 = vld [vmem:[%s4833_s12] sm:$0xf] }
 0x217   : > { %v1093_v7 = vpop.permute.xlu2 %1092  ;;  %v1953_v26 = vpop.permute.xlu1 %1952  ;;  %v2127_v50 = vsel %vm1351_vm3, %v2100_v25, %v1935_v38  ;;  %v1207_v33 = vsel %vm1180_vm0, %v4621_v54, %v5204_v61  ;;  %v2101_v25 = vsel %vm1302_vm2, %v2057_v51, %v8244_v39  ;;  %v1420_v51 = vsel %vm1400_vm4, %v1371_v14, %v5784_v19  ;;  %v8248_v19 = vld [vmem:[#allocation31_spill] sm:$0xff] }
 0x218   : > { %v2172_v3 = vsel %vm1400_vm4, %v2127_v50, %v5718_v12  ;;  %v1271_v31 = vsel %vm1253_vm1, %v1207_v33, %v8245_v59  ;;  %v2109_v33 = vsel %vm1302_vm2, %v2073_v47, %v8247_v10  ;;  %v2129_v29 = vsel %vm1351_vm3, %v2101_v25, %v6016_v23  ;;  %v8249_v23 = vld [vmem:[#allocation28_spill] sm:$0xff] }
 0x219   : > { %v1320_v48 = vsel %vm1302_vm2, %v1271_v31, %v5460_v63  ;;  %v2199_v46 = vsel %vm1449_vm5, %v2172_v3, %v6056_v53  ;;  %v2145_v63 = vsel %vm1351_vm3, %v2109_v33, %v1953_v26  ;;  %v2173_v3 = vsel %vm1400_vm4, %v2129_v29, %v5760_v20 }
 0x21a   : > { %1146 = vrot.lane.b32.xlu0 %v8237_v27, %s4728_s26 }
 0x21c   : > { %v1985_v57 = vpop.permute.xlu0 %1984 }
 0x21d   : > { %1162 = vrot.lane.b32.xlu2 %v8241_v24, %s4728_s26  ;;  %1160 = vrot.lane.b32.xlu1 %v5104_v28, %s4728_s26  ;;  %v2180_v28 = vsel %vm1400_vm4, %v2143_v56, %v5792_v49  ;;  %v8246_v56 = vld [vmem:[#allocation25_spill] sm:$0xff] }
 0x21f   : > { %v6155_v15 = vpop.permute.xlu2 %1906  ;;  %v1999_v38 = vpop.permute.xlu1 %1998 }
 0x220   : > { %v2215_v61 = vsel %vm1449_vm5, %v2180_v28, %v1999_v38  ;;  %v1469_v38 = vsel %vm1449_vm5, %v1420_v51, %v1093_v7  ;;  %v1369_v7 = vsel %vm1351_vm3, %v1320_v48, %v5631_v37  ;;  %v2201_v37 = vsel %vm1449_vm5, %v2173_v3, %v1985_v57 }
 0x221   : > { %v2252_v34 = vsel %vm1498_vm6, %v2215_v61, %v6105_v40 }
 0x222   : > { %1082 = vrot.lane.b32.xlu0 %v8246_v56, %s4727_s25  ;;  %v2302_v50 = vunpack.c.l.b16 %v2252_v34  ;;  %v2303_v54 = vunpack.c.h.b16 %v2252_v34  ;;  %v6209_v34 = vsel %vm1498_vm6, %v1469_v38, %v5927_v2  ;;  %v2181_v56 = vsel %vm1400_vm4, %v2145_v63, %v5754_v5  ;;  %v8250_v63 = vld [vmem:[#allocation32_spill] sm:$0xff] }
 0x224   : > { %v6192_v28 = vpop.permute.xlu0 %1136  ;;  %v2334_v61 = vpack.c.b16 %v2302_v50, %v2302_v50  ;;  %v2335_v59 = vpack.c.b16 %v2303_v54, %v2303_v54 }
 0x225   : > { %1098 = vrot.lane.b32.xlu2 %v8248_v19, %s4727_s25  ;;  %v2244_v47 = vsel %vm1498_vm6, %v2199_v46, %v6192_v28  ;;  %1084 = vrot.lane.b32.xlu1 %v8249_v23, %s4727_s25 }
 0x226   : > { %v2286_v25 = vunpack.c.l.b16 %v2244_v47  ;;  %v2287_v53 = vunpack.c.h.b16 %v2244_v47  ;;  %v2490_v26 = vshrl.u32 %v2334_v61, 16  ;;  %v2493_v31 = vshll.u32 %v2334_v61, 16 }
 0x227   : > { %v6205_v14 = vpop.permute.xlu2 %1940  ;;  %v6214_v50 = vpop.permute.xlu1 %1138  ;;  %v2499_v29 = vshll.u32 %v2335_v59, 16  ;;  %v1418_v61 = vsel %vm1400_vm4, %v1369_v7, %v5742_v43 }
 0x228   : > { %v2318_v48 = vpack.c.b16 %v2286_v25, %v2286_v25  ;;  %v2319_v51 = vpack.c.b16 %v2287_v53, %v2287_v53  ;;  %v2492_v54 = vrot.slane %v2490_v26, 4  ;;  %v2495_v33 = vrot.slane %v2493_v31, 5 }
 0x229   : > { %v2245_v46 = vsel %vm1498_vm6, %v2201_v37, %v6214_v50  ;;  %v2217_v26 = vsel %vm1449_vm5, %v2181_v56, %v6080_v16  ;;  %v2501_v43 = vrot.slane %v2499_v29, 5 }
 0x22a   : > { %v2378_v2 = vshrl.u32 %v2318_v48, 16  ;;  %v2381_v38 = vshll.u32 %v2318_v48, 16  ;;  %v2288_v19 = vunpack.c.l.b16 %v2245_v46  ;;  %1100 = vrot.lane.b32.xlu0 %v8250_v63, %s4727_s25  ;;  %v2387_v57 = vshll.u32 %v2319_v51, 16 }
 0x22b   : > { %v2289_v47 = vunpack.c.h.b16 %v2245_v46  ;;  %v2496_v25 = vor.u32 %v2495_v33, %v2492_v54 }
 0x22c   : > { %v2380_v53 = vrot.slane %v2378_v2, 4  ;;  %v2383_v3 = vrot.slane %v2381_v38, 5  ;;  %v2320_v59 = vpack.c.b16 %v2288_v19, %v2288_v19  ;;  %v6225_v31 = vpop.permute.xlu0 %1154  ;;  %v2389_v2 = vrot.slane %v2387_v57, 5 }
 0x22d   : > { %v2321_v7 = vpack.c.b16 %v2289_v47, %v2289_v47  ;;  %1916 = vrot.lane.b32.xlu2 %v8193_v6, %s4723_s14  ;;  %v2253_v37 = vsel %vm1498_vm6, %v2217_v26, %v6225_v31  ;;  %v2497_v48 = vrot.slane %v2496_v25, 4  ;;  %1914 = vrot.lane.b32.xlu1 %v8189_v42, %s4723_s14 }
 0x22e   : > { %v2384_v51 = vor.u32 %v2383_v3, %v2380_v53  ;;  %v2392_v46 = vshrl.u32 %v2320_v59, 16  ;;  %v2395_v54 = vshll.u32 %v2320_v59, 16  ;;  %v2304_v33 = vunpack.c.l.b16 %v2253_v37 }
 0x22f   : > { %v2401_v16 = vshll.u32 %v2321_v7, 16  ;;  %v2305_v56 = vunpack.c.h.b16 %v2253_v37  ;;  %v6233_v38 = vpop.permute.xlu2 %1986  ;;  %v2502_v29 = vsel %vm6069_vm9, %v2497_v48, %v2501_v43  ;;  %v1091_v26 = vpop.permute.xlu1 %1090  ;;  %v8251_v7 = vld [vmem:[#allocation104_spill] sm:$0xff] }
 0x230   : > { %v2394_v19 = vrot.slane %v2392_v46, 4  ;;  %v2397_v63 = vrot.slane %v2395_v54, 5  ;;  %v2336_v47 = vpack.c.b16 %v2304_v33, %v2304_v33  ;;  %v2385_v25 = vrot.slane %v2384_v51, 4 }
 0x231   : > { %v2403_v53 = vrot.slane %v2401_v16, 5  ;;  %v2337_v3 = vpack.c.b16 %v2305_v56, %v2305_v56  ;;  %v1467_v59 = vsel %vm1449_vm5, %v1418_v61, %v1091_v26  ;;  %v2600_v23 = vunpack.c.l.b16 %v2502_v29  ;;  %v8254_v29 = vld [vmem:[#allocation103_spill] sm:$0xff] }
 0x232   : > { %v2398_v17 = vor.u32 %v2397_v63, %v2394_v19  ;;  %v2504_v6 = vshrl.u32 %v2336_v47, 16  ;;  %v2507_v57 = vshll.u32 %v2336_v47, 16  ;;  %1962 = vrot.lane.b32.xlu0 %v8251_v7, %s4725_s23  ;;  %v1516_v37 = vsel %vm1498_vm6, %v1467_v59, %v6059_v44 }
 0x233   : > { %v2513_v43 = vshll.u32 %v2337_v3, 16  ;;  %v1590_v48 = vunpack.c.l.b16 %v1516_v37  ;;  %v2390_v46 = vsel %vm6069_vm9, %v2385_v25, %v2389_v2  ;;  %v6245_v51 = vpack.c.b16 %v2600_v23, %v6107_v1 }
 0x234   : > { %v2506_v54 = vrot.slane %v2504_v6, 4  ;;  %v2509_v61 = vrot.slane %v2507_v57, 5  ;;  %v1891_v33 = vpop.permute.xlu0 %1890  ;;  %v2399_v16 = vrot.slane %v2398_v17, 4  ;;  %v6247_v56 = vunpack.c.l.b16 %v2390_v46 }
 0x235   : > { %8252 = vst [vmem:[#allocation20_spill] sm:$0xff] %v6245_v51  ;;  %2010 = vrot.lane.b32.xlu2 %v8254_v29, %s4727_s25  ;;  %v8255_v19 = vunpack.c.l.b16 %v6209_v34  ;;  %1964 = vrot.lane.b32.xlu1 %v8254_v29, %s4725_s23  ;;  %v2515_v47 = vrot.slane %v2513_v43, 5  ;;  %v8263_v29 = vld [vmem:[#allocation26_spill] sm:$0xff]  ;;  %v4622_v51 = vld [vmem:[%s4833_s12 + $0x18] sm:$0xf] }
 0x236   : > { %8253 = vst [vmem:[#allocation58_spill] sm:$0xff] %v6247_v56  ;;  %v2510_v63 = vor.u32 %v2509_v61, %v2506_v54  ;;  %v2404_v1 = vsel %vm6069_vm9, %v2399_v16, %v2403_v53  ;;  %v8260_v54 = vld [vmem:[#allocation36_spill] sm:$0xff]  ;;  %v8262_v61 = vld [vmem:[#allocation46_spill] sm:$0xff] }
 0x237   : > { %v6253_v44 = vpack.c.b16 %v8255_v19, %v1590_v48  ;;  %v6262_v17 = vpop.permute.xlu2 %2004  ;;  %v6264_v2 = vunpack.c.l.b16 %v2404_v1  ;;  %v1893_v26 = vpop.permute.xlu1 %1892  ;;  %v8259_v48 = vld [vmem:[#allocation27_spill] sm:$0xff]  ;;  %v8264_v19 = vld [vmem:[#allocation6_spill] sm:$0xff] }
 0x238   : > { %v2511_v25 = vrot.slane %v2510_v63, 4  ;;  %v2030_v63 = vsel %vm1180_vm0, %v8264_v19, %v8263_v29  ;;  %v1216_v19 = vsel %vm1180_vm0, %v4622_v51, %v8243_v52  ;;  %v8271_v51 = vld [vmem:[#allocation21_spill] sm:$0xff] }
 0x239   : > { %8256 = vst [vmem:[#allocation44_spill] sm:$0xff] %v6253_v44  ;;  %1824 = vmatmul.bf16.vlgmr.msra.gmra.mxu1 %v6253_v44  ;;  %v2607_v3 = vpack.c.b16 %v6264_v2, %v6247_v56  ;;  %v4624_v56 = vld [vmem:[%s4801_s9 + $0x18] sm:$0xf] }
 0x23a   : > { %8257 = vst [vmem:[#allocation34_spill] sm:$0xff] %v6264_v2  ;;  %2012 = vrot.lane.b32.xlu0 %v5578_v9, %s4727_s25  ;;  %v2516_v53 = vsel %vm6069_vm9, %v2511_v25, %v2515_v47  ;;  %v2059_v47 = vsel %vm1253_vm1, %v2030_v63, %v1891_v33  ;;  %v8265_v25 = vld [vmem:[#allocation35_spill] sm:$0xff] }
 0x23b   : > { %2683 = vmatmul.bf16.gmra.mxu2 %v2607_v3  ;;  %v6272_v59 = vunpack.c.l.b16 %v2516_v53  ;;  %v8266_v3 = vld [vmem:[#allocation99_spill] sm:$0xff] }
 0x23c   : > { %v1909_v57 = vpop.permute.xlu0 %1908  ;;  %v4623_v63 = vld [vmem:[%s4801_s9 + $0x10] sm:$0xf] }
 0x23d   : > { %1166 = vrot.lane.b32.xlu2 %v5627_v32, %s4728_s26  ;;  %v6277_v7 = vpack.c.b16 %v6272_v59, %v2600_v23  ;;  %1164 = vrot.lane.b32.xlu1 %v5608_v11, %s4728_s26  ;;  %v8261_v32 = vld [vmem:[#allocation29_spill] sm:$0xff]  ;;  %v2038_v11 = vsel %vm1180_vm0, %v8201_v35, %v8262_v61  ;;  %v8267_v35 = vld [vmem:[#allocation30_spill] sm:$0xff] }
 0x23e   : > { %v2075_v1 = vsel %vm1253_vm1, %v2038_v11, %v6155_v15  ;;  %v2102_v15 = vsel %vm1302_vm2, %v2059_v47, %v8269_v41  ;;  %v8270_v11 = vld [vmem:[#allocation19_spill] sm:$0xff] }
 0x23f   : > { %8258 = vst [vmem:[#allocation98_spill] sm:$0xff] %v6277_v7  ;;  %v6281_v37 = vpop.permute.xlu2 %1156  ;;  %2982 = vmatmul.bf16.gmra.mxu3 %v6277_v7  ;;  %v1939_v43 = vpop.permute.xlu1 %1938  ;;  %v2110_v53 = vsel %vm1302_vm2, %v2075_v1, %v8266_v3  ;;  %v1189_v1 = vsel %vm1180_vm0, %v4623_v63, %v8236_v36  ;;  %v4625_v47 = vld [vmem:[%s4833_s12 + $0x10] sm:$0xf] }
 0x240   : > { %v2131_v52 = vsel %vm1351_vm3, %v2102_v15, %v1939_v43  ;;  %v8274_v36 = vld [vmem:[#allocation51_spill] sm:$0xff] }
 0x241   : > { %v1259_v63 = vsel %vm1253_vm1, %v1189_v1, %v8274_v36  ;;  %v8277_v43 = vld [vmem:[#allocation71_spill] sm:$0xff] }
 0x242   : > { %1086 = vrot.lane.b32.xlu0 %v8259_v48, %s4727_s25  ;;  %v8279_v1 = vld [vmem:[#allocation79_spill] sm:$0xff] }
 0x244   : > { %v1955_v46 = vpop.permute.xlu0 %1954 }
 0x245   : > { %1102 = vrot.lane.b32.xlu2 %v8260_v54, %s4727_s25  ;;  %1088 = vrot.lane.b32.xlu1 %v8261_v32, %s4727_s25  ;;  %v8268_v54 = vld [vmem:[#allocation7_spill] sm:$0xff]  ;;  %v2147_v33 = vsel %vm1351_vm3, %v2110_v53, %v1955_v46  ;;  %v1213_v46 = vsel %vm1180_vm0, %v4625_v47, %v8235_v0  ;;  %v8272_v53 = vld [vmem:[#allocation48_spill] sm:$0xff] }
 0x246   : > { %v2031_v6 = vsel %vm1180_vm0, %v8268_v54, %v8267_v35  ;;  %v1192_v54 = vsel %vm1180_vm0, %v4624_v56, %v8239_v60  ;;  %v1275_v15 = vsel %vm1253_vm1, %v1213_v46, %v8277_v43  ;;  %v1308_v46 = vsel %vm1302_vm2, %v1259_v63, %v8240_v30 }
 0x247   : > { %v1081_v23 = vpop.permute.xlu2 %1080  ;;  %v1957_v16 = vpop.permute.xlu1 %1956  ;;  %v2061_v44 = vsel %vm1253_vm1, %v2031_v6, %v1893_v26  ;;  %v8276_v6 = vld [vmem:[#allocation61_spill] sm:$0xff] }
 0x248   : > { %v6338_v26 = vsel %vm1253_vm1, %v1216_v19, %v8276_v6  ;;  %v2103_v36 = vsel %vm1302_vm2, %v2061_v44, %v8279_v1  ;;  %v8282_v44 = vld [vmem:[#allocation105_spill] sm:$0xff] }
 0x249   : > { %v2133_v43 = vsel %vm1351_vm3, %v2103_v36, %v6205_v14 }
 0x24a   : > { %1104 = vrot.lane.b32.xlu0 %v8265_v25, %s4727_s25  ;;  %v8275_v25 = vld [vmem:[#allocation63_spill] sm:$0xff] }
 0x24b   : > { %v1261_v60 = vsel %vm1253_vm1, %v1192_v54, %v8275_v25  ;;  %v8280_v54 = vld [vmem:[#allocation11_spill] sm:$0xff] }
 0x24c   : > { %v1989_v48 = vpop.permute.xlu0 %1988  ;;  %v1310_v0 = vsel %vm1302_vm2, %v1261_v60, %v8244_v39  ;;  %v2174_v7 = vsel %vm1400_vm4, %v2131_v52, %v8280_v54  ;;  %v1324_v39 = vsel %vm1302_vm2, %v1275_v15, %v8238_v45  ;;  %v8281_v60 = vld [vmem:[#allocation123_spill] sm:$0xff] }
 0x24d   : > { %1920 = vrot.lane.b32.xlu2 %v8270_v11, %s4723_s14  ;;  %1918 = vrot.lane.b32.xlu1 %v8271_v51, %s4723_s14  ;;  %v8273_v11 = vld [vmem:[#allocation14_spill] sm:$0xff]  ;;  %v1359_v6 = vsel %vm1351_vm3, %v1310_v0, %v8281_v60  ;;  %v2203_v15 = vsel %vm1449_vm5, %v2174_v7, %v6233_v38 }
 0x24e   : > { %v2039_v32 = vsel %vm1180_vm0, %v8273_v11, %v8272_v53  ;;  %v8278_v11 = vld [vmem:[#allocation143_spill] sm:$0xff] }
 0x24f   : > { %v6334_v56 = vpop.permute.xlu2 %1894  ;;  %v2003_v47 = vpop.permute.xlu1 %2002  ;;  %v2182_v51 = vsel %vm1400_vm4, %v2147_v33, %v8278_v11  ;;  %v2077_v25 = vsel %vm1253_vm1, %v2039_v32, %v1909_v57  ;;  %v1357_v57 = vsel %vm1351_vm3, %v1308_v46, %v8282_v44  ;;  %v1408_v32 = vsel %vm1400_vm4, %v1359_v6, %v5760_v20  ;;  %v8284_v20 = vld [vmem:[#allocation109_spill] sm:$0xff]  ;;  %v8285_v46 = vld [vmem:[#allocation130_spill] sm:$0xff] }
 0x250   : > { %v2219_v19 = vsel %vm1449_vm5, %v2182_v51, %v2003_v47  ;;  %v8283_v51 = vld [vmem:[#allocation101_spill] sm:$0xff]  ;;  %v1457_v63 = vsel %vm1449_vm5, %v1408_v32, %v1081_v23  ;;  %v1373_v23 = vsel %vm1351_vm3, %v1324_v39, %v8285_v46  ;;  %v1406_v14 = vsel %vm1400_vm4, %v1357_v57, %v5718_v12 }
 0x251   : > { %v2254_v33 = vsel %vm1498_vm6, %v2219_v19, %v6281_v37  ;;  %v2111_v45 = vsel %vm1302_vm2, %v2077_v25, %v8283_v51  ;;  %v6392_v44 = vsel %vm1498_vm6, %v1457_v63, %v6214_v50  ;;  %v8287_v39 = vld [vmem:[#allocation145_spill] sm:$0xff] }
 0x252   : > { %1966 = vrot.lane.b32.xlu0 %v5578_v9, %s4725_s23  ;;  %v2306_v52 = vunpack.c.l.b16 %v2254_v33  ;;  %v2307_v30 = vunpack.c.h.b16 %v2254_v33  ;;  %v2149_v0 = vsel %vm1351_vm3, %v2111_v45, %v1957_v16  ;;  %v8286_v16 = vld [vmem:[#allocation136_spill] sm:$0xff] }
 0x253   : > { %v2175_v36 = vsel %vm1400_vm4, %v2133_v43, %v8286_v16  ;;  %v2183_v32 = vsel %vm1400_vm4, %v2149_v0, %v8287_v39  ;;  %v8288_v0 = vld [vmem:[#allocation108_spill] sm:$0xff] }
 0x254   : > { %v6373_v9 = vpop.permute.xlu0 %1140  ;;  %v2338_v47 = vpack.c.b16 %v2306_v52, %v2306_v52  ;;  %v2339_v19 = vpack.c.b16 %v2307_v30, %v2307_v30  ;;  %v2205_v12 = vsel %vm1449_vm5, %v2175_v36, %v1989_v48 }
 0x255   : > { %2014 = vrot.lane.b32.xlu2 %v8284_v20, %s4727_s25  ;;  %v2246_v25 = vsel %vm1498_vm6, %v2203_v15, %v6373_v9  ;;  %1968 = vrot.lane.b32.xlu1 %v8284_v20, %s4725_s23  ;;  %v1422_v20 = vsel %vm1400_vm4, %v1373_v23, %v5792_v49 }
 0x256   : > { %v2290_v38 = vunpack.c.l.b16 %v2246_v25  ;;  %v2291_v7 = vunpack.c.h.b16 %v2246_v25  ;;  %v2518_v60 = vshrl.u32 %v2338_v47, 16  ;;  %v2521_v6 = vshll.u32 %v2338_v47, 16 }
 0x257   : > { %v6388_v33 = vpop.permute.xlu2 %1912  ;;  %v6397_v30 = vpop.permute.xlu1 %1142  ;;  %v2527_v43 = vshll.u32 %v2339_v19, 16 }
 0x258   : > { %v2322_v57 = vpack.c.b16 %v2290_v38, %v2290_v38  ;;  %v2323_v52 = vpack.c.b16 %v2291_v7, %v2291_v7  ;;  %v2520_v45 = vrot.slane %v2518_v60, 4  ;;  %v2523_v15 = vrot.slane %v2521_v6, 5 }
 0x259   : > { %v2247_v47 = vsel %vm1498_vm6, %v2205_v12, %v6397_v30  ;;  %v2221_v6 = vsel %vm1449_vm5, %v2183_v32, %v6262_v17  ;;  %v2529_v49 = vrot.slane %v2527_v43, 5 }
 0x25a   : > { %v2406_v50 = vshrl.u32 %v2322_v57, 16  ;;  %v2409_v63 = vshll.u32 %v2322_v57, 16  ;;  %v2292_v25 = vunpack.c.l.b16 %v2247_v47  ;;  %2016 = vrot.lane.b32.xlu0 %v8288_v0, %s4727_s25  ;;  %v2415_v48 = vshll.u32 %v2323_v52, 16  ;;  %v8289_v57 = vld [vmem:[#allocation117_spill] sm:$0xff] }
 0x25b   : > { %v2293_v46 = vunpack.c.h.b16 %v2247_v47  ;;  %v2524_v7 = vor.u32 %v2523_v15, %v2520_v45  ;;  %v8290_v15 = vld [vmem:[#allocation118_spill] sm:$0xff] }
 0x25c   : > { %v2408_v36 = vrot.slane %v2406_v50, 4  ;;  %v2411_v60 = vrot.slane %v2409_v63, 5  ;;  %v2324_v19 = vpack.c.b16 %v2292_v25, %v2292_v25  ;;  %v6408_v12 = vpop.permute.xlu0 %1158  ;;  %v2417_v63 = vrot.slane %v2415_v48, 5 }
 0x25d   : > { %v2325_v23 = vpack.c.b16 %v2293_v46, %v2293_v46  ;;  %1170 = vrot.lane.b32.xlu2 %v8289_v57, %s4728_s26  ;;  %v2255_v52 = vsel %vm1498_vm6, %v2221_v6, %v6408_v12  ;;  %v2525_v47 = vrot.slane %v2524_v7, 4  ;;  %1168 = vrot.lane.b32.xlu1 %v8290_v15, %s4728_s26 }
 0x25e   : > { %v2412_v24 = vor.u32 %v2411_v60, %v2408_v36  ;;  %v2420_v38 = vshrl.u32 %v2324_v19, 16  ;;  %v2423_v45 = vshll.u32 %v2324_v19, 16  ;;  %v2308_v50 = vunpack.c.l.b16 %v2255_v52 }
 0x25f   : > { %v2429_v17 = vshll.u32 %v2325_v23, 16  ;;  %v2309_v32 = vunpack.c.h.b16 %v2255_v52  ;;  %v6416_v25 = vpop.permute.xlu2 %1958  ;;  %v2530_v43 = vsel %vm6069_vm9, %v2525_v47, %v2529_v49  ;;  %v1079_v6 = vpop.permute.xlu1 %1078  ;;  %v8291_v23 = vld [vmem:[#allocation81_spill] sm:$0xff] }
 0x260   : > { %v2422_v46 = vrot.slane %v2420_v38, 4  ;;  %v2425_v57 = vrot.slane %v2423_v45, 5  ;;  %v2340_v62 = vpack.c.b16 %v2308_v50, %v2308_v50  ;;  %v2413_v7 = vrot.slane %v2412_v24, 4 }
 0x261   : > { %v2431_v36 = vrot.slane %v2429_v17, 5  ;;  %v2341_v60 = vpack.c.b16 %v2309_v32, %v2309_v32  ;;  %v1455_v19 = vsel %vm1449_vm5, %v1406_v14, %v1079_v6  ;;  %v2602_v21 = vunpack.c.l.b16 %v2530_v43  ;;  %v8295_v32 = vld [vmem:[#allocation22_spill] sm:$0xff]  ;;  %v8298_v6 = vld [vmem:[#allocation120_spill] sm:$0xff] }
 0x262   : > { %v2426_v15 = vor.u32 %v2425_v57, %v2422_v46  ;;  %v2532_v27 = vshrl.u32 %v2340_v62, 16  ;;  %v2535_v48 = vshll.u32 %v2340_v62, 16  ;;  %1106 = vrot.lane.b32.xlu0 %v8291_v23, %s4727_s25  ;;  %v6425_v52 = vsel %vm1498_vm6, %v1455_v19, %v6192_v28  ;;  %v8297_v46 = vld [vmem:[#allocation83_spill] sm:$0xff] }
 0x263   : > { %8292 = vst [vmem:[#allocation38_spill] sm:$0xff] %v6425_v52  ;;  %v2541_v38 = vshll.u32 %v2341_v60, 16  ;;  %v8043_v49 = vunpack.c.l.b16 %v6425_v52  ;;  %v2418_v24 = vsel %vm6069_vm9, %v2413_v7, %v2417_v63  ;;  %v6431_v47 = vpack.c.b16 %v2602_v21, %v6272_v59 }
 0x264   : > { %v2534_v14 = vrot.slane %v2532_v27, 4  ;;  %v2537_v45 = vrot.slane %v2535_v48, 5  ;;  %v1095_v50 = vpop.permute.xlu0 %1094  ;;  %v2427_v62 = vrot.slane %v2426_v15, 4  ;;  %v6433_v17 = vunpack.c.l.b16 %v2418_v24 }
 0x265   : > { %8293 = vst [vmem:[#allocation76_spill] sm:$0xff] %v6431_v47  ;;  %v1326_v28 = vsel %vm1302_vm2, %v6338_v26, %v8247_v10  ;;  %1922 = vrot.lane.b32.xlu2 %v8295_v32, %s4723_s14  ;;  %v1471_v43 = vsel %vm1449_vm5, %v1422_v20, %v1095_v50  ;;  %v8296_v59 = vunpack.c.l.b16 %v6392_v44  ;;  %1108 = vrot.lane.b32.xlu1 %v8297_v46, %s4727_s25  ;;  %v4630_v26 = vld [vmem:[%s4833_s12 + $0x28] sm:$0xf] }
 0x266   : > { %8294 = vst [vmem:[#allocation69_spill] sm:$0xff] %v6433_v17  ;;  %v2538_v27 = vor.u32 %v2537_v45, %v2534_v14  ;;  %v2432_v57 = vsel %vm6069_vm9, %v2427_v62, %v2431_v36  ;;  %v1520_v10 = vsel %vm1498_vm6, %v1471_v43, %v6105_v40  ;;  %v1375_v20 = vsel %vm1351_vm3, %v1326_v28, %v8298_v6  ;;  %v8302_v28 = vld [vmem:[#allocation112_spill] sm:$0xff] }
 0x267   : > { %v1599_v63 = vpack.c.b16 %v8296_v59, %v8043_v49  ;;  %v6455_v7 = vpop.permute.xlu2 %1992  ;;  %v6457_v60 = vunpack.c.l.b16 %v2432_v57  ;;  %v1592_v19 = vunpack.c.l.b16 %v1520_v10  ;;  %v1424_v15 = vsel %vm1400_vm4, %v1375_v20, %v5754_v5  ;;  %v1097_v48 = vpop.permute.xlu1 %1096  ;;  %v8305_v57 = vld [vmem:[#allocation39_spill] sm:$0xff]  ;;  %v8306_v10 = vld [vmem:[#allocation9_spill] sm:$0xff] }
 0x268   : > { %v2543_v36 = vrot.slane %v2541_v38, 5  ;;  %v2539_v23 = vrot.slane %v2538_v27, 4  ;;  %v1473_v40 = vsel %vm1449_vm5, %v1424_v15, %v1097_v48  ;;  %v8300_v14 = vunpack.c.l.b16 %v6209_v34  ;;  %v8303_v27 = vld [vmem:[#allocation119_spill] sm:$0xff]  ;;  %v8307_v15 = vld [vmem:[#allocation122_spill] sm:$0xff] }
 0x269   : > { %1675 = vmatmul.bf16.gmra.mxu0 %v1599_v63  ;;  %8299 = vst [vmem:[#allocation33_spill] sm:$0xff] %v6457_v60  ;;  %v2608_v24 = vpack.c.b16 %v6457_v60, %v6433_v17  ;;  %v6472_v50 = vsel %vm1498_vm6, %v1473_v40, %v6225_v31  ;;  %v2032_v6 = vsel %vm1180_vm0, %v8306_v10, %v8305_v57 }
 0x26a   : > { %v6466_v45 = vpack.c.b16 %v1592_v19, %v8300_v14  ;;  %1924 = vrot.lane.b32.xlu0 %v5085_v18, %s4723_s14  ;;  %v2544_v5 = vsel %vm6069_vm9, %v2539_v23, %v2543_v36  ;;  %v8044_v38 = vunpack.c.l.b16 %v6472_v50  ;;  %v4626_v36 = vld [vmem:[%s4833_s12 + $0x20] sm:$0xf] }
 0x26b   : > { %2688 = vmatmul.bf16.gmra.mxu2 %v2608_v24  ;;  %v6478_v62 = vunpack.c.l.b16 %v2544_v5  ;;  %v1219_v48 = vsel %vm1180_vm0, %v4626_v36, %v8262_v61  ;;  %v4627_v23 = vld [vmem:[%s4801_s9 + $0x20] sm:$0xf]  ;;  %v4628_v24 = vld [vmem:[%s4801_s9 + $0x28] sm:$0xf]  ;;  %v332_v61 = vld [vmem:[%s4801_s9 + $0x90] sm:$0xf] }
 0x26c   : > { %8301 = vst [vmem:[#allocation91_spill] sm:$0xff] %v6466_v45  ;;  %v1897_v34 = vpop.permute.xlu0 %1896  ;;  %v6484_v43 = vpack.c.b16 %v8044_v38, %v1592_v19  ;;  %v2063_v19 = vsel %vm1253_vm1, %v2032_v6, %v6334_v56  ;;  %v1195_v40 = vsel %vm1180_vm0, %v4627_v23, %v8263_v29  ;;  %v1198_v14 = vsel %vm1180_vm0, %v4628_v24, %v8267_v35  ;;  %v8308_v5 = vld [vmem:[#allocation72_spill] sm:$0xff]  ;;  %v8310_v36 = vld [vmem:[#allocation37_spill] sm:$0xff]  ;;  %v8312_v24 = vld [vmem:[#allocation42_spill] sm:$0xff] }
 0x26d   : > { %1972 = vrot.lane.b32.xlu2 %v8302_v28, %s4725_s23  ;;  %v6487_v31 = vpack.c.b16 %v6478_v62, %v2602_v21  ;;  %1970 = vrot.lane.b32.xlu1 %v8288_v0, %s4725_s23  ;;  %v8304_v0 = vld [vmem:[#allocation115_spill] sm:$0xff]  ;;  %v1279_v56 = vsel %vm1253_vm1, %v1219_v48, %v8308_v5  ;;  %v6531_v6 = vld [vmem:[#allocation2] ss:$0 sm:$0xff]  ;;  %v2040_v29 = vsel %vm1180_vm0, %v8220_v22, %v8310_v36  ;;  %v8311_v23 = vld [vmem:[#allocation85_spill] sm:$0xff] }
 0x26e   : > { %1829 = vmatmul.bf16.gmra.mxu1 %v6484_v43  ;;  %v1328_v35 = vsel %vm1302_vm2, %v1279_v56, %v8266_v3  ;;  %v2033_v5 = vsel %vm1180_vm0, %v8224_v8, %v8312_v24  ;;  %v8313_v38 = vld [vmem:[#allocation50_spill] sm:$0xff]  ;;  %v8316_v8 = vld [vmem:[#allocation55_spill] sm:$0xff] }
 0x26f   : > { %v6492_v59 = vpop.permute.xlu2 %1144  ;;  %2987 = vmatmul.bf16.gmra.mxu3 %v6487_v31  ;;  %v6495_v63 = vpop.permute.xlu1 %1910  ;;  %v2041_v22 = vsel %vm1180_vm0, %v8227_v4, %v8313_v38  ;;  %v1265_v56 = vsel %vm1253_vm1, %v1198_v14, %v8316_v8  ;;  %v2065_v8 = vsel %vm1253_vm1, %v2033_v5, %v1897_v34  ;;  %v8322_v5 = vld [vmem:[#allocation96_spill] sm:$0xff] }
 0x272   : > { %2018 = vrot.lane.b32.xlu0 %v8302_v28, %s4727_s25  ;;  %v8309_v28 = vld [vmem:[#allocation94_spill] sm:$0xff] }
 0x274   : > { %v1943_v21 = vpop.permute.xlu0 %1942 }
 0x275   : > { %1172 = vrot.lane.b32.xlu2 %v8303_v27, %s4728_s26  ;;  %2020 = vrot.lane.b32.xlu1 %v8304_v0, %s4727_s25  ;;  %v2104_v27 = vsel %vm1302_vm2, %v2063_v19, %v8309_v28  ;;  %v333_v19 = vld [vmem:[%s4801_s9 + $0x94] sm:$0x1] }
 0x276   : > { %v2135_v48 = vsel %vm1351_vm3, %v2104_v27, %v1943_v21  ;;  %v8315_v21 = vld [vmem:[#allocation86_spill] sm:$0xff]  ;;  %v8317_v27 = vld [vmem:[#allocation64_spill] sm:$0xff]  ;;  %v1123_v14 = vunpack.c.l.b16 %v333_v19 }
 0x277   : > { %v6504_v46 = vpop.permute.xlu2 %1162  ;;  %v6509_v20 = vpop.permute.xlu1 %1944 }
 0x27a   : > { %1174 = vrot.lane.b32.xlu0 %v8307_v15, %s4728_s26  ;;  %v4629_v15 = vld [vmem:[%s4833_s12 + $0x30] sm:$0xf] }
 0x27b   : > { %v1225_v49 = vsel %vm1180_vm0, %v4629_v15, %v8310_v36  ;;  %v1222_v15 = vsel %vm1180_vm0, %v4630_v26, %v8272_v53  ;;  %v8314_v36 = vld [vmem:[#allocation131_spill] sm:$0xff] }
 0x27c   : > { %v1961_v10 = vpop.permute.xlu0 %1960  ;;  %v1377_v3 = vsel %vm1351_vm3, %v1328_v35, %v8314_v36  ;;  %v1283_v53 = vsel %vm1253_vm1, %v1225_v49, %v8317_v27  ;;  %v2081_v49 = vsel %vm1253_vm1, %v2041_v22, %v6388_v33  ;;  %v8323_v22 = vld [vmem:[#allocation102_spill] sm:$0xff] }
 0x27d   : > { %1112 = vrot.lane.b32.xlu2 %v8311_v23, %s4727_s25  ;;  %1110 = vrot.lane.b32.xlu1 %v8315_v21, %s4727_s25  ;;  %v1426_v4 = vsel %vm1400_vm4, %v1377_v3, %v8278_v11  ;;  %v6570_v23 = vunpack.c.l.b16 %v332_v61  ;;  %v8318_v21 = vld [vmem:[#allocation12_spill] sm:$0xff]  ;;  %v8319_v3 = vld [vmem:[#allocation65_spill] sm:$0xff] }
 0x27e   : > { %v2176_v47 = vsel %vm1400_vm4, %v2135_v48, %v8318_v21  ;;  %v1263_v27 = vsel %vm1253_vm1, %v1195_v40, %v8319_v3  ;;  %v8320_v48 = vld [vmem:[#allocation74_spill] sm:$0xff]  ;;  %v8327_v3 = vld [vmem:[#allocation124_spill] sm:$0xff] }
 0x27f   : > { %v1099_v26 = vpop.permute.xlu2 %1098  ;;  %v1671_v35 = vpop.f32.mrf.mxu0 }
 0x280   : > { %v1991_v36 = vpop.permute.xlu1 %1990  ;;  %v1475_v45 = vsel %vm1449_vm5, %v1426_v4, %v1099_v26  ;;  %v1672_v52 = vadd.f32 %v6531_v6, %v1671_v35  ;;  %v1281_v4 = vsel %vm1253_vm1, %v1222_v15, %v8320_v48  ;;  %v2105_v15 = vsel %vm1302_vm2, %v2065_v8, %v8322_v5 }
 0x281   : > { %v2207_v11 = vsel %vm1449_vm5, %v2176_v47, %v1991_v36  ;;  %v6582_v61 = vsel %vm1498_vm6, %v1475_v45, %v6281_v37  ;;  %v1314_v37 = vsel %vm1302_vm2, %v1265_v56, %v8279_v1  ;;  %v8321_v47 = vld [vmem:[#allocation92_spill] sm:$0xff]  ;;  %v2113_v26 = vsel %vm1302_vm2, %v2081_v49, %v8323_v22 }
 0x282   : > { %v2248_v19 = vsel %vm1498_vm6, %v2207_v11, %v6492_v59  ;;  %1711 = vst.msk [vmem:[%s6562_s11] sm:$0xff] %vm1180_vm0, %v1672_v52  ;;  %1926 = vrot.lane.b32.xlu0 %v8230_v13, %s4723_s14  ;;  %v8048_v33 = vunpack.c.l.b16 %v6582_v61  ;;  %v1332_v45 = vsel %vm1302_vm2, %v1283_v53, %v8321_v47  ;;  %v6604_v35 = vpack.c.b16 %v1123_v14, %v6570_v23 }
 0x283   : > { %v2294_v34 = vunpack.c.l.b16 %v2248_v19  ;;  %v2295_v40 = vunpack.c.h.b16 %v2248_v19  ;;  %v8324_v36 = vunpack.c.l.b16 %v6472_v50  ;;  %v2079_v56 = vsel %vm1253_vm1, %v2040_v29, %v6495_v63 }
 0x284   : > { %v2007_v52 = vpop.permute.xlu0 %2006  ;;  %v2153_v53 = vsel %vm1351_vm3, %v2113_v26, %v1961_v10  ;;  %v1312_v14 = vsel %vm1302_vm2, %v1263_v27, %v8269_v41  ;;  %v1330_v50 = vsel %vm1302_vm2, %v1281_v4, %v8283_v51  ;;  %v2137_v49 = vsel %vm1351_vm3, %v2105_v15, %v6509_v20  ;;  %v8326_v10 = vld [vmem:[#allocation110_spill] sm:$0xff]  ;;  %v8329_v15 = vld [vmem:[#allocation141_spill] sm:$0xff] }
 0x285   : > { %v6610_v1 = vpack.c.b16 %v8048_v33, %v8324_v36  ;;  %v2326_v11 = vpack.c.b16 %v2294_v34, %v2294_v34  ;;  %v2327_v8 = vpack.c.b16 %v2295_v40, %v2295_v40  ;;  %1974 = vrot.lane.b32.xlu2 %v8304_v0, %s4725_s23  ;;  %1928 = vrot.lane.b32.xlu1 %v8234_v58, %s4723_s14  ;;  %v1128_v63 = vshll.u32 %v6604_v35, 16  ;;  %v8328_v34 = vld [vmem:[#allocation146_spill] sm:$0xff] }
 0x286   : > { %v1363_v29 = vsel %vm1351_vm3, %v1314_v37, %v8326_v10  ;;  %v6630_v0 = vsel %vm1351_vm3, %v1332_v45, %v8327_v3  ;;  %v2112_v20 = vsel %vm1302_vm2, %v2079_v56, %v8321_v47  ;;  %v2185_v40 = vsel %vm1400_vm4, %v2153_v53, %v8328_v34  ;;  %v8330_v10 = vld [vmem:[#allocation125_spill] sm:$0xff]  ;;  %v8331_v56 = vld [vmem:[#allocation114_spill] sm:$0xff] }
 0x287   : > { %8325 = vst [vmem:[#allocation59_spill] sm:$0xff] %v6610_v1  ;;  %v2434_v41 = vshrl.u32 %v2326_v11, 16  ;;  %v2437_v27 = vshll.u32 %v2326_v11, 16  ;;  %v6632_v48 = vpop.permute.xlu2 %1916  ;;  %v1673_v51 = vpop.f32.mrf.mxu0  ;;  %v2443_v4 = vshll.u32 %v2327_v8, 16  ;;  %v2177_v45 = vsel %vm1400_vm4, %v2137_v49, %v8329_v15 }
 0x288   : > { %v2009_v19 = vpop.permute.xlu1 %2008  ;;  %v1674_v37 = vadd.f32 %v6531_v6, %v1673_v51  ;;  %v1361_v3 = vsel %vm1351_vm3, %v1312_v14, %v8330_v10  ;;  %v1126_v53 = vshrl.u32 %v6604_v35, 16  ;;  %v1130_v8 = vrot.slane %v1128_v63, 1  ;;  %v8332_v51 = vld [vmem:[#allocation133_spill] sm:$0xff] }
 0x289   : > { %v2436_v26 = vrot.slane %v2434_v41, 4  ;;  %v2439_v36 = vrot.slane %v2437_v27, 5  ;;  %v2225_v11 = vsel %vm1449_vm5, %v2185_v40, %v2009_v19  ;;  %v6653_v49 = vsel %vm1351_vm3, %v1330_v50, %v8332_v51 }
 0x28a   : > { %v2257_v47 = vsel %vm1498_vm6, %v2225_v11, %v6504_v46  ;;  %1712 = vst.msk [vmem:[%s6562_s11 + $0x8] sm:$0xff] %vm1180_vm0, %v1674_v37  ;;  %1976 = vrot.lane.b32.xlu0 %v8331_v56, %s4725_s23  ;;  %v2151_v41 = vsel %vm1351_vm3, %v2112_v20, %v6416_v25  ;;  %v6659_v19 = vsel %vm1400_vm4, %v1363_v29, %v8286_v16  ;;  %v2445_v37 = vrot.slane %v2443_v4, 5  ;;  %v8333_v16 = vld [vmem:[#allocation8_spill] sm:$0xff] }
 0x28b   : > { %v2312_v27 = vunpack.c.l.b16 %v2257_v47  ;;  %v2440_v14 = vor.u32 %v2439_v36, %v2436_v26  ;;  %v1410_v40 = vsel %vm1400_vm4, %v1361_v3, %v8280_v54  ;;  %v2209_v63 = vsel %vm1449_vm5, %v2177_v45, %v6455_v7 }
 0x28c   : > { %v6665_v11 = vpop.permute.xlu0 %1146  ;;  %v2313_v50 = vunpack.c.h.b16 %v2257_v47  ;;  %v2184_v29 = vsel %vm1400_vm4, %v2151_v41, %v8333_v16  ;;  %v6675_v7 = vor.u32 %v1130_v8, %v1126_v53  ;;  %v6681_v3 = vpack.c.b16 %v6570_v23, %v6570_v23  ;;  %v314_v23 = vld [vmem:[%s4801_s9 + $0x48] sm:$0xf] }
 0x28d   : > { %v2344_v10 = vpack.c.b16 %v2312_v27, %v2312_v27  ;;  %2024 = vrot.lane.b32.xlu2 %v6604_v35, %s4727_s25  ;;  %v2249_v25 = vsel %vm1498_vm6, %v2209_v63, %v6665_v11  ;;  %v2441_v20 = vrot.slane %v2440_v14, 4  ;;  %2022 = vrot.lane.b32.xlu1 %v8331_v56, %s4727_s25  ;;  %v2223_v51 = vsel %vm1449_vm5, %v2184_v29, %v2007_v52  ;;  %v8334_v52 = vld [vmem:[#allocation121_spill] sm:$0xff]  ;;  %v6696_v29 = vld [vmem:[%s4801_s9 + $0x4c] sm:$0x1] }
 0x28e   : > { %v2296_v54 = vunpack.c.l.b16 %v2249_v25  ;;  %v2297_v4 = vunpack.c.h.b16 %v2249_v25  ;;  %v2345_v8 = vpack.c.b16 %v2313_v50, %v2313_v50 }
 0x28f   : > { %v2560_v45 = vshrl.u32 %v2344_v10, 16  ;;  %v2563_v26 = vshll.u32 %v2344_v10, 16  ;;  %v6677_v36 = vpop.permute.xlu2 %2010  ;;  %v2446_v47 = vsel %vm6069_vm9, %v2441_v20, %v2445_v37 }
 0x290   : > { %v2328_v56 = vpack.c.b16 %v2296_v54, %v2296_v54  ;;  %v2329_v41 = vpack.c.b16 %v2297_v4, %v2297_v4  ;;  %v6686_v27 = vpop.permute.xlu1 %1160  ;;  %v6688_v53 = vunpack.c.l.b16 %v2446_v47  ;;  %v2569_v2 = vshll.u32 %v2345_v8, 16 }
 0x291   : > { %v2562_v14 = vrot.slane %v2560_v45, 4  ;;  %v2565_v63 = vrot.slane %v2563_v26, 5  ;;  %v2256_v10 = vsel %vm1498_vm6, %v2223_v51, %v6686_v27 }
 0x292   : > { %v2448_v25 = vshrl.u32 %v2328_v56, 16  ;;  %v2451_v33 = vshll.u32 %v2328_v56, 16  ;;  %v2457_v1 = vshll.u32 %v2329_v41, 16  ;;  %v2310_v37 = vunpack.c.l.b16 %v2256_v10  ;;  %1176 = vrot.lane.b32.xlu0 %v8334_v52, %s4728_s26  ;;  %v2679_v20 = vpop.f32.mrf.mxu2 }
 0x293   : > { %v2311_v54 = vunpack.c.h.b16 %v2256_v10  ;;  %v2680_v50 = vadd.f32 %v6531_v6, %v2679_v20  ;;  %v2566_v4 = vor.u32 %v2565_v63, %v2562_v14  ;;  %v6701_v41 = vunpack.c.l.b16 %v314_v23  ;;  %v8335_v10 = vld [vmem:[#allocation87_spill] sm:$0xff] }
 0x294   : > { %v2450_v26 = vrot.slane %v2448_v25, 4  ;;  %v2453_v47 = vrot.slane %v2451_v33, 5  ;;  %v2342_v51 = vpack.c.b16 %v2310_v37, %v2310_v37  ;;  %v1083_v56 = vpop.permute.xlu0 %1082  ;;  %v3059_v63 = vunpack.c.l.b16 %v6696_v29  ;;  %v4549_v33 = vld [vmem:[%s7891_s2 + $0xf8] sm:$0xff]  ;;  %v354_v29 = vld [vmem:[%s4833_s12 + $0x48] sm:$0xf] }
 0x295   : > { %v2343_v52 = vpack.c.b16 %v2311_v54, %v2311_v54  ;;  %4155 = vst.msk [vmem:[%s6562_s11 + $0x80] sm:$0xff] %vm1180_vm0, %v2680_v50  ;;  %1114 = vrot.lane.b32.xlu2 %v8335_v10, %s4727_s25  ;;  %v1459_v14 = vsel %vm1449_vm5, %v1410_v40, %v1083_v56  ;;  %v4557_v23 = vld [vmem:[%s7891_s2 + $0x1f8] sm:$0xff]  ;;  %1178 = vrot.lane.b32.xlu1 %v6675_v7, %s4728_s26  ;;  %v2459_v50 = vrot.slane %v2457_v1, 5  ;;  %v2567_v60 = vrot.slane %v2566_v4, 4 }
 0x296   : > { %v2454_v25 = vor.u32 %v2453_v47, %v2450_v26  ;;  %v2546_v8 = vshrl.u32 %v2342_v51, 16  ;;  %v2549_v37 = vshll.u32 %v2342_v51, 16  ;;  %v2978_v20 = vpop.f32.mrf.mxu3  ;;  %v1508_v40 = vsel %vm1498_vm6, %v1459_v14, %v6373_v9  ;;  %v355_v54 = vld [vmem:[%s4833_s12 + $0x4c] sm:$0x1]  ;;  %3635 = vmatpush.bf16.msrb.mxu2 %v4549_v33  ;;  %3794 = vmatpush.bf16.msrb.mxu3 %v4557_v23 }
 0x297   : > { %v2979_v56 = vadd.f32 %v6531_v6, %v2978_v20  ;;  %v6722_v10 = vpop.permute.xlu2 %1166  ;;  %v1586_v45 = vunpack.c.l.b16 %v1508_v40  ;;  %v2555_v51 = vshll.u32 %v2343_v52, 16  ;;  %v6728_v14 = vunpack.c.l.b16 %v354_v29  ;;  %v8337_v23 = vld [vmem:[#allocation90_spill] sm:$0xff] }
 0x298   : > { %v2548_v26 = vrot.slane %v2546_v8, 4  ;;  %v2551_v47 = vrot.slane %v2549_v37, 5  ;;  %v1085_v17 = vpop.permute.xlu1 %1084  ;;  %v2455_v13 = vrot.slane %v2454_v25, 4  ;;  %v3060_v1 = vunpack.c.l.b16 %v355_v54 }
 0x299   : > { %4219 = vst.msk [vmem:[%s6562_s11 + $0x280] sm:$0xff] %vm1180_vm0, %v2979_v56  ;;  %v1461_v9 = vsel %vm1449_vm5, %v6659_v19, %v1085_v17  ;;  %v8336_v20 = vunpack.c.l.b16 %v6392_v44  ;;  %v2571_v4 = vrot.slane %v2569_v2, 5  ;;  %v4533_v44 = vld [vmem:[%s7891_s2 + $0xb8] sm:$0xff]  ;;  %v1430_v19 = vsel %vm1400_vm4, %v6630_v0, %v8333_v16 }
 0x29a   : > { %v2552_v33 = vor.u32 %v2551_v47, %v2548_v26  ;;  %1116 = vrot.lane.b32.xlu0 %v8337_v23, %s4727_s25  ;;  %v2681_v52 = vpop.f32.mrf.mxu2  ;;  %v6738_v25 = vsel %vm1498_vm6, %v1461_v9, %v6397_v30  ;;  %v2460_v17 = vsel %vm6069_vm9, %v2455_v13, %v2459_v50  ;;  %v4541_v2 = vld [vmem:[%s7891_s2 + $0x1b8] sm:$0xff]  ;;  %v1428_v13 = vsel %vm1400_vm4, %v6653_v49, %v8287_v39  ;;  %v8338_v49 = vld [vmem:[#allocation89_spill] sm:$0xff] }
 0x29b   : > { %v6732_v18 = vpack.c.b16 %v1586_v45, %v8336_v20  ;;  %v2682_v8 = vadd.f32 %v6531_v6, %v2681_v52  ;;  %v8056_v30 = vunpack.c.l.b16 %v6738_v25  ;;  %v6753_v37 = vunpack.c.l.b16 %v2460_v17  ;;  %3259 = vmatpush.bf16.msrb.mxu0 %v4533_v44  ;;  %3400 = vmatpush.bf16.msrb.mxu1 %v4541_v2  ;;  %v4548_v44 = vld [vmem:[%s7891_s2 + $0xf0] sm:$0xff] }
 0x29c   : > { %v2557_v40 = vrot.slane %v2555_v51, 5  ;;  %v1101_v29 = vpop.permute.xlu0 %1100  ;;  %v2553_v54 = vrot.slane %v2552_v33, 4  ;;  %v2572_v50 = vsel %vm6069_vm9, %v2567_v60, %v2571_v4  ;;  %v6776_v47 = vpack.c.b16 %v3060_v1, %v6728_v14  ;;  %v4556_v2 = vld [vmem:[%s7891_s2 + $0x1f0] sm:$0xff]  ;;  %3636 = vmatpush.bf16.msrb.mxu2 %v4548_v44 }
 0x29d   : > { %4156 = vst.msk [vmem:[%s6562_s11 + $0x88] sm:$0xff] %vm1180_vm0, %v2682_v8  ;;  %1120 = vrot.lane.b32.xlu2 %v6681_v3, %s4727_s25  ;;  %v1477_v0 = vsel %vm1449_vm5, %v1428_v13, %v1101_v29  ;;  %v1600_v16 = vpack.c.b16 %v8056_v30, %v1586_v45  ;;  %v2609_v39 = vpack.c.b16 %v6753_v37, %v6688_v53  ;;  %v6780_v4 = vunpack.c.l.b16 %v2572_v50  ;;  %v8341_v8 = vld [vmem:[#allocation45_spill] sm:$0xff] }
 0x29e   : > { %1118 = vrot.lane.b32.xlu1 %v8338_v49, %s4727_s25  ;;  %v2980_v60 = vpop.f32.mrf.mxu3  ;;  %v2558_v56 = vsel %vm6069_vm9, %v2553_v54, %v2557_v40  ;;  %v1526_v26 = vsel %vm1498_vm6, %v1477_v0, %v6408_v12  ;;  %v3062_v51 = vpack.c.b16 %v3059_v63, %v6701_v41  ;;  %v8340_v1 = vunpack.c.l.b16 %v6582_v61  ;;  %v8343_v29 = vld [vmem:[#allocation41_spill] sm:$0xff]  ;;  %3795 = vmatpush.bf16.msrb.mxu3 %v4556_v2  ;;  %v8345_v0 = vld [vmem:[#allocation52_spill] sm:$0xff] }
 0x29f   : > { %v2981_v45 = vadd.f32 %v6531_v6, %v2980_v60  ;;  %1680 = vmatmul.bf16.gmra.mxu0 %v1600_v16  ;;  %v1103_v9 = vpop.permute.xlu2 %1102  ;;  %2693 = vmatmul.bf16.gmra.mxu2 %v2609_v39  ;;  %v2604_v20 = vunpack.c.l.b16 %v2558_v56  ;;  %8339 = vst [vmem:[#allocation25_spill] sm:$0xff] %v6780_v4  ;;  %v1595_v33 = vunpack.c.l.b16 %v1526_v26  ;;  %v3075_v17 = vshll.u32 %v6776_v47, 16  ;;  %v8346_v16 = vld [vmem:[#allocation17_spill] sm:$0xff]  ;;  %v4540_v56 = vld [vmem:[%s7891_s2 + $0x1b0] sm:$0xff] }
 0x2a0   : > { %v1915_v23 = vpop.permute.xlu1 %1914  ;;  %v1479_v52 = vsel %vm1449_vm5, %v1430_v19, %v1103_v9  ;;  %v3068_v61 = vshll.u32 %v3062_v51, 16  ;;  %v2043_v54 = vsel %vm1180_vm0, %v8189_v42, %v8343_v29  ;;  %v3073_v49 = vshrl.u32 %v6776_v47, 16  ;;  %v4532_v42 = vld [vmem:[%s7891_s2 + $0xb0] sm:$0xff]  ;;  %3401 = vmatpush.bf16.msrb.mxu1 %v4540_v56  ;;  %v4632_v56 = vld [vmem:[%s4801_s9 + $0x38] sm:$0xf] }
 0x2a1   : > { %4220 = vst.msk [vmem:[%s6562_s11 + $0x288] sm:$0xff] %vm1180_vm0, %v2981_v45  ;;  %v6786_v12 = vpack.c.b16 %v6780_v4, %v2604_v20  ;;  %v6790_v63 = vpack.c.b16 %v1595_v33, %v8340_v1  ;;  %v6801_v19 = vsel %vm1498_vm6, %v1479_v52, %v6686_v27  ;;  %v6807_v40 = vpack.c.b16 %v2604_v20, %v6478_v62  ;;  %v8347_v45 = vld [vmem:[#allocation54_spill] sm:$0xff]  ;;  %v8348_v52 = vld [vmem:[#allocation95_spill] sm:$0xff] }
 0x2a2   : > { %3035 = vrot.lane.b32.xlu0 %v8341_v8, %s4722_s13  ;;  %v8055_v13 = vunpack.c.l.b16 %v6801_v19  ;;  %v2042_v62 = vsel %vm1180_vm0, %v8346_v16, %v8345_v0  ;;  %v2085_v39 = vsel %vm1253_vm1, %v2043_v54, %v6632_v48  ;;  %v3077_v60 = vrot.slane %v3075_v17, 1  ;;  %3260 = vmatpush.bf16.msrb.mxu0 %v4532_v42  ;;  %v8349_v17 = vld [vmem:[#allocation106_spill] sm:$0xff] }
 0x2a3   : > { %8342 = vst [vmem:[#allocation88_spill] sm:$0xff] %v6807_v40  ;;  %2992 = vmatmul.bf16.gmra.mxu3 %v6786_v12  ;;  %1834 = vmatmul.bf16.gmra.mxu1 %v6790_v63  ;;  %v2083_v26 = vsel %vm1253_vm1, %v2042_v62, %v1915_v23  ;;  %v3066_v9 = vshrl.u32 %v3062_v51, 16  ;;  %v3070_v48 = vrot.slane %v3068_v61, 1  ;;  %v2115_v1 = vsel %vm1302_vm2, %v2085_v39, %v8348_v52  ;;  %v8350_v61 = vld [vmem:[#allocation140_spill] sm:$0xff]  ;;  %v8351_v62 = vld [vmem:[#allocation147_spill] sm:$0xff] }
 0x2a4   : > { %v1963_v50 = vpop.permute.xlu0 %1962  ;;  %v6816_v27 = vpack.c.b16 %v8055_v13, %v1595_v33  ;;  %v2114_v44 = vsel %vm1302_vm2, %v2083_v26, %v8349_v17  ;;  %v6841_v2 = vor.u32 %v3077_v60, %v3073_v49  ;;  %v4631_v49 = vld [vmem:[%s4801_s9 + $0x30] sm:$0xf]  ;;  %v1204_v26 = vsel %vm1180_vm0, %v4632_v56, %v8312_v24 }
 0x2a5   : > { %3466 = vrot.lane.b32.xlu2 %v3062_v51, %s4723_s14  ;;  %v2155_v51 = vsel %vm1351_vm3, %v2114_v44, %v1963_v50  ;;  %v3071_v8 = vor.u32 %v3070_v48, %v3066_v9  ;;  %v1201_v50 = vsel %vm1180_vm0, %v4631_v49, %v8305_v57  ;;  %v4633_v9 = vld [vmem:[%s4833_s12 + $0x38] sm:$0xf] }
 0x2a6   : > { %8344 = vst [vmem:[#allocation31_spill] sm:$0xff] %v6816_v27  ;;  %3037 = vrot.lane.b32.xlu1 %v8347_v45, %s4722_s13  ;;  %v2186_v39 = vsel %vm1400_vm4, %v2155_v51, %v8351_v62  ;;  %v1228_v48 = vsel %vm1180_vm0, %v4633_v9, %v8313_v38  ;;  %v374_v57 = vld [vmem:[%s4833_s12 + $0x98] sm:$0xf]  ;;  %v375_v51 = vld [vmem:[%s4833_s12 + $0x9c] sm:$0x1] }
 0x2a7   : > { %v6834_v20 = vpop.permute.xlu2 %1920  ;;  %v8355_v49 = vld [vmem:[#allocation75_spill] sm:$0xff]  ;;  %v2227_v38 = vsel %vm1449_vm5, %v2186_v39, %v6677_v36  ;;  %v8357_v36 = vld [vmem:[#allocation126_spill] sm:$0xff] }
 0x2a8   : > { %v1965_v33 = vpop.permute.xlu1 %1964  ;;  %v1285_v24 = vsel %vm1253_vm1, %v1228_v48, %v8355_v49  ;;  %v3061_v48 = vunpack.c.l.b16 %v375_v51 }
 0x2a9   : > { %v2157_v23 = vsel %vm1351_vm3, %v2115_v1, %v1965_v33 }
 0x2aa   : > { %3468 = vrot.lane.b32.xlu0 %v6776_v47, %s4723_s14  ;;  %v2187_v54 = vsel %vm1400_vm4, %v2157_v23, %v8350_v61  ;;  %v8352_v23 = vld [vmem:[#allocation15_spill] sm:$0xff] }
 0x2ac   : > { %v2013_v16 = vpop.permute.xlu0 %2012 }
 0x2ad   : > { %v2229_v42 = vsel %vm1449_vm5, %v2187_v54, %v2013_v16  ;;  %3088 = vrot.lane.b32.xlu2 %v6841_v2, %s4724_s20  ;;  %v8354_v16 = vld [vmem:[#allocation68_spill] sm:$0xff] }
 0x2ae   : > { %3086 = vrot.lane.b32.xlu1 %v3071_v8, %s4724_s20  ;;  %v2259_v60 = vsel %vm1498_vm6, %v2229_v42, %v6722_v10  ;;  %v8353_v8 = vld [vmem:[#allocation66_spill] sm:$0xff]  ;;  %v1269_v42 = vsel %vm1253_vm1, %v1204_v26, %v8354_v16  ;;  %v8356_v26 = vld [vmem:[#allocation49_spill] sm:$0xff]  ;;  %v6886_v16 = vunpack.c.l.b16 %v374_v57 }
 0x2af   : > { %v2746_v33 = vunpack.c.l.b16 %v2259_v60  ;;  %v2747_v1 = vunpack.c.h.b16 %v2259_v60  ;;  %v6865_v44 = vpop.permute.xlu2 %2014  ;;  %2698 = vmatmul.bf16.gmra.mxu2 %v8352_v23  ;;  %v1267_v54 = vsel %vm1253_vm1, %v1201_v50, %v8353_v8  ;;  %v1318_v49 = vsel %vm1302_vm2, %v1269_v42, %v8322_v5  ;;  %v4547_v42 = vld [vmem:[%s7891_s2 + $0xe8] sm:$0xff] }
 0x2b0   : > { %v6876_v56 = vpop.permute.xlu1 %1164  ;;  %v1316_v60 = vsel %vm1302_vm2, %v1267_v54, %v8309_v28  ;;  %3637 = vmatpush.bf16.msrb.mxu2 %v4547_v42 }
 0x2b1   : > { %v2762_v9 = vpack.c.b16 %v2746_v33, %v2746_v33  ;;  %v2763_v23 = vpack.c.b16 %v2747_v1, %v2747_v1  ;;  %v2258_v13 = vsel %vm1498_vm6, %v2227_v38, %v6876_v56  ;;  %v1365_v39 = vsel %vm1351_vm3, %v1316_v60, %v8357_v36  ;;  %v8358_v1 = vld [vmem:[#allocation128_spill] sm:$0xff] }
 0x2b2   : > { %v2744_v50 = vunpack.c.l.b16 %v2258_v13  ;;  %v2745_v8 = vunpack.c.h.b16 %v2258_v13  ;;  %3472 = vrot.lane.b32.xlu0 %v8356_v26, %s4725_s23  ;;  %v1367_v54 = vsel %vm1351_vm3, %v1318_v49, %v8358_v1  ;;  %v1414_v13 = vsel %vm1400_vm4, %v1365_v39, %v8318_v21  ;;  %v4555_v21 = vld [vmem:[%s7891_s2 + $0x1e8] sm:$0xff] }
 0x2b3   : > { %v2791_v28 = vshrl.u32 %v2762_v9, 16  ;;  %v2794_v33 = vshll.u32 %v2762_v9, 16  ;;  %v2800_v40 = vshll.u32 %v2763_v23, 16  ;;  %3796 = vmatpush.bf16.msrb.mxu3 %v4555_v21 }
 0x2b4   : > { %v2760_v38 = vpack.c.b16 %v2744_v50, %v2744_v50  ;;  %v2761_v30 = vpack.c.b16 %v2745_v8, %v2745_v8  ;;  %v1087_v4 = vpop.permute.xlu0 %1086  ;;  %v6909_v50 = vpack.c.b16 %v3061_v48, %v6886_v16  ;;  %v1334_v48 = vsel %vm1302_vm2, %v1285_v24, %v8323_v22  ;;  %v4539_v22 = vld [vmem:[%s7891_s2 + $0x1a8] sm:$0xff] }
 0x2b5   : > { %v2793_v51 = vrot.slane %v2791_v28, 4  ;;  %v2796_v27 = vrot.slane %v2794_v33, 5  ;;  %3098 = vrot.lane.b32.xlu2 %v8347_v45, %s4726_s24  ;;  %v1463_v23 = vsel %vm1449_vm5, %v1414_v13, %v1087_v4  ;;  %v1416_v45 = vsel %vm1400_vm4, %v1367_v54, %v8329_v15  ;;  %3402 = vmatpush.bf16.msrb.mxu1 %v4539_v22 }
 0x2b6   : > { %v1825_v57 = vpop.f32.mrf.mxu1  ;;  %v2777_v60 = vshrl.u32 %v2760_v38, 16  ;;  %v2780_v9 = vshll.u32 %v2760_v38, 16  ;;  %3474 = vrot.lane.b32.xlu1 %v8234_v58, %s4725_s23  ;;  %v1512_v49 = vsel %vm1498_vm6, %v1463_v23, %v6492_v59  ;;  %v2786_v33 = vshll.u32 %v2761_v30, 16  ;;  %v4531_v30 = vld [vmem:[%s7891_s2 + $0xa8] sm:$0xff] }
 0x2b7   : > { %v1826_v5 = vadd.f32 %v6531_v6, %v1825_v57  ;;  %v6915_v8 = vpop.permute.xlu2 %1170  ;;  %v2797_v36 = vor.u32 %v2796_v27, %v2793_v51  ;;  %v1588_v1 = vunpack.c.l.b16 %v1512_v49  ;;  %v2802_v13 = vrot.slane %v2800_v40, 5  ;;  %v8359_v57 = vld [vmem:[#allocation62_spill] sm:$0xff]  ;;  %v4546_v40 = vld [vmem:[%s7891_s2 + $0xe0] sm:$0xff]  ;;  %3261 = vmatpush.bf16.msrb.mxu0 %v4531_v30 }
 0x2b8   : > { %v2779_v39 = vrot.slane %v2777_v60, 4  ;;  %v2782_v28 = vrot.slane %v2780_v9, 5  ;;  %v1089_v4 = vpop.permute.xlu1 %1088  ;;  %v3082_v27 = vshll.u32 %v6909_v50, 16  ;;  %v8360_v24 = vunpack.c.l.b16 %v6738_v25  ;;  %3638 = vmatpush.bf16.msrb.mxu2 %v4546_v40 }
 0x2b9   : > { %4091 = vst.msk [vmem:[%s6562_s11 + $0x200] sm:$0xff] %vm1180_vm0, %v1826_v5  ;;  %v1465_v15 = vsel %vm1449_vm5, %v1416_v45, %v1089_v4  ;;  %v2798_v54 = vrot.slane %v2797_v36, 4  ;;  %v2788_v9 = vrot.slane %v2786_v33, 5  ;;  %v8363_v22 = vunpack.c.l.b16 %v6801_v19 }
 0x2ba   : > { %v2783_v38 = vor.u32 %v2782_v28, %v2779_v39  ;;  %3100 = vrot.lane.b32.xlu0 %v8359_v57, %s4726_s24  ;;  %v6926_v59 = vsel %vm1498_vm6, %v1465_v15, %v6665_v11  ;;  %v6940_v51 = vpack.c.b16 %v1588_v1, %v8360_v24  ;;  %v8361_v11 = vld [vmem:[#allocation16_spill] sm:$0xff]  ;;  %v3047_v24 = vpack.c.b16 %v6701_v41, %v6701_v41 }
 0x2bb   : > { %v1383_v5 = vsel %vm1351_vm3, %v1334_v48, %v8361_v11  ;;  %v1589_v42 = vunpack.c.l.b16 %v6926_v59  ;;  %v2803_v21 = vsel %vm6069_vm9, %v2798_v54, %v2802_v13  ;;  %v3084_v48 = vrot.slane %v3082_v27, 1  ;;  %v8362_v54 = vld [vmem:[#allocation98_spill] sm:$0xff]  ;;  %v4545_v11 = vld [vmem:[%s7891_s2 + $0xd8] sm:$0xff] }
 0x2bc   : > { %v1432_v60 = vsel %vm1400_vm4, %v1383_v5, %v8328_v34  ;;  %v1105_v45 = vpop.permute.xlu0 %1104  ;;  %v2784_v49 = vrot.slane %v2783_v38, 4  ;;  %v6953_v28 = vunpack.c.l.b16 %v2803_v21  ;;  %3639 = vmatpush.bf16.msrb.mxu2 %v4545_v11 }
 0x2bd   : > { %v1481_v36 = vsel %vm1449_vm5, %v1432_v60, %v1105_v45  ;;  %v1601_v39 = vpack.c.b16 %v1589_v42, %v1588_v1  ;;  %3480 = vrot.lane.b32.xlu2 %v6909_v50, %s4727_s25  ;;  %v3080_v1 = vshrl.u32 %v6909_v50, 16  ;;  %v8364_v60 = vld [vmem:[#allocation56_spill] sm:$0xff]  ;;  %v8366_v45 = vld [vmem:[#allocation53_spill] sm:$0xff] }
 0x2be   : > { %v1827_v23 = vpop.f32.mrf.mxu1  ;;  %3478 = vrot.lane.b32.xlu1 %v6776_v47, %s4727_s25  ;;  %v2684_v34 = vpop.f32.mrf.mxu2  ;;  %v2789_v33 = vsel %vm6069_vm9, %v2784_v49, %v2788_v9  ;;  %v6963_v4 = vsel %vm1498_vm6, %v1481_v36, %v6504_v46  ;;  %v4554_v46 = vld [vmem:[%s7891_s2 + $0x1e0] sm:$0xff]  ;;  %v8367_v49 = vld [vmem:[#allocation18_spill] sm:$0xff] }
 0x2bf   : > { %v1828_v25 = vadd.f32 %v6531_v6, %v1827_v23  ;;  %v2685_v13 = vadd.f32 %v6531_v6, %v2684_v34  ;;  %1685 = vmatmul.bf16.gmra.mxu0 %v1601_v39  ;;  %v6969_v15 = vpop.permute.xlu2 %1922  ;;  %2703 = vmatmul.bf16.gmra.mxu2 %v8362_v54  ;;  %v2905_v47 = vunpack.c.l.b16 %v2789_v33  ;;  %v1597_v38 = vunpack.c.l.b16 %v6963_v4  ;;  %v8365_v9 = vld [vmem:[#allocation21_spill] sm:$0xff] }
 0x2c0   : > { %v1919_v30 = vpop.permute.xlu1 %1918  ;;  %3797 = vmatpush.bf16.msrb.mxu3 %v4554_v46  ;;  %v6992_v21 = vor.u32 %v3084_v48, %v3080_v1  ;;  %v2045_v41 = vsel %vm1180_vm0, %v8365_v9, %v8364_v60  ;;  %v3048_v34 = vpack.c.b16 %v6728_v14, %v6728_v14  ;;  %v4538_v48 = vld [vmem:[%s7891_s2 + $0x1a0] sm:$0xff]  ;;  %v8369_v46 = vld [vmem:[#allocation107_spill] sm:$0xff] }
 0x2c1   : > { %4092 = vst.msk [vmem:[%s6562_s11 + $0x208] sm:$0xff] %vm1180_vm0, %v1828_v25  ;;  %v2913_v27 = vpack.c.b16 %v6953_v28, %v2905_v47  ;;  %v6983_v40 = vpack.c.b16 %v1597_v38, %v8363_v22  ;;  %v2044_v25 = vsel %vm1180_vm0, %v8367_v49, %v8366_v45  ;;  %v8368_v47 = vld [vmem:[#allocation111_spill] sm:$0xff]  ;;  %3403 = vmatpush.bf16.msrb.mxu1 %v4538_v48  ;;  %v8371_v49 = vld [vmem:[#allocation148_spill] sm:$0xff] }
 0x2c2   : > { %4157 = vst.msk [vmem:[%s6562_s11 + $0x90] sm:$0xff] %vm1180_vm0, %v2685_v13  ;;  %3123 = vrot.lane.b32.xlu0 %v6841_v2, %s4728_s26  ;;  %v2983_v5 = vpop.f32.mrf.mxu3  ;;  %v2089_v2 = vsel %vm1253_vm1, %v2045_v41, %v6834_v20  ;;  %v2087_v36 = vsel %vm1253_vm1, %v2044_v25, %v1919_v30  ;;  %v4530_v20 = vld [vmem:[%s7891_s2 + $0xa0] sm:$0xff]  ;;  %v4544_v13 = vld [vmem:[%s7891_s2 + $0xd0] sm:$0xff] }
 0x2c3   : > { %2997 = vmatmul.bf16.gmra.mxu3 %v2913_v27  ;;  %v2984_v19 = vadd.f32 %v6531_v6, %v2983_v5  ;;  %1839 = vmatmul.bf16.gmra.mxu1 %v6983_v40  ;;  %v2117_v14 = vsel %vm1302_vm2, %v2089_v2, %v8368_v47  ;;  %v2116_v30 = vsel %vm1302_vm2, %v2087_v36, %v8369_v46  ;;  %v4543_v5 = vld [vmem:[%s7891_s2 + $0xc8] sm:$0xff]  ;;  %v8372_v2 = vld [vmem:[#allocation35_spill] sm:$0xff] }
 0x2c4   : > { %v1967_v23 = vpop.permute.xlu0 %1966  ;;  %3262 = vmatpush.bf16.msrb.mxu0 %v4530_v20  ;;  %3640 = vmatpush.bf16.msrb.mxu2 %v4544_v13  ;;  %v8373_v36 = vld [vmem:[#allocation29_spill] sm:$0xff] }
 0x2c5   : > { %4221 = vst.msk [vmem:[%s6562_s11 + $0x290] sm:$0xff] %vm1180_vm0, %v2984_v19  ;;  %3050 = vrot.lane.b32.xlu2 %v3047_v24, %s4723_s14  ;;  %v2159_v22 = vsel %vm1351_vm3, %v2116_v30, %v1967_v23  ;;  %v8370_v19 = vld [vmem:[#allocation149_spill] sm:$0xff] }
 0x2c6   : > { %3125 = vrot.lane.b32.xlu1 %v6992_v21, %s4728_s26  ;;  %v2686_v39 = vpop.f32.mrf.mxu2  ;;  %v2188_v25 = vsel %vm1400_vm4, %v2159_v22, %v8371_v49  ;;  %v4542_v30 = vld [vmem:[%s7891_s2 + $0xc0] sm:$0xff] }
 0x2c7   : > { %v2687_v33 = vadd.f32 %v6531_v6, %v2686_v39  ;;  %v7013_v1 = vpop.permute.xlu2 %1972 }
 0x2c8   : > { %v1969_v54 = vpop.permute.xlu1 %1968  ;;  %3641 = vmatpush.bf16.msrb.mxu2 %v4543_v5  ;;  %v2231_v5 = vsel %vm1449_vm5, %v2188_v25, %v6865_v44  ;;  %v8377_v25 = vld [vmem:[#allocation134_spill] sm:$0xff] }
 0x2c9   : > { %4158 = vst.msk [vmem:[%s6562_s11 + $0x98] sm:$0xff] %vm1180_vm0, %v2687_v33  ;;  %v2161_v27 = vsel %vm1351_vm3, %v2117_v14, %v1969_v54  ;;  %v4634_v33 = vld [vmem:[%s4833_s12 + $0x58] sm:$0xf] }
 0x2ca   : > { %3052 = vrot.lane.b32.xlu0 %v3048_v34, %s4723_s14  ;;  %v2985_v24 = vpop.f32.mrf.mxu3  ;;  %v2189_v9 = vsel %vm1400_vm4, %v2161_v27, %v8370_v19  ;;  %v1234_v20 = vsel %vm1180_vm0, %v4634_v33, %v8343_v29  ;;  %v8374_v54 = vld [vmem:[#allocation44_spill] sm:$0xff]  ;;  %v4635_v27 = vld [vmem:[%s4833_s12 + $0x50] sm:$0xf]  ;;  %v7078_v33 = vpack.c.b16 %v6886_v16, %v6886_v16 }
 0x2cb   : > { %v2986_v11 = vadd.f32 %v6531_v6, %v2985_v24  ;;  %v1231_v22 = vsel %vm1180_vm0, %v4635_v27, %v8345_v0  ;;  %v8375_v24 = vld [vmem:[#allocation67_spill] sm:$0xff]  ;;  %v335_v27 = vld [vmem:[%s4801_s9 + $0x9c] sm:$0x1] }
 0x2cc   : > { %v2017_v41 = vpop.permute.xlu0 %2016  ;;  %3642 = vmatpush.bf16.msrb.mxu2 %v4542_v30 }
 0x2cd   : > { %4222 = vst.msk [vmem:[%s6562_s11 + $0x298] sm:$0xff] %vm1180_vm0, %v2986_v11  ;;  %v2233_v23 = vsel %vm1449_vm5, %v2189_v9, %v2017_v41  ;;  %3094 = vrot.lane.b32.xlu2 %v8372_v2, %s4725_s23  ;;  %v1289_v11 = vsel %vm1253_vm1, %v1234_v20, %v8375_v24  ;;  %v8376_v9 = vld [vmem:[#allocation77_spill] sm:$0xff] }
 0x2ce   : > { %3092 = vrot.lane.b32.xlu1 %v8373_v36, %s4725_s23  ;;  %v2261_v39 = vsel %vm1498_vm6, %v2233_v23, %v6915_v8  ;;  %v1338_v44 = vsel %vm1302_vm2, %v1289_v11, %v8348_v52 }
 0x2cf   : > { %v2750_v48 = vunpack.c.l.b16 %v2261_v39  ;;  %v2751_v13 = vunpack.c.h.b16 %v2261_v39  ;;  %1690 = vmatmul.bf16.gmra.mxu0 %v8374_v54  ;;  %v7054_v14 = vpop.permute.xlu2 %1172  ;;  %2708 = vmatmul.bf16.gmra.mxu2 %v6487_v31  ;;  %v1287_v31 = vsel %vm1253_vm1, %v1231_v22, %v8376_v9  ;;  %v334_v54 = vld [vmem:[%s4801_s9 + $0x98] sm:$0xf] }
 0x2d0   : > { %v7065_v29 = vpop.permute.xlu1 %1168  ;;  %v1336_v0 = vsel %vm1302_vm2, %v1287_v31, %v8349_v17  ;;  %v8378_v17 = vld [vmem:[#allocation127_spill] sm:$0xff] }
 0x2d1   : > { %v2766_v41 = vpack.c.b16 %v2750_v48, %v2750_v48  ;;  %v2767_v23 = vpack.c.b16 %v2751_v13, %v2751_v13  ;;  %v2260_v2 = vsel %vm1498_vm6, %v2231_v5, %v7065_v29  ;;  %v1385_v20 = vsel %vm1351_vm3, %v1336_v0, %v8377_v25 }
 0x2d2   : > { %v2748_v36 = vunpack.c.l.b16 %v2260_v2  ;;  %v2749_v39 = vunpack.c.h.b16 %v2260_v2  ;;  %3107 = vrot.lane.b32.xlu0 %v3048_v34, %s4727_s25  ;;  %v1387_v22 = vsel %vm1351_vm3, %v1338_v44, %v8378_v17  ;;  %v1434_v34 = vsel %vm1400_vm4, %v1385_v20, %v8351_v62  ;;  %v4537_v44 = vld [vmem:[%s7891_s2 + $0x198] sm:$0xff] }
 0x2d3   : > { %v2819_v48 = vshrl.u32 %v2766_v41, 16  ;;  %v2822_v13 = vshll.u32 %v2766_v41, 16  ;;  %v2828_v31 = vshll.u32 %v2767_v23, 16  ;;  %v7095_v2 = vunpack.c.l.b16 %v334_v54  ;;  %v4553_v23 = vld [vmem:[%s7891_s2 + $0x1d8] sm:$0xff]  ;;  %3404 = vmatpush.bf16.msrb.mxu1 %v4537_v44 }
 0x2d4   : > { %v2764_v24 = vpack.c.b16 %v2748_v36, %v2748_v36  ;;  %v2765_v16 = vpack.c.b16 %v2749_v39, %v2749_v39  ;;  %v1107_v5 = vpop.permute.xlu0 %1106  ;;  %v3114_v0 = vunpack.c.l.b16 %v335_v27  ;;  %v1436_v62 = vsel %vm1400_vm4, %v1387_v22, %v8350_v61  ;;  %3798 = vmatpush.bf16.msrb.mxu3 %v4553_v23 }
 0x2d5   : > { %v2821_v30 = vrot.slane %v2819_v48, 4  ;;  %v2824_v9 = vrot.slane %v2822_v13, 5  ;;  %v1483_v52 = vsel %vm1449_vm5, %v1434_v34, %v1107_v5  ;;  %3039 = vrot.lane.b32.xlu2 %v8359_v57, %s4722_s13  ;;  %v4529_v57 = vld [vmem:[%s7891_s2 + $0x98] sm:$0xff]  ;;  %v2830_v54 = vrot.slane %v2828_v31, 5 }
 0x2d6   : > { %v2805_v11 = vshrl.u32 %v2764_v24, 16  ;;  %v2808_v41 = vshll.u32 %v2764_v24, 16  ;;  %3109 = vrot.lane.b32.xlu1 %v7078_v33, %s4727_s25  ;;  %v2814_v48 = vshll.u32 %v2765_v16, 16  ;;  %v1532_v61 = vsel %vm1498_vm6, %v1483_v52, %v6876_v56  ;;  %3263 = vmatpush.bf16.msrb.mxu0 %v4529_v57 }
 0x2d7   : > { %v7099_v36 = vpop.permute.xlu2 %1112  ;;  %v2825_v39 = vor.u32 %v2824_v9, %v2821_v30  ;;  %v3115_v24 = vpack.c.b16 %v3114_v0, %v7095_v2  ;;  %v1752_v16 = vunpack.c.l.b16 %v1532_v61  ;;  %v8379_v30 = vld [vmem:[#allocation43_spill] sm:$0xff] }
 0x2d8   : > { %v2807_v25 = vrot.slane %v2805_v11, 4  ;;  %v2810_v20 = vrot.slane %v2808_v41, 5  ;;  %v1109_v13 = vpop.permute.xlu1 %1108  ;;  %v8380_v9 = vld [vmem:[#allocation19_spill] sm:$0xff]  ;;  %v2816_v52 = vrot.slane %v2814_v48, 5 }
 0x2d9   : > { %v1485_v27 = vsel %vm1449_vm5, %v1436_v62, %v1109_v13  ;;  %v2826_v17 = vrot.slane %v2825_v39, 4  ;;  %v2046_v31 = vsel %vm1180_vm0, %v8380_v9, %v8379_v30  ;;  %v3119_v41 = vshll.u32 %v3115_v24, 16  ;;  %v4528_v61 = vld [vmem:[%s7891_s2 + $0x90] sm:$0xff] }
 0x2da   : > { %v2811_v22 = vor.u32 %v2810_v20, %v2807_v25  ;;  %3470 = vrot.lane.b32.xlu0 %v6909_v50, %s4723_s14  ;;  %v7117_v34 = vsel %vm1498_vm6, %v1485_v27, %v6722_v10  ;;  %v2091_v10 = vsel %vm1253_vm1, %v2046_v31, %v6969_v15  ;;  %v3117_v23 = vshrl.u32 %v3115_v24, 16  ;;  %v4552_v25 = vld [vmem:[%s7891_s2 + $0x1d0] sm:$0xff]  ;;  %v8381_v20 = vld [vmem:[#allocation97_spill] sm:$0xff]  ;;  %3264 = vmatpush.bf16.msrb.mxu0 %v4528_v61 }
 0x2db   : > { %v1753_v56 = vunpack.c.l.b16 %v7117_v34  ;;  %v2831_v5 = vsel %vm6069_vm9, %v2826_v17, %v2830_v54  ;;  %v3121_v57 = vrot.slane %v3119_v41, 1  ;;  %3799 = vmatpush.bf16.msrb.mxu3 %v4552_v25  ;;  %v4536_v54 = vld [vmem:[%s7891_s2 + $0x190] sm:$0xff]  ;;  %v8382_v17 = vld [vmem:[#allocation57_spill] sm:$0xff] }
 0x2dc   : > { %v1925_v11 = vpop.permute.xlu0 %1924  ;;  %v2812_v50 = vrot.slane %v2811_v22, 4  ;;  %v7130_v62 = vunpack.c.l.b16 %v2831_v5  ;;  %v8383_v5 = vld [vmem:[#allocation142_spill] sm:$0xff]  ;;  %3405 = vmatpush.bf16.msrb.mxu1 %v4536_v54  ;;  %v4638_v25 = vld [vmem:[%s4833_s12 + $0x60] sm:$0xf] }
 0x2dd   : > { %v1760_v0 = vpack.c.b16 %v1753_v56, %v1752_v16  ;;  %3476 = vrot.lane.b32.xlu2 %v6604_v35, %s4725_s23  ;;  %v3122_v13 = vor.u32 %v3121_v57, %v3117_v23  ;;  %v4636_v41 = vld [vmem:[%s4833_s12 + $0x70] sm:$0xf]  ;;  %v4527_v54 = vld [vmem:[%s7891_s2 + $0x88] sm:$0xff] }
 0x2de   : > { %3090 = vrot.lane.b32.xlu1 %v6992_v21, %s4724_s20  ;;  %v2817_v39 = vsel %vm6069_vm9, %v2812_v50, %v2816_v52  ;;  %v2118_v21 = vsel %vm1302_vm2, %v2091_v10, %v8381_v20  ;;  %v1243_v10 = vsel %vm1180_vm0, %v4636_v41, %v8379_v30  ;;  %3265 = vmatpush.bf16.msrb.mxu0 %v4527_v54 }
 0x2df   : > { %1695 = vmatmul.bf16.gmra.mxu0 %v6484_v43  ;;  %1844 = vmatmul.bf16.gmra.mxu1 %v1760_v0  ;;  %v7139_v15 = vpop.permute.xlu2 %1974  ;;  %v7141_v44 = vunpack.c.l.b16 %v2817_v39  ;;  %v4637_v0 = vld [vmem:[%s4833_s12 + $0x68] sm:$0xf] }
 0x2e0   : > { %v1971_v35 = vpop.permute.xlu1 %1970  ;;  %2713 = vmatmul.bf16.gmra.mxu2 %v6786_v12  ;;  %v2047_v12 = vsel %vm1180_vm0, %v8295_v32, %v8382_v17 }
 0x2e1   : > { %v2163_v48 = vsel %vm1351_vm3, %v2118_v21, %v1971_v35  ;;  %v2914_v43 = vpack.c.b16 %v7130_v62, %v7141_v44  ;;  %v3738_v27 = vpack.c.b16 %v7141_v44, %v6953_v28  ;;  %v2093_v22 = vsel %vm1253_vm1, %v2047_v12, %v1925_v11  ;;  %v8385_v35 = vld [vmem:[#allocation70_spill] sm:$0xff] }
 0x2e2   : > { %3102 = vrot.lane.b32.xlu0 %v6675_v7, %s4726_s24  ;;  %v2190_v9 = vsel %vm1400_vm4, %v2163_v48, %v8383_v5  ;;  %v8384_v7 = vld [vmem:[#allocation113_spill] sm:$0xff]  ;;  %v1295_v21 = vsel %vm1253_vm1, %v1243_v10, %v8385_v35  ;;  %v8386_v48 = vld [vmem:[#allocation80_spill] sm:$0xff]  ;;  %v8387_v12 = vld [vmem:[#allocation78_spill] sm:$0xff] }
 0x2e3   : > { %3002 = vmatmul.bf16.gmra.mxu3 %v2914_v43  ;;  %v2119_v50 = vsel %vm1302_vm2, %v2093_v22, %v8384_v7 }
 0x2e4   : > { %v2019_v31 = vpop.permute.xlu0 %2018  ;;  %v2165_v61 = vsel %vm1351_vm3, %v2119_v50, %v7013_v1  ;;  %v8389_v50 = vld [vmem:[#allocation129_spill] sm:$0xff] }
 0x2e5   : > { %v2235_v32 = vsel %vm1449_vm5, %v2190_v9, %v2019_v31  ;;  %3127 = vrot.lane.b32.xlu2 %v3122_v13, %s4728_s26  ;;  %v8388_v9 = vld [vmem:[#allocation137_spill] sm:$0xff] }
 0x2e6   : > { %v1676_v16 = vpop.f32.mrf.mxu0  ;;  %3482 = vrot.lane.b32.xlu1 %v3115_v24, %s4727_s25  ;;  %v2262_v11 = vsel %vm1498_vm6, %v2235_v32, %v7054_v14  ;;  %v1237_v24 = vsel %vm1180_vm0, %v4638_v25, %v8366_v45  ;;  %v3106_v45 = vpack.c.b16 %v7095_v2, %v7095_v2  ;;  %v7223_v25 = vld [vmem:[#allocation2] ss:$0 sm:$0xff] }
 0x2e7   : > { %v1677_v52 = vadd.f32 %v6531_v6, %v1676_v16  ;;  %v1240_v6 = vsel %vm1180_vm0, %v4637_v0, %v8364_v60  ;;  %v2752_v39 = vunpack.c.l.b16 %v2262_v11  ;;  %v2753_v23 = vunpack.c.h.b16 %v2262_v11  ;;  %v7184_v57 = vpop.permute.xlu2 %2024  ;;  %v8391_v0 = vld [vmem:[#allocation13_spill] sm:$0xff] }
 0x2e8   : > { %v1293_v30 = vsel %vm1253_vm1, %v1240_v6, %v8386_v48  ;;  %v2021_v43 = vpop.permute.xlu1 %2020  ;;  %v1291_v22 = vsel %vm1253_vm1, %v1237_v24, %v8387_v12  ;;  %v1344_v16 = vsel %vm1302_vm2, %v1295_v21, %v8381_v20  ;;  %v8390_v20 = vld [vmem:[#allocation135_spill] sm:$0xff] }
 0x2e9   : > { %1713 = vst.msk [vmem:[%s6562_s11 + $0x10] sm:$0xff] %vm1180_vm0, %v1677_v52  ;;  %v1342_v60 = vsel %vm1302_vm2, %v1293_v30, %v8368_v47  ;;  %v2768_v13 = vpack.c.b16 %v2752_v39, %v2752_v39  ;;  %v2769_v31 = vpack.c.b16 %v2753_v23, %v2753_v23  ;;  %v1340_v1 = vsel %vm1302_vm2, %v1291_v22, %v8369_v46 }
 0x2ea   : > { %v1391_v47 = vsel %vm1351_vm3, %v1342_v60, %v8388_v9  ;;  %3054 = vrot.lane.b32.xlu0 %v7078_v33, %s4723_s14  ;;  %v1393_v11 = vsel %vm1351_vm3, %v1344_v16, %v8389_v50  ;;  %v1389_v41 = vsel %vm1351_vm3, %v1340_v1, %v8390_v20  ;;  %v2191_v33 = vsel %vm1400_vm4, %v2165_v61, %v8391_v0  ;;  %v8392_v16 = vld [vmem:[#allocation58_spill] sm:$0xff] }
 0x2eb   : > { %v1440_v52 = vsel %vm1400_vm4, %v1391_v47, %v8370_v19  ;;  %v2833_v2 = vshrl.u32 %v2768_v13, 16  ;;  %v2836_v32 = vshll.u32 %v2768_v13, 16  ;;  %v1830_v46 = vpop.f32.mrf.mxu1  ;;  %v2237_v23 = vsel %vm1449_vm5, %v2191_v33, %v2021_v43  ;;  %v8393_v9 = vld [vmem:[#allocation10_spill] sm:$0xff] }
 0x2ec   : > { %v1489_v10 = vsel %vm1449_vm5, %v1440_v52, %v7099_v36  ;;  %v7226_v35 = vpop.permute.xlu0 %1174  ;;  %v4526_v36 = vld [vmem:[%s7891_s2 + $0x80] sm:$0xff]  ;;  %v1442_v21 = vsel %vm1400_vm4, %v1393_v11, %v8383_v5  ;;  %v2842_v48 = vshll.u32 %v2769_v31, 16  ;;  %v1831_v30 = vadd.f32 %v7223_v25, %v1830_v46  ;;  %v4551_v11 = vld [vmem:[%s7891_s2 + $0x1c8] sm:$0xff] }
 0x2ed   : > { %v2835_v39 = vrot.slane %v2833_v2, 4  ;;  %v2838_v19 = vrot.slane %v2836_v32, 5  ;;  %3111 = vrot.lane.b32.xlu2 %v3106_v45, %s4727_s25  ;;  %v2263_v60 = vsel %vm1498_vm6, %v2237_v23, %v7226_v35  ;;  %v1438_v12 = vsel %vm1400_vm4, %v1389_v41, %v8371_v49  ;;  %3266 = vmatpush.bf16.msrb.mxu0 %v4526_v36 }
 0x2ee   : > { %v1678_v6 = vpop.f32.mrf.mxu0  ;;  %3096 = vrot.lane.b32.xlu1 %v6681_v3, %s4725_s23  ;;  %v2689_v43 = vpop.f32.mrf.mxu2  ;;  %v2754_v61 = vunpack.c.l.b16 %v2263_v60  ;;  %v2755_v54 = vunpack.c.h.b16 %v2263_v60  ;;  %4093 = vst.msk [vmem:[%s6562_s11 + $0x210] sm:$0xff] %vm1180_vm0, %v1831_v30  ;;  %v8394_v47 = vpack.c.b16 %v8392_v16, %v8393_v9  ;;  %v1538_v31 = vsel %vm1498_vm6, %v1489_v10, %v6915_v8  ;;  %v4535_v8 = vld [vmem:[%s7891_s2 + $0x188] sm:$0xff]  ;;  %3800 = vmatpush.bf16.msrb.mxu3 %v4551_v11 }
 0x2ef   : > { %v1679_v24 = vadd.f32 %v7223_v25, %v1678_v6  ;;  %v2690_v13 = vadd.f32 %v7223_v25, %v2689_v43  ;;  %1700 = vmatmul.bf16.gmra.mxu0 %v6790_v63  ;;  %v1115_v5 = vpop.permute.xlu2 %1114  ;;  %v2839_v45 = vor.u32 %v2838_v19, %v2835_v39  ;;  %v2844_v2 = vrot.slane %v2842_v48, 5  ;;  %3406 = vmatpush.bf16.msrb.mxu1 %v4535_v8 }
 0x2f0   : > { %v1111_v3 = vpop.permute.xlu1 %1110  ;;  %v1491_v22 = vsel %vm1449_vm5, %v1442_v21, %v1115_v5  ;;  %3643 = vmatmul.bf16.vlgmr.msrb.gmra.mxu2 %v8394_v47  ;;  %v2770_v63 = vpack.c.b16 %v2754_v61, %v2754_v61  ;;  %v2771_v1 = vpack.c.b16 %v2755_v54, %v2755_v54 }
 0x2f1   : > { %1714 = vst.msk [vmem:[%s6562_s11 + $0x18] sm:$0xff] %vm1180_vm0, %v1679_v24  ;;  %v1487_v52 = vsel %vm1449_vm5, %v1438_v12, %v1111_v3  ;;  %v2840_v49 = vrot.slane %v2839_v45, 4  ;;  %v7266_v20 = vsel %vm1498_vm6, %v1491_v22, %v7054_v14  ;;  %v8396_v3 = vld [vmem:[#allocation24_spill] sm:$0xff] }
 0x2f2   : > { %4159 = vst.msk [vmem:[%s6562_s11 + $0xa0] sm:$0xff] %vm1180_vm0, %v2690_v13  ;;  %v2988_v32 = vpop.f32.mrf.mxu3  ;;  %v1536_v50 = vsel %vm1498_vm6, %v1487_v52, %v7065_v29  ;;  %v2847_v41 = vshrl.u32 %v2770_v63, 16  ;;  %v2850_v10 = vshll.u32 %v2770_v63, 16  ;;  %v1755_v29 = vunpack.c.l.b16 %v1538_v31  ;;  %v8398_v52 = vld [vmem:[#allocation23_spill] sm:$0xff] }
 0x2f3   : > { %v2989_v33 = vadd.f32 %v7223_v25, %v2988_v32  ;;  %v1832_v6 = vpop.f32.mrf.mxu1  ;;  %v1754_v46 = vunpack.c.l.b16 %v1536_v50  ;;  %v2845_v39 = vsel %vm6069_vm9, %v2840_v49, %v2844_v2  ;;  %v1756_v19 = vunpack.c.l.b16 %v7266_v20  ;;  %v8399_v32 = vld [vmem:[#allocation116_spill] sm:$0xff] }
 0x2f4   : > { %v2849_v23 = vrot.slane %v2847_v41, 4  ;;  %v2852_v24 = vrot.slane %v2850_v10, 5  ;;  %v2856_v36 = vshll.u32 %v2771_v1, 16  ;;  %v1833_v14 = vadd.f32 %v7223_v25, %v1832_v6  ;;  %v1927_v21 = vpop.permute.xlu0 %1926  ;;  %v8397_v1 = vld [vmem:[#allocation47_spill] sm:$0xff]  ;;  %v4550_v41 = vld [vmem:[%s7891_s2 + $0x1c0] sm:$0xff]  ;;  %v8401_v6 = vld [vmem:[#allocation34_spill] sm:$0xff] }
 0x2f5   : > { %4223 = vst.msk [vmem:[%s6562_s11 + $0x2a0] sm:$0xff] %vm1180_vm0, %v2989_v33  ;;  %v1761_v30 = vpack.c.b16 %v1755_v29, %v1754_v46  ;;  %v7275_v43 = vunpack.c.l.b16 %v2845_v39  ;;  %v7279_v60 = vpack.c.b16 %v1754_v46, %v1753_v56  ;;  %v7286_v54 = vpack.c.b16 %v1756_v19, %v1755_v29  ;;  %v8395_v56 = vld [vmem:[#allocation60_spill] sm:$0xff]  ;;  %v8400_v33 = vld [vmem:[#allocation69_spill] sm:$0xff]  ;;  %3801 = vmatpush.bf16.msrb.mxu3 %v4550_v41  ;;  %v8408_v41 = vld [vmem:[#allocation138_spill] sm:$0xff] }
 0x2f6   : > { %v2691_v48 = vpop.f32.mrf.mxu2  ;;  %v2853_v13 = vor.u32 %v2852_v24, %v2849_v23  ;;  %4094 = vst.msk [vmem:[%s6562_s11 + $0x218] sm:$0xff] %vm1180_vm0, %v1833_v14  ;;  %v2858_v12 = vrot.slane %v2856_v36, 5  ;;  %v2048_v22 = vsel %vm1180_vm0, %v8396_v3, %v8395_v56  ;;  %v2049_v49 = vsel %vm1180_vm0, %v8398_v52, %v8397_v1  ;;  %v8403_v29 = vld [vmem:[#allocation100_spill] sm:$0xff]  ;;  %v8404_v24 = vld [vmem:[#allocation150_spill] sm:$0xff] }
 0x2f7   : > { %v2692_v61 = vadd.f32 %v7223_v25, %v2691_v48  ;;  %1849 = vmatmul.bf16.gmra.mxu1 %v1761_v30  ;;  %v3739_v45 = vpack.c.b16 %v7275_v43, %v7130_v62  ;;  %v2095_v9 = vsel %vm1253_vm1, %v2048_v22, %v1927_v21  ;;  %v8402_v46 = vpack.c.b16 %v8400_v33, %v8401_v6  ;;  %v8405_v14 = vld [vmem:[#allocation144_spill] sm:$0xff]  ;;  %v1121_v33 = vpop.permute.xlu2 %1120 }
 0x2f8   : > { %v1929_v5 = vpop.permute.xlu1 %1928  ;;  %v2854_v34 = vrot.slane %v2853_v13, 4  ;;  %v2120_v50 = vsel %vm1302_vm2, %v2095_v9, %v8399_v32 }
 0x2f9   : > { %4160 = vst.msk [vmem:[%s6562_s11 + $0xa8] sm:$0xff] %vm1180_vm0, %v2692_v61  ;;  %v2097_v11 = vsel %vm1253_vm1, %v2049_v49, %v1929_v5  ;;  %v2167_v23 = vsel %vm1351_vm3, %v2120_v50, %v7139_v15  ;;  %v4534_v15 = vld [vmem:[%s7891_s2 + $0x180] sm:$0xff] }
 0x2fa   : > { %v2990_v16 = vpop.f32.mrf.mxu3  ;;  %v2859_v31 = vsel %vm6069_vm9, %v2854_v34, %v2858_v12  ;;  %v2121_v39 = vsel %vm1302_vm2, %v2097_v11, %v8403_v29  ;;  %v2192_v36 = vsel %vm1400_vm4, %v2167_v23, %v8404_v24  ;;  %v4640_v12 = vld [vmem:[%s4833_s12 + $0x78] sm:$0xf]  ;;  %3407 = vmatpush.bf16.msrb.mxu1 %v4534_v15  ;;  %v4641_v49 = vld [vmem:[%s4833_s12 + $0x80] sm:$0xf] }
 0x2fb   : > { %v2991_v47 = vadd.f32 %v7223_v25, %v2990_v16  ;;  %v7299_v63 = vunpack.c.l.b16 %v2859_v31  ;;  %v1246_v34 = vsel %vm1180_vm0, %v4640_v12, %v8382_v17  ;;  %v8406_v16 = vld [vmem:[#allocation82_spill] sm:$0xff] }
 0x2fc   : > { %v1977_v2 = vpop.permute.xlu0 %1976  ;;  %v1297_v9 = vsel %vm1253_vm1, %v1246_v34, %v8406_v16  ;;  %v8413_v34 = vld [vmem:[#allocation139_spill] sm:$0xff] }
 0x2fd   : > { %4224 = vst.msk [vmem:[%s6562_s11 + $0x2a8] sm:$0xff] %vm1180_vm0, %v2991_v47  ;;  %v2915_v8 = vpack.c.b16 %v7299_v63, %v7275_v43  ;;  %v1346_v17 = vsel %vm1302_vm2, %v1297_v9, %v8384_v7 }
 0x2ff   : > { %1705 = vmatmul.bf16.gmra.mxu0 %v6983_v40  ;;  %3007 = vmatmul.bf16.gmra.mxu3 %v2915_v8  ;;  %v2169_v40 = vsel %vm1351_vm3, %v2121_v39, %v1977_v2  ;;  %v1249_v2 = vsel %vm1180_vm0, %v4641_v49, %v8395_v56  ;;  %v8407_v8 = vld [vmem:[#allocation84_spill] sm:$0xff] }
 0x300   : > { %v2023_v10 = vpop.permute.xlu1 %2022  ;;  %3648 = vmatmul.bf16.gmra.mxu2 %v8402_v46  ;;  %v2193_v21 = vsel %vm1400_vm4, %v2169_v40, %v8405_v14 }
 0x301   : > { %v2239_v48 = vsel %vm1449_vm5, %v2192_v36, %v2023_v10  ;;  %v2241_v22 = vsel %vm1449_vm5, %v2193_v21, %v7184_v57  ;;  %v1299_v57 = vsel %vm1253_vm1, %v1249_v2, %v8407_v8  ;;  %v1395_v10 = vsel %vm1351_vm3, %v1346_v17, %v8408_v41 }
 0x302   : > { %v1348_v39 = vsel %vm1302_vm2, %v1299_v57, %v8399_v32  ;;  %v1444_v56 = vsel %vm1400_vm4, %v1395_v10, %v8391_v0 }
 0x304   : > { %v1177_v30 = vpop.permute.xlu0 %1176 }
 0x305   : > { %v2264_v13 = vsel %vm1498_vm6, %v2239_v48, %v1177_v30 }
 0x306   : > { %v2756_v61 = vunpack.c.l.b16 %v2264_v13  ;;  %v2757_v5 = vunpack.c.h.b16 %v2264_v13  ;;  %v8409_v13 = vld [vmem:[#allocation5_spill] sm:$0xff] }
 0x308   : > { %v7335_v3 = vpop.permute.xlu1 %1178  ;;  %v2772_v47 = vpack.c.b16 %v2756_v61, %v2756_v61  ;;  %v2773_v31 = vpack.c.b16 %v2757_v5, %v2757_v5  ;;  %v8410_v61 = vunpack.c.l.b16 %v8409_v13  ;;  %v8411_v5 = vld [vmem:[#allocation38_spill] sm:$0xff]  ;;  %v8416_v13 = vld [vmem:[#allocation73_spill] sm:$0xff] }
 0x309   : > { %v2265_v52 = vsel %vm1498_vm6, %v2241_v22, %v7335_v3  ;;  %v8412_v15 = vunpack.c.l.b16 %v8411_v5  ;;  %v1397_v22 = vsel %vm1351_vm3, %v1348_v39, %v8413_v34  ;;  %v8417_v34 = vld [vmem:[#allocation132_spill] sm:$0xff] }
 0x30a   : > { %v2758_v50 = vunpack.c.l.b16 %v2265_v52  ;;  %v2759_v11 = vunpack.c.h.b16 %v2265_v52  ;;  %v2861_v6 = vshrl.u32 %v2772_v47, 16  ;;  %v2864_v46 = vshll.u32 %v2772_v47, 16 }
 0x30b   : > { %v2870_v21 = vshll.u32 %v2773_v31, 16  ;;  %v3195_v12 = vpack.c.b16 %v8412_v15, %v8410_v61  ;;  %v1446_v0 = vsel %vm1400_vm4, %v1397_v22, %v8404_v24 }
 0x30c   : > { %v2774_v23 = vpack.c.b16 %v2758_v50, %v2758_v50  ;;  %v2775_v40 = vpack.c.b16 %v2759_v11, %v2759_v11  ;;  %v2863_v7 = vrot.slane %v2861_v6, 4  ;;  %v2866_v36 = vrot.slane %v2864_v46, 5  ;;  %v1117_v48 = vpop.permute.xlu0 %1116  ;;  %v8414_v50 = vld [vmem:[#allocation33_spill] sm:$0xff]  ;;  %v3467_v46 = vpop.permute.xlu2 %3466 }
 0x30d   : > { %v1493_v32 = vsel %vm1449_vm5, %v1444_v56, %v1117_v48  ;;  %v8415_v11 = vpack.c.b16 %v6688_v53, %v8414_v50  ;;  %v2872_v57 = vrot.slane %v2870_v21, 5 }
 0x30e   : > { %v2875_v16 = vshrl.u32 %v2774_v23, 16  ;;  %v2878_v9 = vshll.u32 %v2774_v23, 16  ;;  %v2867_v47 = vor.u32 %v2866_v36, %v2863_v7  ;;  %v1542_v31 = vsel %vm1498_vm6, %v1493_v32, %v7226_v35 }
 0x30f   : > { %3267 = vmatmul.bf16.vlgmr.msrb.gmra.mxu0 %v3195_v12  ;;  %v2884_v2 = vshll.u32 %v2775_v40, 16  ;;  %v1757_v8 = vunpack.c.l.b16 %v1542_v31 }
 0x310   : > { %v2877_v52 = vrot.slane %v2875_v16, 4  ;;  %v2880_v49 = vrot.slane %v2878_v9, 5  ;;  %v1119_v17 = vpop.permute.xlu1 %1118  ;;  %3653 = vmatmul.bf16.gmra.mxu2 %v8415_v11  ;;  %v2868_v10 = vrot.slane %v2867_v47, 4  ;;  %v8418_v11 = vld [vmem:[#allocation40_spill] sm:$0xff] }
 0x311   : > { %v1495_v41 = vsel %vm1449_vm5, %v1446_v0, %v1119_v17  ;;  %v1762_v6 = vpack.c.b16 %v1757_v8, %v1756_v19  ;;  %v2886_v23 = vrot.slane %v2884_v2, 5 }
 0x312   : > { %v2881_v24 = vor.u32 %v2880_v49, %v2877_v52  ;;  %v1544_v35 = vsel %vm1498_vm6, %v1495_v41, %v1177_v30  ;;  %v2873_v39 = vsel %vm6069_vm9, %v2868_v10, %v2872_v57  ;;  %v4642_v30 = vld [vmem:[%s4833_s12 + $0x88] sm:$0xf] }
 0x313   : > { %v1758_v56 = vunpack.c.l.b16 %v1544_v35  ;;  %1854 = vmatmul.bf16.gmra.mxu1 %v1762_v6  ;;  %v7376_v40 = vunpack.c.l.b16 %v2873_v39  ;;  %v1252_v21 = vsel %vm1180_vm0, %v4642_v30, %v8397_v1 }
 0x314   : > { %v2882_v53 = vrot.slane %v2881_v24, 4  ;;  %v7378_v7 = vpop.permute.xlu0 %3035  ;;  %v1301_v61 = vsel %vm1253_vm1, %v1252_v21, %v8416_v13  ;;  %v7408_v0 = vpop.permute.xlu2 %3088 }
 0x315   : > { %v7380_v36 = vpack.c.b16 %v1758_v56, %v1757_v8  ;;  %v3740_v19 = vpack.c.b16 %v7376_v40, %v7299_v63  ;;  %v1350_v15 = vsel %vm1302_vm2, %v1301_v61, %v8403_v29  ;;  %v3484_v8 = vsel %vm1180_vm0, %v8418_v11, %v7378_v7 }
 0x316   : > { %v2887_v20 = vsel %vm6069_vm9, %v2882_v53, %v2886_v23  ;;  %v1399_v22 = vsel %vm1351_vm3, %v1350_v15, %v8417_v34  ;;  %v3488_v39 = vsel %vm1253_vm1, %v3484_v8, %v3467_v46  ;;  %v8419_v53 = vld [vmem:[#allocation20_spill] sm:$0xff] }
 0x317   : > { %v7389_v48 = vunpack.c.l.b16 %v2887_v20  ;;  %v1448_v16 = vsel %vm1400_vm4, %v1399_v22, %v8405_v14 }
 0x318   : > { %v7393_v5 = vpop.permute.xlu1 %3037  ;;  %v1497_v1 = vsel %vm1449_vm5, %v1448_v16, %v1121_v33 }
 0x319   : > { %v2916_v12 = vpack.c.b16 %v7389_v48, %v7376_v40  ;;  %v7406_v32 = vsel %vm1498_vm6, %v1497_v1, %v7335_v3  ;;  %v3485_v35 = vsel %vm1180_vm0, %v8356_v26, %v7393_v5 }
 0x31a   : > { %v1759_v14 = vunpack.c.l.b16 %v7406_v32 }
 0x31b   : > { %3012 = vmatmul.bf16.gmra.mxu3 %v2916_v12 }
 0x31c   : > { %v1681_v9 = vpop.f32.mrf.mxu0  ;;  %v3469_v47 = vpop.permute.xlu0 %3468  ;;  %v1763_v49 = vpack.c.b16 %v1759_v14, %v1758_v56 }
 0x31d   : > { %v1682_v29 = vadd.f32 %v7223_v25, %v1681_v9  ;;  %v7429_v41 = vpop.permute.xlu2 %3098  ;;  %v3490_v30 = vsel %vm1253_vm1, %v3485_v35, %v3469_v47 }
 0x31e   : > { %v3494_v61 = vsel %vm1302_vm2, %v3490_v30, %v7408_v0 }
 0x31f   : > { %1715 = vst.msk [vmem:[%s6562_s11 + $0x20] sm:$0xff] %vm1180_vm0, %v1682_v29  ;;  %3272 = vmatmul.bf16.gmra.mxu0 %v6732_v18  ;;  %v8420_v29 = vld [vmem:[#allocation91_spill] sm:$0xff] }
 0x320   : > { %v7415_v31 = vpop.permute.xlu1 %3086  ;;  %v1835_v33 = vpop.f32.mrf.mxu1 }
 0x321   : > { %v1836_v52 = vadd.f32 %v7223_v25, %v1835_v33  ;;  %v3493_v21 = vsel %vm1302_vm2, %v3488_v39, %v7415_v31 }
 0x322   : > { %v2694_v3 = vpop.f32.mrf.mxu2 }
 0x323   : > { %4095 = vst.msk [vmem:[%s6562_s11 + $0x220] sm:$0xff] %vm1180_vm0, %v1836_v52  ;;  %v2695_v2 = vadd.f32 %v7223_v25, %v2694_v3  ;;  %1859 = vmatmul.bf16.gmra.mxu1 %v1763_v49 }
 0x324   : > { %v1683_v17 = vpop.f32.mrf.mxu0  ;;  %v3473_v50 = vpop.permute.xlu0 %3472 }
 0x325   : > { %v1684_v18 = vadd.f32 %v7223_v25, %v1683_v17  ;;  %4161 = vst.msk [vmem:[%s6562_s11 + $0xb0] sm:$0xff] %vm1180_vm0, %v2695_v2  ;;  %v3497_v13 = vsel %vm1351_vm3, %v3493_v21, %v3473_v50  ;;  %v3481_v34 = vpop.permute.xlu2 %3480 }
 0x326   : > { %v2993_v57 = vpop.f32.mrf.mxu3  ;;  %v3502_v16 = vsel %vm1400_vm4, %v3497_v13, %v7429_v41 }
 0x327   : > { %1716 = vst.msk [vmem:[%s6562_s11 + $0x28] sm:$0xff] %vm1180_vm0, %v1684_v18  ;;  %v2994_v10 = vadd.f32 %v7223_v25, %v2993_v57 }
 0x328   : > { %v3475_v24 = vpop.permute.xlu1 %3474  ;;  %v1837_v6 = vpop.f32.mrf.mxu1 }
 0x329   : > { %4225 = vst.msk [vmem:[%s6562_s11 + $0x2b0] sm:$0xff] %vm1180_vm0, %v2994_v10  ;;  %v1838_v56 = vadd.f32 %v7223_v25, %v1837_v6  ;;  %v3499_v22 = vsel %vm1351_vm3, %v3494_v61, %v3475_v24  ;;  %v4643_v10 = vld [vmem:[%s4801_s9 + $0x40] sm:$0xf] }
 0x32a   : > { %v2696_v23 = vpop.f32.mrf.mxu2  ;;  %v3131_v24 = vsel %vm1180_vm0, %v4643_v10, %v7378_v7 }
 0x32b   : > { %4096 = vst.msk [vmem:[%s6562_s11 + $0x228] sm:$0xff] %vm1180_vm0, %v1838_v56  ;;  %3802 = vmatmul.bf16.vlgmr.msrb.gmra.mxu3 %v8419_v53  ;;  %v2697_v20 = vadd.f32 %v7223_v25, %v2696_v23  ;;  %v8421_v56 = vld [vmem:[#allocation76_spill] sm:$0xff] }
 0x32c   : > { %v7450_v26 = vpop.permute.xlu0 %3100 }
 0x32d   : > { %4162 = vst.msk [vmem:[%s6562_s11 + $0xb8] sm:$0xff] %vm1180_vm0, %v2697_v20  ;;  %v3503_v47 = vsel %vm1400_vm4, %v3499_v22, %v7450_v26  ;;  %v3051_v6 = vpop.permute.xlu2 %3050 }
 0x32e   : > { %v2995_v46 = vpop.f32.mrf.mxu3  ;;  %v3508_v17 = vsel %vm1449_vm5, %v3503_v47, %v3481_v34  ;;  %v3139_v7 = vsel %vm1253_vm1, %v3131_v24, %v3051_v6 }
 0x32f   : > { %v2996_v15 = vadd.f32 %v7223_v25, %v2995_v46  ;;  %3277 = vmatmul.bf16.gmra.mxu0 %v6940_v51 }
 0x330   : > { %v3479_v12 = vpop.permute.xlu1 %3478 }
 0x331   : > { %4226 = vst.msk [vmem:[%s6562_s11 + $0x2b8] sm:$0xff] %vm1180_vm0, %v2996_v15  ;;  %v3506_v51 = vsel %vm1449_vm5, %v3502_v16, %v3479_v12 }
 0x332   : > { %v2699_v1 = vpop.f32.mrf.mxu2 }
 0x333   : > { %v2700_v9 = vadd.f32 %v7223_v25, %v2699_v1  ;;  %3408 = vmatmul.bf16.vlgmr.msrb.gmra.mxu1 %v8420_v29  ;;  %v3145_v1 = vsel %vm1302_vm2, %v3139_v7, %v7415_v31 }
 0x334   : > { %v3124_v33 = vpop.permute.xlu0 %3123 }
 0x335   : > { %4163 = vst.msk [vmem:[%s6562_s11 + $0xc0] sm:$0xff] %vm1180_vm0, %v2700_v9  ;;  %v3511_v52 = vsel %vm1498_vm6, %v3506_v51, %v3124_v33 }
 0x336   : > { %v3516_v3 = vunpack.c.l.b16 %v3511_v52  ;;  %v3517_v49 = vunpack.c.h.b16 %v3511_v52 }
 0x338   : > { %v7470_v2 = vpop.permute.xlu1 %3125  ;;  %v3520_v18 = vpack.c.b16 %v3516_v3, %v3516_v3  ;;  %v3521_v50 = vpack.c.b16 %v3517_v49, %v3517_v49 }
 0x339   : > { %v3512_v11 = vsel %vm1498_vm6, %v3508_v17, %v7470_v2 }
 0x33a   : > { %v3518_v8 = vunpack.c.l.b16 %v3512_v11  ;;  %v2701_v57 = vpop.f32.mrf.mxu2  ;;  %v3525_v35 = vshrl.u32 %v3520_v18, 16  ;;  %v3528_v39 = vshll.u32 %v3520_v18, 16  ;;  %v3534_v46 = vshll.u32 %v3521_v50, 16 }
 0x33b   : > { %3807 = vmatmul.bf16.gmra.mxu3 %v8421_v56  ;;  %v2702_v23 = vadd.f32 %v7223_v25, %v2701_v57  ;;  %v3519_v50 = vunpack.c.h.b16 %v3512_v11  ;;  %v8422_v57 = vld [vmem:[#allocation59_spill] sm:$0xff] }
 0x33c   : > { %v1686_v20 = vpop.f32.mrf.mxu0  ;;  %v3527_v30 = vrot.slane %v3525_v35, 4  ;;  %v3530_v21 = vrot.slane %v3528_v39, 5  ;;  %v3053_v61 = vpop.permute.xlu0 %3052  ;;  %v3522_v15 = vpack.c.b16 %v3518_v8, %v3518_v8  ;;  %v3536_v16 = vrot.slane %v3534_v46, 5 }
 0x33d   : > { %v1687_v13 = vadd.f32 %v7223_v25, %v1686_v20  ;;  %4164 = vst.msk [vmem:[%s6562_s11 + $0xc8] sm:$0xff] %vm1180_vm0, %v2702_v23  ;;  %v3523_v46 = vpack.c.b16 %v3519_v50, %v3519_v50 }
 0x33e   : > { %v3531_v12 = vor.u32 %v3530_v21, %v3527_v30  ;;  %v3539_v51 = vshrl.u32 %v3522_v15, 16  ;;  %v3542_v52 = vshll.u32 %v3522_v15, 16 }
 0x33f   : > { %1717 = vst.msk [vmem:[%s6562_s11 + $0x30] sm:$0xff] %vm1180_vm0, %v1687_v13 }
 0x340   : > { %v3093_v34 = vpop.permute.xlu1 %3092  ;;  %v1840_v22 = vpop.f32.mrf.mxu1  ;;  %v3532_v47 = vrot.slane %v3531_v12, 4  ;;  %v3541_v35 = vrot.slane %v3539_v51, 4  ;;  %v3544_v39 = vrot.slane %v3542_v52, 5 }
 0x341   : > { %v1841_v9 = vadd.f32 %v7223_v25, %v1840_v22  ;;  %v3151_v3 = vsel %vm1351_vm3, %v3145_v1, %v3093_v34  ;;  %v8423_v34 = vld [vmem:[#allocation88_spill] sm:$0xff]  ;;  %v3548_v22 = vshll.u32 %v3523_v46, 16 }
 0x342   : > { %v2704_v49 = vpop.f32.mrf.mxu2  ;;  %v3537_v18 = vsel %vm6069_vm9, %v3532_v47, %v3536_v16  ;;  %v3157_v24 = vsel %vm1400_vm4, %v3151_v3, %v7429_v41  ;;  %v3545_v15 = vor.u32 %v3544_v39, %v3541_v35  ;;  %v4644_v1 = vld [vmem:[%s4833_s12 + $0x40] sm:$0xf] }
 0x343   : > { %4097 = vst.msk [vmem:[%s6562_s11 + $0x230] sm:$0xff] %vm1180_vm0, %v1841_v9  ;;  %v2705_v17 = vadd.f32 %v7223_v25, %v2704_v49  ;;  %3413 = vmatmul.bf16.gmra.mxu1 %v8422_v57  ;;  %v3569_v31 = vunpack.c.l.b16 %v3537_v18  ;;  %v3134_v9 = vsel %vm1180_vm0, %v4644_v1, %v7393_v5  ;;  %v3550_v3 = vrot.slane %v3548_v22, 5  ;;  %v3095_v49 = vpop.permute.xlu2 %3094  ;;  %v8425_v39 = vld [vmem:[#allocation25_spill] sm:$0xff] }
 0x344   : > { %v1688_v8 = vpop.f32.mrf.mxu0  ;;  %v3108_v6 = vpop.permute.xlu0 %3107  ;;  %v3141_v59 = vsel %vm1253_vm1, %v3134_v9, %v3053_v61  ;;  %v3546_v51 = vrot.slane %v3545_v15, 4 }
 0x345   : > { %v1689_v10 = vadd.f32 %v7223_v25, %v1688_v8  ;;  %4165 = vst.msk [vmem:[%s6562_s11 + $0xd0] sm:$0xff] %vm1180_vm0, %v2705_v17  ;;  %v3163_v20 = vsel %vm1449_vm5, %v3157_v24, %v3108_v6  ;;  %v3574_v11 = vpack.c.b16 %v3569_v31, %v6753_v37  ;;  %v3147_v17 = vsel %vm1302_vm2, %v3141_v59, %v7408_v0  ;;  %v8424_v31 = vld [vmem:[#allocation31_spill] sm:$0xff] }
 0x346   : > { %v2998_v23 = vpop.f32.mrf.mxu3  ;;  %v3169_v21 = vsel %vm1498_vm6, %v3163_v20, %v3124_v33  ;;  %v3551_v18 = vsel %vm6069_vm9, %v3546_v51, %v3550_v3  ;;  %v3153_v50 = vsel %vm1351_vm3, %v3147_v17, %v3095_v49 }
 0x347   : > { %1718 = vst.msk [vmem:[%s6562_s11 + $0x38] sm:$0xff] %vm1180_vm0, %v1689_v10  ;;  %v2999_v30 = vadd.f32 %v7223_v25, %v2998_v23  ;;  %3658 = vmatmul.bf16.gmra.mxu2 %v3574_v11  ;;  %v3193_v41 = vunpack.c.l.b16 %v3169_v21  ;;  %v3570_v0 = vunpack.c.l.b16 %v3551_v18  ;;  %v3159_v6 = vsel %vm1400_vm4, %v3153_v50, %v7450_v26 }
 0x348   : > { %v1842_v13 = vpop.f32.mrf.mxu1  ;;  %v3110_v10 = vpop.permute.xlu1 %3109 }
 0x349   : > { %4227 = vst.msk [vmem:[%s6562_s11 + $0x2c0] sm:$0xff] %vm1180_vm0, %v2999_v30  ;;  %v1843_v7 = vadd.f32 %v7223_v25, %v1842_v13  ;;  %v3198_v37 = vpack.c.b16 %v3193_v41, %v1589_v42  ;;  %v3165_v35 = vsel %vm1449_vm5, %v3159_v6, %v3110_v10  ;;  %v7545_v23 = vpack.c.b16 %v3570_v0, %v8425_v39 }
 0x34a   : > { %v2706_v12 = vpop.f32.mrf.mxu2  ;;  %v3171_v30 = vsel %vm1498_vm6, %v3165_v35, %v7470_v2 }
 0x34b   : > { %4098 = vst.msk [vmem:[%s6562_s11 + $0x238] sm:$0xff] %vm1180_vm0, %v1843_v7  ;;  %3812 = vmatmul.bf16.gmra.mxu3 %v8423_v34  ;;  %v2707_v33 = vadd.f32 %v7223_v25, %v2706_v12  ;;  %3282 = vmatmul.bf16.gmra.mxu0 %v3198_v37  ;;  %v7558_v41 = vpop.permute.xlu2 %3039 }
 0x34c   : > { %v1691_v16 = vpop.f32.mrf.mxu0 }
 0x34d   : > { %v1692_v47 = vadd.f32 %v7223_v25, %v1691_v16  ;;  %4166 = vst.msk [vmem:[%s6562_s11 + $0xd8] sm:$0xff] %vm1180_vm0, %v2707_v33  ;;  %v3486_v33 = vsel %vm1180_vm0, %v8234_v58, %v7558_v41 }
 0x34e   : > { %v3000_v42 = vpop.f32.mrf.mxu3 }
 0x34f   : > { %1719 = vst.msk [vmem:[%s6562_s11 + $0x40] sm:$0xff] %vm1180_vm0, %v1692_v47  ;;  %v3001_v52 = vadd.f32 %v7223_v25, %v3000_v42 }
 0x350   : > { %v7575_v16 = vpop.permute.xlu1 %3090 }
 0x351   : > { %4228 = vst.msk [vmem:[%s6562_s11 + $0x2c8] sm:$0xff] %vm1180_vm0, %v3001_v52 }
 0x352   : > { %v2709_v5 = vpop.f32.mrf.mxu2 }
 0x353   : > { %v2710_v61 = vadd.f32 %v7223_v25, %v2709_v5  ;;  %3418 = vmatmul.bf16.gmra.mxu1 %v8424_v31  ;;  %v3477_v58 = vpop.permute.xlu2 %3476 }
 0x354   : > { %v1693_v8 = vpop.f32.mrf.mxu0 }
 0x355   : > { %v1694_v24 = vadd.f32 %v7223_v25, %v1693_v8  ;;  %4167 = vst.msk [vmem:[%s6562_s11 + $0xe0] sm:$0xff] %vm1180_vm0, %v2710_v61 }
 0x357   : > { %1720 = vst.msk [vmem:[%s6562_s11 + $0x48] sm:$0xff] %vm1180_vm0, %v1694_v24  ;;  %3663 = vmatmul.bf16.gmra.mxu2 %v8419_v53  ;;  %v3194_v53 = vunpack.c.l.b16 %v3171_v30 }
 0x359   : > { %v7564_v2 = vpack.c.b16 %v3194_v53, %v1597_v38 }
 0x35a   : > { %v2711_v20 = vpop.f32.mrf.mxu2 }
 0x35b   : > { %3817 = vmatmul.bf16.gmra.mxu3 %v7545_v23  ;;  %v2712_v11 = vadd.f32 %v7223_v25, %v2711_v20  ;;  %3287 = vmatmul.bf16.gmra.mxu0 %v8420_v29  ;;  %v3471_v29 = vpop.permute.xlu0 %3470  ;;  %v7607_v5 = vpop.permute.xlu2 %3127 }
 0x35c   : > { %v1696_v26 = vpop.f32.mrf.mxu0  ;;  %v1845_v21 = vpop.f32.mrf.mxu1  ;;  %v3492_v9 = vsel %vm1253_vm1, %v3486_v33, %v3471_v29 }
 0x35d   : > { %v1697_v46 = vadd.f32 %v7223_v25, %v1696_v26  ;;  %v1846_v13 = vadd.f32 %v7223_v25, %v1845_v21  ;;  %4168 = vst.msk [vmem:[%s6562_s11 + $0xe8] sm:$0xff] %vm1180_vm0, %v2712_v11  ;;  %v3495_v47 = vsel %vm1302_vm2, %v3492_v9, %v7575_v16 }
 0x35f   : > { %1721 = vst.msk [vmem:[%s6562_s11 + $0x50] sm:$0xff] %vm1180_vm0, %v1697_v46 }
 0x360   : > { %4099 = vst.msk [vmem:[%s6562_s11 + $0x240] sm:$0xff] %vm1180_vm0, %v1846_v13 }
 0x363   : > { %v2714_v7 = vpop.f32.mrf.mxu2  ;;  %3423 = vmatmul.bf16.gmra.mxu1 %v7564_v2  ;;  %v7595_v3 = vpop.permute.xlu0 %3102 }
 0x364   : > { %v1698_v15 = vpop.f32.mrf.mxu0  ;;  %v1847_v12 = vpop.f32.mrf.mxu1  ;;  %v2715_v37 = vadd.f32 %v7223_v25, %v2714_v7 }
 0x365   : > { %v1699_v22 = vadd.f32 %v7223_v25, %v1698_v15  ;;  %v1848_v4 = vadd.f32 %v7223_v25, %v1847_v12  ;;  %v4645_v15 = vld [vmem:[%s4833_s12 + $0x90] sm:$0xf] }
 0x366   : > { %4169 = vst.msk [vmem:[%s6562_s11 + $0xf0] sm:$0xff] %vm1180_vm0, %v2715_v37  ;;  %v3003_v38 = vpop.f32.mrf.mxu3  ;;  %v3137_v12 = vsel %vm1180_vm0, %v4645_v15, %v7558_v41 }
 0x367   : > { %1722 = vst.msk [vmem:[%s6562_s11 + $0x58] sm:$0xff] %vm1180_vm0, %v1699_v22  ;;  %v3004_v1 = vadd.f32 %v7223_v25, %v3003_v38  ;;  %3668 = vmatmul.bf16.gmra.mxu2 %v8421_v56  ;;  %v3501_v56 = vsel %vm1351_vm3, %v3495_v47, %v3477_v58 }
 0x368   : > { %4100 = vst.msk [vmem:[%s6562_s11 + $0x248] sm:$0xff] %vm1180_vm0, %v1848_v4  ;;  %v3504_v44 = vsel %vm1400_vm4, %v3501_v56, %v7595_v3  ;;  %v3112_v56 = vpop.permute.xlu2 %3111 }
 0x369   : > { %4229 = vst.msk [vmem:[%s6562_s11 + $0x2d0] sm:$0xff] %vm1180_vm0, %v3004_v1 }
 0x36b   : > { %3822 = vmatmul.bf16.gmra.mxu3 %v3738_v27  ;;  %v2716_v59 = vpop.f32.mrf.mxu2  ;;  %3292 = vmatmul.bf16.gmra.mxu0 %v8422_v57  ;;  %v3483_v27 = vpop.permute.xlu1 %3482 }
 0x36c   : > { %v1701_v42 = vpop.f32.mrf.mxu0  ;;  %v2717_v51 = vadd.f32 %v7223_v25, %v2716_v59  ;;  %v3510_v17 = vsel %vm1449_vm5, %v3504_v44, %v3483_v27  ;;  %v3055_v37 = vpop.permute.xlu0 %3054 }
 0x36d   : > { %v1702_v52 = vadd.f32 %v7223_v25, %v1701_v42  ;;  %v3513_v24 = vsel %vm1498_vm6, %v3510_v17, %v7607_v5  ;;  %v3143_v38 = vsel %vm1253_vm1, %v3137_v12, %v3055_v37 }
 0x36e   : > { %4170 = vst.msk [vmem:[%s6562_s11 + $0xf8] sm:$0xff] %vm1180_vm0, %v2717_v51  ;;  %v3005_v49 = vpop.f32.mrf.mxu3  ;;  %v3703_v62 = vunpack.c.h.b16 %v3513_v24  ;;  %v3149_v40 = vsel %vm1302_vm2, %v3143_v38, %v7575_v16 }
 0x36f   : > { %1723 = vst.msk [vmem:[%s6562_s11 + $0x60] sm:$0xff] %vm1180_vm0, %v1702_v52  ;;  %v3006_v28 = vadd.f32 %v7223_v25, %v3005_v49 }
 0x370   : > { %v3705_v53 = vpack.c.b16 %v3703_v62, %v3703_v62 }
 0x371   : > { %4230 = vst.msk [vmem:[%s6562_s11 + $0x2d8] sm:$0xff] %vm1180_vm0, %v3006_v28 }
 0x372   : > { %v3716_v33 = vshll.u32 %v3705_v53, 16 }
 0x373   : > { %v3644_v57 = vpop.f32.mrf.mxu2  ;;  %3428 = vmatmul.bf16.gmra.mxu1 %v7279_v60  ;;  %v3702_v60 = vunpack.c.l.b16 %v3513_v24  ;;  %v3097_v63 = vpop.permute.xlu1 %3096 }
 0x374   : > { %v1703_v18 = vpop.f32.mrf.mxu0  ;;  %v3645_v61 = vadd.f32 %v7223_v25, %v3644_v57  ;;  %v1850_v8 = vpop.f32.mrf.mxu1  ;;  %v3718_v47 = vrot.slane %v3716_v33, 5  ;;  %v3155_v59 = vsel %vm1351_vm3, %v3149_v40, %v3097_v63 }
 0x375   : > { %v1704_v50 = vadd.f32 %v7223_v25, %v1703_v18  ;;  %v1851_v10 = vadd.f32 %v7223_v25, %v1850_v8  ;;  %v3704_v11 = vpack.c.b16 %v3702_v60, %v3702_v60  ;;  %v3161_v49 = vsel %vm1400_vm4, %v3155_v59, %v7595_v3 }
 0x376   : > { %4411 = vst.msk [vmem:[%s6562_s11 + $0x180] sm:$0xff] %vm1180_vm0, %v3645_v61  ;;  %v3167_v55 = vsel %vm1449_vm5, %v3161_v49, %v3112_v56 }
 0x377   : > { %1724 = vst.msk [vmem:[%s6562_s11 + $0x68] sm:$0xff] %vm1180_vm0, %v1704_v50  ;;  %3673 = vmatmul.bf16.gmra.mxu2 %v8423_v34  ;;  %v3707_v43 = vshrl.u32 %v3704_v11, 16  ;;  %v3173_v3 = vsel %vm1498_vm6, %v3167_v55, %v7607_v5 }
 0x378   : > { %4101 = vst.msk [vmem:[%s6562_s11 + $0x250] sm:$0xff] %vm1180_vm0, %v1851_v10  ;;  %v3343_v8 = vunpack.c.l.b16 %v3173_v3 }
 0x379   : > { %v3709_v29 = vrot.slane %v3707_v43, 4 }
 0x37a   : > { %v3347_v60 = vpack.c.b16 %v3343_v8, %v1759_v14 }
 0x37b   : > { %3827 = vmatmul.bf16.gmra.mxu3 %v3739_v45  ;;  %v3646_v0 = vpop.f32.mrf.mxu2  ;;  %3297 = vmatmul.bf16.gmra.mxu0 %v8424_v31  ;;  %v3710_v45 = vshll.u32 %v3704_v11, 16 }
 0x37c   : > { %v1706_v6 = vpop.f32.mrf.mxu0  ;;  %v3647_v35 = vadd.f32 %v7223_v25, %v3646_v0  ;;  %v1852_v20 = vpop.f32.mrf.mxu1 }
 0x37d   : > { %v1707_v39 = vadd.f32 %v7223_v25, %v1706_v6  ;;  %v1853_v30 = vadd.f32 %v7223_v25, %v1852_v20  ;;  %v3712_v7 = vrot.slane %v3710_v45, 5 }
 0x37e   : > { %4412 = vst.msk [vmem:[%s6562_s11 + $0x188] sm:$0xff] %vm1180_vm0, %v3647_v35 }
 0x37f   : > { %1725 = vst.msk [vmem:[%s6562_s11 + $0x70] sm:$0xff] %vm1180_vm0, %v1707_v39 }
 0x380   : > { %4102 = vst.msk [vmem:[%s6562_s11 + $0x258] sm:$0xff] %vm1180_vm0, %v1853_v30 }
 0x382   : > { %v3008_v34 = vpop.f32.mrf.mxu3 }
 0x383   : > { %v3649_v31 = vpop.f32.mrf.mxu2  ;;  %v3009_v21 = vadd.f32 %v7223_v25, %v3008_v34  ;;  %3433 = vmatmul.bf16.gmra.mxu1 %v7286_v54  ;;  %v3713_v54 = vor.u32 %v3712_v7, %v3709_v29 }
 0x384   : > { %v1708_v26 = vpop.f32.mrf.mxu0  ;;  %v3650_v46 = vadd.f32 %v7223_v25, %v3649_v31 }
 0x385   : > { %v1709_v13 = vadd.f32 %v7223_v25, %v1708_v26  ;;  %4231 = vst.msk [vmem:[%s6562_s11 + $0x2e0] sm:$0xff] %vm1180_vm0, %v3009_v21  ;;  %v3714_v58 = vrot.slane %v3713_v54, 4 }
 0x386   : > { %4413 = vst.msk [vmem:[%s6562_s11 + $0x190] sm:$0xff] %vm1180_vm0, %v3650_v46 }
 0x387   : > { %1726 = vst.msk [vmem:[%s6562_s11 + $0x78] sm:$0xff] %vm1180_vm0, %v1709_v13  ;;  %3678 = vmatmul.bf16.gmra.mxu2 %v7545_v23  ;;  %v3719_v42 = vsel %vm6069_vm9, %v3714_v58, %v3718_v47 }
 0x388   : > { %v3737_v44 = vunpack.c.l.b16 %v3719_v42 }
 0x38a   : > { %v3010_v22 = vpop.f32.mrf.mxu3  ;;  %v3741_v57 = vpack.c.b16 %v3737_v44, %v7389_v48 }
 0x38b   : > { %3832 = vmatmul.bf16.gmra.mxu3 %v3740_v19  ;;  %v3651_v4 = vpop.f32.mrf.mxu2  ;;  %v3011_v23 = vadd.f32 %v7223_v25, %v3010_v22  ;;  %3302 = vmatmul.bf16.gmra.mxu0 %v7564_v2 }
 0x38c   : > { %v3268_v1 = vpop.f32.mrf.mxu0  ;;  %v3652_v9 = vadd.f32 %v7223_v25, %v3651_v4 }
 0x38d   : > { %v3269_v41 = vadd.f32 %v7223_v25, %v3268_v1  ;;  %4232 = vst.msk [vmem:[%s6562_s11 + $0x2e8] sm:$0xff] %vm1180_vm0, %v3011_v23 }
 0x38e   : > { %4414 = vst.msk [vmem:[%s6562_s11 + $0x198] sm:$0xff] %vm1180_vm0, %v3652_v9  ;;  %v7746_v9 = vld [vmem:[#allocation2] ss:$0 sm:$0xff] }
 0x38f   : > { %4283 = vst.msk [vmem:[%s6562_s11 + $0x100] sm:$0xff] %vm1180_vm0, %v3269_v41 }
 0x390   : > { %v1855_v19 = vpop.f32.mrf.mxu1 }
 0x391   : > { %v1856_v2 = vadd.f32 %v7223_v25, %v1855_v19 }
 0x393   : > { %v3654_v51 = vpop.f32.mrf.mxu2  ;;  %4103 = vst.msk [vmem:[%s6562_s11 + $0x260] sm:$0xff] %vm1180_vm0, %v1856_v2  ;;  %3438 = vmatmul.bf16.gmra.mxu1 %v7380_v36 }
 0x394   : > { %v3270_v52 = vpop.f32.mrf.mxu0  ;;  %v3655_v16 = vadd.f32 %v7223_v25, %v3654_v51 }
 0x395   : > { %v3271_v28 = vadd.f32 %v7223_v25, %v3270_v52 }
 0x396   : > { %4415 = vst.msk [vmem:[%s6562_s11 + $0x1a0] sm:$0xff] %vm1180_vm0, %v3655_v16 }
 0x397   : > { %4284 = vst.msk [vmem:[%s6562_s11 + $0x108] sm:$0xff] %vm1180_vm0, %v3271_v28 }
 0x398   : > { %v1857_v27 = vpop.f32.mrf.mxu1 }
 0x399   : > { %v1858_v36 = vadd.f32 %v7223_v25, %v1857_v27 }
 0x39b   : > { %3837 = vmatmul.bf16.gmra.mxu3 %v3741_v57  ;;  %v3656_v17 = vpop.f32.mrf.mxu2  ;;  %4104 = vst.msk [vmem:[%s6562_s11 + $0x268] sm:$0xff] %vm1180_vm0, %v1858_v36 }
 0x39c   : > { %v3273_v18 = vpop.f32.mrf.mxu0  ;;  %v3657_v61 = vadd.f32 %v7223_v25, %v3656_v17 }
 0x39d   : > { %v3274_v50 = vadd.f32 %v7223_v25, %v3273_v18 }
 0x39e   : > { %4416 = vst.msk [vmem:[%s6562_s11 + $0x1a8] sm:$0xff] %vm1180_vm0, %v3657_v61  ;;  %v3013_v48 = vpop.f32.mrf.mxu3 }
 0x39f   : > { %4285 = vst.msk [vmem:[%s6562_s11 + $0x110] sm:$0xff] %vm1180_vm0, %v3274_v50  ;;  %v3014_v5 = vadd.f32 %v7223_v25, %v3013_v48 }
 0x3a0   : > { %v1860_v10 = vpop.f32.mrf.mxu1 }
 0x3a1   : > { %4233 = vst.msk [vmem:[%s6562_s11 + $0x2f0] sm:$0xff] %vm1180_vm0, %v3014_v5  ;;  %v1861_v24 = vadd.f32 %v7223_v25, %v1860_v10 }
 0x3a3   : > { %4105 = vst.msk [vmem:[%s6562_s11 + $0x270] sm:$0xff] %vm1180_vm0, %v1861_v24  ;;  %3443 = vmatmul.bf16.gmra.mxu1 %v3347_v60 }
 0x3a4   : > { %v3275_v0 = vpop.f32.mrf.mxu0 }
 0x3a5   : > { %v3276_v6 = vadd.f32 %v7223_v25, %v3275_v0 }
 0x3a6   : > { %v3015_v35 = vpop.f32.mrf.mxu3 }
 0x3a7   : > { %4286 = vst.msk [vmem:[%s6562_s11 + $0x118] sm:$0xff] %vm1180_vm0, %v3276_v6  ;;  %v3016_v39 = vadd.f32 %v7223_v25, %v3015_v35 }
 0x3a8   : > { %v1862_v20 = vpop.f32.mrf.mxu1 }
 0x3a9   : > { %4234 = vst.msk [vmem:[%s6562_s11 + $0x2f8] sm:$0xff] %vm1180_vm0, %v3016_v39  ;;  %v1863_v32 = vadd.f32 %v7223_v25, %v1862_v20 }
 0x3ab   : > { %4106 = vst.msk [vmem:[%s6562_s11 + $0x278] sm:$0xff] %vm1180_vm0, %v1863_v32 }
 0x3ac   : > { %v3278_v14 = vpop.f32.mrf.mxu0 }
 0x3ad   : > { %v3279_v11 = vadd.f32 %v7223_v25, %v3278_v14 }
 0x3ae   : > { %v3803_v30 = vpop.f32.mrf.mxu3 }
 0x3af   : > { %4287 = vst.msk [vmem:[%s6562_s11 + $0x120] sm:$0xff] %vm1180_vm0, %v3279_v11  ;;  %v3804_v62 = vadd.f32 %v7223_v25, %v3803_v30 }
 0x3b0   : > { %v3409_v43 = vpop.f32.mrf.mxu1 }
 0x3b1   : > { %4475 = vst.msk [vmem:[%s6562_s11 + $0x380] sm:$0xff] %vm1180_vm0, %v3804_v62  ;;  %v3410_v45 = vadd.f32 %v7223_v25, %v3409_v43 }
 0x3b3   : > { %4347 = vst.msk [vmem:[%s6562_s11 + $0x300] sm:$0xff] %vm1180_vm0, %v3410_v45 }
 0x3b4   : > { %v3280_v34 = vpop.f32.mrf.mxu0 }
 0x3b5   : > { %v3281_v31 = vadd.f32 %v7223_v25, %v3280_v34 }
 0x3b6   : > { %v3805_v26 = vpop.f32.mrf.mxu3 }
 0x3b7   : > { %4288 = vst.msk [vmem:[%s6562_s11 + $0x128] sm:$0xff] %vm1180_vm0, %v3281_v31  ;;  %v3806_v21 = vadd.f32 %v7223_v25, %v3805_v26 }
 0x3b8   : > { %v3411_v46 = vpop.f32.mrf.mxu1 }
 0x3b9   : > { %4476 = vst.msk [vmem:[%s6562_s11 + $0x388] sm:$0xff] %vm1180_vm0, %v3806_v21  ;;  %v3412_v13 = vadd.f32 %v7223_v25, %v3411_v46 }
 0x3bb   : > { %4348 = vst.msk [vmem:[%s6562_s11 + $0x308] sm:$0xff] %vm1180_vm0, %v3412_v13 }
 0x3be   : > { %v3808_v53 = vpop.f32.mrf.mxu3 }
 0x3bf   : > { %v3809_v29 = vadd.f32 %v7223_v25, %v3808_v53 }
 0x3c0   : > { %v3414_v7 = vpop.f32.mrf.mxu1 }
 0x3c1   : > { %4477 = vst.msk [vmem:[%s6562_s11 + $0x390] sm:$0xff] %vm1180_vm0, %v3809_v29  ;;  %v3415_v15 = vadd.f32 %v7223_v25, %v3414_v7 }
 0x3c3   : > { %4349 = vst.msk [vmem:[%s6562_s11 + $0x310] sm:$0xff] %vm1180_vm0, %v3415_v15 }
 0x3c6   : > { %v3810_v12 = vpop.f32.mrf.mxu3 }
 0x3c7   : > { %v3811_v37 = vadd.f32 %v7223_v25, %v3810_v12 }
 0x3c8   : > { %v3283_v54 = vpop.f32.mrf.mxu0  ;;  %v3416_v33 = vpop.f32.mrf.mxu1 }
 0x3c9   : > { %4478 = vst.msk [vmem:[%s6562_s11 + $0x398] sm:$0xff] %vm1180_vm0, %v3811_v37  ;;  %v3284_v22 = vadd.f32 %v7223_v25, %v3283_v54  ;;  %v3417_v4 = vadd.f32 %v7223_v25, %v3416_v33 }
 0x3ca   : > { %v3659_v38 = vpop.f32.mrf.mxu2 }
 0x3cb   : > { %4289 = vst.msk [vmem:[%s6562_s11 + $0x130] sm:$0xff] %vm1180_vm0, %v3284_v22  ;;  %v3660_v23 = vadd.f32 %v7223_v25, %v3659_v38 }
 0x3cc   : > { %4350 = vst.msk [vmem:[%s6562_s11 + $0x318] sm:$0xff] %vm1180_vm0, %v3417_v4 }
 0x3cd   : > { %4417 = vst.msk [vmem:[%s6562_s11 + $0x1b0] sm:$0xff] %vm1180_vm0, %v3660_v23 }
 0x3ce   : > { %v3813_v1 = vpop.f32.mrf.mxu3 }
 0x3cf   : > { %v3814_v41 = vadd.f32 %v7746_v9, %v3813_v1 }
 0x3d0   : > { %v3285_v58 = vpop.f32.mrf.mxu0  ;;  %v3419_v47 = vpop.f32.mrf.mxu1 }
 0x3d1   : > { %4479 = vst.msk [vmem:[%s6562_s11 + $0x3a0] sm:$0xff] %vm1180_vm0, %v3814_v41  ;;  %v3286_v63 = vadd.f32 %v7746_v9, %v3285_v58  ;;  %v3420_v40 = vadd.f32 %v7746_v9, %v3419_v47 }
 0x3d2   : > { %v3661_v25 = vpop.f32.mrf.mxu2 }
 0x3d3   : > { %4290 = vst.msk [vmem:[%s6562_s11 + $0x138] sm:$0xff] %vm1180_vm0, %v3286_v63  ;;  %v3662_v19 = vadd.f32 %v7746_v9, %v3661_v25 }
 0x3d4   : > { %4351 = vst.msk [vmem:[%s6562_s11 + $0x320] sm:$0xff] %vm1180_vm0, %v3420_v40 }
 0x3d5   : > { %4418 = vst.msk [vmem:[%s6562_s11 + $0x1b8] sm:$0xff] %vm1180_vm0, %v3662_v19 }
 0x3d6   : > { %v3815_v59 = vpop.f32.mrf.mxu3 }
 0x3d7   : > { %v3816_v2 = vadd.f32 %v7746_v9, %v3815_v59 }
 0x3d8   : > { %v3288_v42 = vpop.f32.mrf.mxu0  ;;  %v3421_v51 = vpop.f32.mrf.mxu1 }
 0x3d9   : > { %4480 = vst.msk [vmem:[%s6562_s11 + $0x3a8] sm:$0xff] %vm1180_vm0, %v3816_v2  ;;  %v3289_v52 = vadd.f32 %v7746_v9, %v3288_v42  ;;  %v3422_v16 = vadd.f32 %v7746_v9, %v3421_v51 }
 0x3da   : > { %v3664_v56 = vpop.f32.mrf.mxu2 }
 0x3db   : > { %4291 = vst.msk [vmem:[%s6562_s11 + $0x140] sm:$0xff] %vm1180_vm0, %v3289_v52  ;;  %v3665_v49 = vadd.f32 %v7746_v9, %v3664_v56 }
 0x3dc   : > { %4352 = vst.msk [vmem:[%s6562_s11 + $0x328] sm:$0xff] %vm1180_vm0, %v3422_v16 }
 0x3dd   : > { %4419 = vst.msk [vmem:[%s6562_s11 + $0x1c0] sm:$0xff] %vm1180_vm0, %v3665_v49 }
 0x3de   : > { %v3818_v28 = vpop.f32.mrf.mxu3 }
 0x3df   : > { %v3819_v44 = vadd.f32 %v7746_v9, %v3818_v28 }
 0x3e0   : > { %v3290_v55 = vpop.f32.mrf.mxu0  ;;  %v3424_v27 = vpop.f32.mrf.mxu1 }
 0x3e1   : > { %4481 = vst.msk [vmem:[%s6562_s11 + $0x3b0] sm:$0xff] %vm1180_vm0, %v3819_v44  ;;  %v3291_v57 = vadd.f32 %v7746_v9, %v3290_v55  ;;  %v3425_v36 = vadd.f32 %v7746_v9, %v3424_v27 }
 0x3e2   : > { %v3666_v3 = vpop.f32.mrf.mxu2 }
 0x3e3   : > { %4292 = vst.msk [vmem:[%s6562_s11 + $0x148] sm:$0xff] %vm1180_vm0, %v3291_v57  ;;  %v3667_v17 = vadd.f32 %v7746_v9, %v3666_v3 }
 0x3e4   : > { %4353 = vst.msk [vmem:[%s6562_s11 + $0x330] sm:$0xff] %vm1180_vm0, %v3425_v36 }
 0x3e5   : > { %4420 = vst.msk [vmem:[%s6562_s11 + $0x1c8] sm:$0xff] %vm1180_vm0, %v3667_v17 }
 0x3e6   : > { %v3820_v18 = vpop.f32.mrf.mxu3 }
 0x3e7   : > { %v3821_v61 = vadd.f32 %v7746_v9, %v3820_v18 }
 0x3e8   : > { %v3293_v50 = vpop.f32.mrf.mxu0  ;;  %v3426_v8 = vpop.f32.mrf.mxu1 }
 0x3e9   : > { %4482 = vst.msk [vmem:[%s6562_s11 + $0x3b8] sm:$0xff] %vm1180_vm0, %v3821_v61  ;;  %v3294_v48 = vadd.f32 %v7746_v9, %v3293_v50  ;;  %v3427_v5 = vadd.f32 %v7746_v9, %v3426_v8 }
 0x3ea   : > { %v3669_v10 = vpop.f32.mrf.mxu2 }
 0x3eb   : > { %4293 = vst.msk [vmem:[%s6562_s11 + $0x150] sm:$0xff] %vm1180_vm0, %v3294_v48  ;;  %v3670_v24 = vadd.f32 %v7746_v9, %v3669_v10 }
 0x3ec   : > { %4354 = vst.msk [vmem:[%s6562_s11 + $0x338] sm:$0xff] %vm1180_vm0, %v3427_v5 }
 0x3ed   : > { %4421 = vst.msk [vmem:[%s6562_s11 + $0x1d0] sm:$0xff] %vm1180_vm0, %v3670_v24 }
 0x3ee   : > { %v3823_v60 = vpop.f32.mrf.mxu3 }
 0x3ef   : > { %v3824_v0 = vadd.f32 %v7746_v9, %v3823_v60 }
 0x3f0   : > { %v3295_v6 = vpop.f32.mrf.mxu0  ;;  %v3429_v35 = vpop.f32.mrf.mxu1 }
 0x3f1   : > { %4483 = vst.msk [vmem:[%s6562_s11 + $0x3c0] sm:$0xff] %vm1180_vm0, %v3824_v0  ;;  %v3296_v39 = vadd.f32 %v7746_v9, %v3295_v6  ;;  %v3430_v20 = vadd.f32 %v7746_v9, %v3429_v35 }
 0x3f2   : > { %v3671_v32 = vpop.f32.mrf.mxu2 }
 0x3f3   : > { %4294 = vst.msk [vmem:[%s6562_s11 + $0x158] sm:$0xff] %vm1180_vm0, %v3296_v39  ;;  %v3672_v14 = vadd.f32 %v7746_v9, %v3671_v32 }
 0x3f4   : > { %4355 = vst.msk [vmem:[%s6562_s11 + $0x340] sm:$0xff] %vm1180_vm0, %v3430_v20 }
 0x3f5   : > { %4422 = vst.msk [vmem:[%s6562_s11 + $0x1d8] sm:$0xff] %vm1180_vm0, %v3672_v14 }
 0x3f6   : > { %v3825_v11 = vpop.f32.mrf.mxu3 }
 0x3f7   : > { %v3826_v30 = vadd.f32 %v7746_v9, %v3825_v11 }
 0x3f8   : > { %v3298_v62 = vpop.f32.mrf.mxu0  ;;  %v3431_v43 = vpop.f32.mrf.mxu1 }
 0x3f9   : > { %4484 = vst.msk [vmem:[%s6562_s11 + $0x3c8] sm:$0xff] %vm1180_vm0, %v3826_v30  ;;  %v3299_v45 = vadd.f32 %v7746_v9, %v3298_v62  ;;  %v3432_v34 = vadd.f32 %v7746_v9, %v3431_v43 }
 0x3fa   : > { %v3674_v31 = vpop.f32.mrf.mxu2 }
 0x3fb   : > { %4295 = vst.msk [vmem:[%s6562_s11 + $0x160] sm:$0xff] %vm1180_vm0, %v3299_v45  ;;  %v3675_v26 = vadd.f32 %v7746_v9, %v3674_v31 }
 0x3fc   : > { %4356 = vst.msk [vmem:[%s6562_s11 + $0x348] sm:$0xff] %vm1180_vm0, %v3432_v34 }
 0x3fd   : > { %4423 = vst.msk [vmem:[%s6562_s11 + $0x1e0] sm:$0xff] %vm1180_vm0, %v3675_v26 }
 0x3fe   : > { %v3828_v21 = vpop.f32.mrf.mxu3 }
 0x3ff   : > { %v3829_v46 = vadd.f32 %v7746_v9, %v3828_v21 }
 0x400   : > { %v3300_v13 = vpop.f32.mrf.mxu0  ;;  %v3434_v53 = vpop.f32.mrf.mxu1 }
 0x401   : > { %4485 = vst.msk [vmem:[%s6562_s11 + $0x3d0] sm:$0xff] %vm1180_vm0, %v3829_v46  ;;  %v3301_v29 = vadd.f32 %v7746_v9, %v3300_v13  ;;  %v3435_v7 = vadd.f32 %v7746_v9, %v3434_v53 }
 0x402   : > { %v3676_v15 = vpop.f32.mrf.mxu2 }
 0x403   : > { %4296 = vst.msk [vmem:[%s6562_s11 + $0x168] sm:$0xff] %vm1180_vm0, %v3301_v29  ;;  %v3677_v12 = vadd.f32 %v7746_v9, %v3676_v15 }
 0x404   : > { %4357 = vst.msk [vmem:[%s6562_s11 + $0x350] sm:$0xff] %vm1180_vm0, %v3435_v7 }
 0x405   : > { %4424 = vst.msk [vmem:[%s6562_s11 + $0x1e8] sm:$0xff] %vm1180_vm0, %v3677_v12 }
 0x406   : > { %v3830_v37 = vpop.f32.mrf.mxu3 }
 0x407   : > { %v3831_v54 = vadd.f32 %v7746_v9, %v3830_v37 }
 0x408   : > { %v3303_v33 = vpop.f32.mrf.mxu0  ;;  %v3436_v22 = vpop.f32.mrf.mxu1 }
 0x409   : > { %4486 = vst.msk [vmem:[%s6562_s11 + $0x3d8] sm:$0xff] %vm1180_vm0, %v3831_v54  ;;  %v3304_v4 = vadd.f32 %v7746_v9, %v3303_v33  ;;  %v3437_v38 = vadd.f32 %v7746_v9, %v3436_v22 }
 0x40a   : > { %v3679_v23 = vpop.f32.mrf.mxu2 }
 0x40b   : > { %4297 = vst.msk [vmem:[%s6562_s11 + $0x170] sm:$0xff] %vm1180_vm0, %v3304_v4  ;;  %v3680_v1 = vadd.f32 %v7746_v9, %v3679_v23 }
 0x40c   : > { %4358 = vst.msk [vmem:[%s6562_s11 + $0x358] sm:$0xff] %vm1180_vm0, %v3437_v38 }
 0x40d   : > { %4425 = vst.msk [vmem:[%s6562_s11 + $0x1f0] sm:$0xff] %vm1180_vm0, %v3680_v1 }
 0x40e   : > { %v3833_v41 = vpop.f32.mrf.mxu3 }
 0x40f   : > { %v3834_v58 = vadd.f32 %v7746_v9, %v3833_v41 }
 0x410   : > { %v3305_v47 = vpop.f32.mrf.mxu0  ;;  %v3439_v63 = vpop.f32.mrf.mxu1 }
 0x411   : > { %4487 = vst.msk [vmem:[%s6562_s11 + $0x3e0] sm:$0xff] %vm1180_vm0, %v3834_v58  ;;  %v3306_v40 = vadd.f32 %v7746_v9, %v3305_v47  ;;  %v3440_v25 = vadd.f32 %v7746_v9, %v3439_v63 }
 0x412   : > { %v3681_v19 = vpop.f32.mrf.mxu2 }
 0x413   : > { %4298 = vst.msk [vmem:[%s6562_s11 + $0x178] sm:$0xff] %vm1180_vm0, %v3306_v40  ;;  %v3682_v59 = vadd.f32 %v7746_v9, %v3681_v19 }
 0x414   : > { %4359 = vst.msk [vmem:[%s6562_s11 + $0x360] sm:$0xff] %vm1180_vm0, %v3440_v25 }
 0x415   : > { %4426 = vst.msk [vmem:[%s6562_s11 + $0x1f8] sm:$0xff] %vm1180_vm0, %v3682_v59 }
 0x416   : > { %v3835_v2 = vpop.f32.mrf.mxu3 }
 0x417   : > { %v3836_v42 = vadd.f32 %v7746_v9, %v3835_v2 }
 0x418   : > { %v3441_v51 = vpop.f32.mrf.mxu1 }
 0x419   : > { %4488 = vst.msk [vmem:[%s6562_s11 + $0x3e8] sm:$0xff] %vm1180_vm0, %v3836_v42  ;;  %v3442_v52 = vadd.f32 %v7746_v9, %v3441_v51 }
 0x41b   : > { %4360 = vst.msk [vmem:[%s6562_s11 + $0x368] sm:$0xff] %vm1180_vm0, %v3442_v52 }
 0x41e   : > { %v3838_v16 = vpop.f32.mrf.mxu3 }
 0x41f   : > { %v3839_v56 = vadd.f32 %v7746_v9, %v3838_v16 }
 0x420   : > { %v3444_v49 = vpop.f32.mrf.mxu1 }
 0x421   : > { %4489 = vst.msk [vmem:[%s6562_s11 + $0x3f0] sm:$0xff] %vm1180_vm0, %v3839_v56  ;;  %v3445_v28 = vadd.f32 %v7746_v9, %v3444_v49 }
 0x423   : > { %4361 = vst.msk [vmem:[%s6562_s11 + $0x370] sm:$0xff] %vm1180_vm0, %v3445_v28 }
 0x426   : > { %v3840_v44 = vpop.f32.mrf.mxu3 }
 0x427   : > { %v3841_v55 = vadd.f32 %v7746_v9, %v3840_v44 }
 0x428   : > { %v3446_v27 = vpop.f32.mrf.mxu1 }
 0x429   : > { %4490 = vst.msk [vmem:[%s6562_s11 + $0x3f8] sm:$0xff] %vm1180_vm0, %v3841_v55  ;;  %v3447_v57 = vadd.f32 %v7746_v9, %v3446_v27 }
 0x42b   : > { %4362 = vst.msk [vmem:[%s6562_s11 + $0x378] sm:$0xff] %vm1180_vm0, %v3447_v57 }
 0x42c PF: > { %s15_s19 = sadd.s32 1, %s4719_s19   ;;  %s8426_s15 = smov %s4711_s17 }
 0x42d   : > { %p12_p11 = scmp.ge.s32.totalorder %s15_s19, 10   ;;  %s8427_s16 = smov %s4715_s18 }
 0x42e   : > { %s8428_s17 = smov %s8431_s21  ;;  %s8429_s18 = smov %s8435_s22 }
 0x42f   :  { %14 = sbr.rel (!%p12_p11) target bundleno = 3 (0x3), region = 88 }
 0x434   :  { %3892 = vsyncpa [#allocation3], 1 }
 0x435   :  { %3894 = vsyncpa [#allocation3 + $0x1], 1 }

</bundles_post_ra>
